<compile_context>
chip_gen: v6e
topology: v6e:2x2x1
jax: 0.10.0
libtpu: 0.0.40
codegen_flags: <defaults>
</compile_context>

<pallas_src>
import math

import numpy as np
import jax
import jax.numpy as jnp
from jax import lax
from jax.experimental import pallas as pl
from jax.experimental.pallas import tpu as pltpu

NEG_SLOPE = 0.2
BN_EPS = 1e-5
K = 4  # every (transposed) conv in the model is 4x4


# ----------------------------------------------------------------------------
# Host-side (numpy, built once per model): separable conv operands.
# Flat activation layout:  X[(b*H + h), (w*C + c)] = x[b, c, h, w]
# A (transposed) conv becomes   out = sum_kh  R[kh] @ X @ N[kh]
#   R[kh]: (B*OH, B*H)   0/1 row gather for vertical tap kh (zero rows = pad)
#   N[kh]: (W*Cin, OW*Cout)  banded matrix holding the weights of tap row kh
# ----------------------------------------------------------------------------
def _prep_conv(w, B, H, s, p):
    """w: PyTorch Conv2d weight (Co, Ci, K, K).  Square images (W == H)."""
    Co, Ci, k, _ = w.shape
    OH = (H + 2 * p - k) // s + 1
    R = np.zeros((k, B * OH, B * H), np.float32)
    N = np.zeros((k, H * Ci, OH * Co), np.float32)
    for kh in range(k):
        for b in range(B):
            for oh in range(OH):
                h = s * oh - p + kh
                if 0 <= h < H:
                    R[kh, b * OH + oh, b * H + h] = 1.0
        for ow in range(OH):
            for kw in range(k):
                wi = s * ow - p + kw
                if 0 <= wi < H:
                    N[kh, wi * Ci:(wi + 1) * Ci,
                      ow * Co:(ow + 1) * Co] = w[:, :, kh, kw].T
    return R, N, OH, Co


def _prep_convT(wt, B, H, s, p):
    """wt: PyTorch ConvTranspose2d weight (Ci, Co, K, K)."""
    Ci, Co, k, _ = wt.shape
    OH = (H - 1) * s - 2 * p + k
    R = np.zeros((k, B * OH, B * H), np.float32)
    N = np.zeros((k, H * Ci, OH * Co), np.float32)
    for kh in range(k):
        for b in range(B):
            for h in range(H):
                oh = s * h - p + kh
                if 0 <= oh < OH:
                    R[kh, b * OH + oh, b * H + h] = 1.0
        for wi in range(H):
            for kw in range(k):
                ow = s * wi - p + kw
                if 0 <= ow < OH:
                    N[kh, wi * Ci:(wi + 1) * Ci,
                      ow * Co:(ow + 1) * Co] = wt[:, :, kh, kw]
    return R, N, OH, Co


def _bn_pool(OW, C):
    """0/1 matmuls that (a) sum the (w,c) lane axis over w -> per-channel,
    and (b) broadcast a per-channel row back to the (w,c) lane layout."""
    red = np.zeros((OW * C, C), np.float32)
    for w in range(OW):
        red[w * C:(w + 1) * C, :] = np.eye(C, dtype=np.float32)
    return red, np.ascontiguousarray(red.T)


# ----------------------------------------------------------------------------
# The fused NetG kernel (entire forward in one pallas_call)
# ----------------------------------------------------------------------------
def _make_netg_kernel(plan):
    def kernel(*refs):
        it = iter(refs)
        x_ref = next(it)
        layer_refs = []
        for e in plan:
            r_ref, n_ref = next(it), next(it)
            bn_refs = (next(it), next(it), next(it), next(it)) if e['bn'] else None
            layer_refs.append((r_ref, n_ref, bn_refs))
        gen_ref, lat_i_ref, lat_o_ref = next(it), next(it), next(it)
        out_refs = {'lat_i': lat_i_ref, 'gen': gen_ref, 'lat_o': lat_o_ref}

        def conv(x, r_ref, n_ref):
            # out = sum_kh (R_kh @ x) @ N_kh : small f32 MXU matmuls carrying
            # the real conv weights; nothing larger than one (32,128) tile is
            # ever live, so no spills and no big patches value (review item 3).
            acc = None
            for kh in range(K):
                g = jnp.dot(r_ref[kh], x, preferred_element_type=jnp.float32)
                t = jnp.dot(g, n_ref[kh], preferred_element_type=jnp.float32)
                acc = t if acc is None else acc + t
            return acc

        def batchnorm(y, bn_refs, inv_n):
            # Training-mode batch statistics (PyTorch default forward).
            # Per-channel stats over rows=(b,h) and the w part of lanes=(w,c):
            # sublane reduce, then a tiny 0/1 pool matmul collapses w; folded
            # per-channel scale/shift are broadcast back with the transposed
            # pool and applied with a single mul + add (review item 9).
            g_ref, b_ref, red_ref, bc_ref = bn_refs
            col_sum = jnp.sum(y, axis=0, keepdims=True)                     # (1, W*C)
            mean_c = jnp.dot(col_sum, red_ref[...],
                             preferred_element_type=jnp.float32) * inv_n    # (1, C)
            mean = jnp.dot(mean_c, bc_ref[...],
                           preferred_element_type=jnp.float32)              # (1, W*C)
            centered = y - mean
            var_c = jnp.dot(jnp.sum(centered * centered, axis=0, keepdims=True),
                            red_ref[...], preferred_element_type=jnp.float32) * inv_n
            scale_c = g_ref[...] * lax.rsqrt(var_c + BN_EPS)                # (1, C)
            scale = jnp.dot(scale_c, bc_ref[...], preferred_element_type=jnp.float32)
            shift = jnp.dot(b_ref[...], bc_ref[...], preferred_element_type=jnp.float32)
            return centered * scale + shift

        y = x_ref[...]
        for e, (r_ref, n_ref, bn_refs) in zip(plan, layer_refs):
            y = conv(y, r_ref, n_ref)
            if e['bn']:
                y = batchnorm(y, bn_refs, e['inv_n'])
            act = e['act']
            if act == 'lrelu':
                y = jnp.where(y >= 0, y, NEG_SLOPE * y)
            elif act == 'relu':
                y = jnp.maximum(y, 0.0)
            elif act == 'tanh':
                y = jnp.tanh(y)
            if e['store'] is not None:
                out_refs[e['store']][...] = y

    return kernel


def _full_spec(shape):
    zeros = (0,) * len(shape)
    return pl.BlockSpec(tuple(shape), lambda: zeros)


# ----------------------------------------------------------------------------
# Parameter init (PyTorch layouts) + one-time packing of kernel inputs
# ----------------------------------------------------------------------------
def init_netg_params(key, isize, nz, nc, ngf):
    assert isize % 16 == 0 and (isize & (isize - 1)) == 0
    P = int(round(math.log2(isize))) - 3   # number of pyramid layers

    def normal(k, shape, scale=0.05):
        return scale * jax.random.normal(k, shape, jnp.float32)

    def make_encoder(k):
        keys = iter(jax.random.split(k, 3 * (P + 2)))
        layers = [dict(kind='conv', w=normal(next(keys), (ngf, nc, K, K)),
                       bn=False, act='lrelu')]
        cndf = ngf
        for _ in range(P):
            layers.append(dict(
                kind='conv', w=normal(next(keys), (2 * cndf, cndf, K, K)), bn=True,
                gamma=1.0 + 0.1 * jax.random.normal(next(keys), (1, 2 * cndf), jnp.float32),
                beta=0.1 * jax.random.normal(next(keys), (1, 2 * cndf), jnp.float32),
                act='lrelu'))
            cndf *= 2
        layers.append(dict(kind='conv', w=normal(next(keys), (nz, cndf, K, K)),
                           bn=False, act='none'))
        return layers

    def make_decoder(k):
        keys = iter(jax.random.split(k, 3 * (P + 2)))
        cngf = (ngf // 2) * (isize // 4)
        layers = [dict(
            kind='convT', w=normal(next(keys), (nz, cngf, K, K)), bn=True,
            gamma=1.0 + 0.1 * jax.random.normal(next(keys), (1, cngf), jnp.float32),
            beta=0.1 * jax.random.normal(next(keys), (1, cngf), jnp.float32),
            act='relu')]
        for _ in range(P):
            layers.append(dict(
                kind='convT', w=normal(next(keys), (cngf, cngf // 2, K, K)), bn=True,
                gamma=1.0 + 0.1 * jax.random.normal(next(keys), (1, cngf // 2), jnp.float32),
                beta=0.1 * jax.random.normal(next(keys), (1, cngf // 2), jnp.float32),
                act='relu'))
            cngf //= 2
        layers.append(dict(kind='convT', w=normal(next(keys), (cngf, nc, K, K)),
                           bn=False, act='tanh'))
        return layers

    k1, k2, k3 = jax.random.split(key, 3)
    return {'enc1': make_encoder(k1), 'dec': make_decoder(k2), 'enc2': make_encoder(k3)}


def _prepare_inputs(params, batch, isize):
    """Fold the conv weights into the separable R/N operands — done ONCE."""
    P = len(params['enc1']) - 2
    enc_specs = [(2, 1)] * (P + 1) + [(1, 0)]
    dec_specs = [(1, 0)] + [(2, 1)] * (P + 1)

    inputs, plan = [], []
    pool_cache = {}

    def pool(OW, C):
        if (OW, C) not in pool_cache:
            red, bc = _bn_pool(OW, C)
            pool_cache[(OW, C)] = (jnp.asarray(red), jnp.asarray(bc))
        return pool_cache[(OW, C)]

    def add(layers, specs, H, store_last):
        for layer, (s, p) in zip(layers, specs):
            w = np.asarray(layer['w'])
            if layer['kind'] == 'conv':
                R, N, OH, Co = _prep_conv(w, batch, H, s, p)
            else:
                R, N, OH, Co = _prep_convT(w, batch, H, s, p)
            inputs.extend([jnp.asarray(R), jnp.asarray(N)])
            entry = dict(bn=layer['bn'], act=layer['act'], store=None,
                         inv_n=1.0 / float(batch * OH * OH))
            if layer['bn']:
                red, bc = pool(OH, Co)
                inputs.extend([layer['gamma'], layer['beta'], red, bc])
            plan.append(entry)
            H = OH
        plan[-1]['store'] = store_last
        return H

    H = add(params['enc1'], enc_specs, isize, 'lat_i')
    assert H == 1
    H = add(params['dec'], dec_specs, 1, 'gen')
    assert H == isize
    H = add(params['enc2'], enc_specs, isize, 'lat_o')
    assert H == 1
    return inputs, plan


def build_netg(params, batch, isize):
    nc = params['enc1'][0]['w'].shape[1]
    nz = params['enc1'][-1]['w'].shape[0]
    prepared, plan = _prepare_inputs(params, batch, isize)   # packed once
    kernel = _make_netg_kernel(plan)

    x_rows, x_cols = batch * isize, isize * nc
    out_shape = (jax.ShapeDtypeStruct((x_rows, x_cols), jnp.float32),   # gen (flat)
                 jax.ShapeDtypeStruct((batch, nz), jnp.float32),        # latent_i
                 jax.ShapeDtypeStruct((batch, nz), jnp.float32))        # latent_o

    call = pl.pallas_call(
        kernel,
        out_shape=out_shape,
        in_specs=[_full_spec((x_rows, x_cols))]
                 + [_full_spec(tuple(a.shape)) for a in prepared],
        out_specs=tuple(_full_spec(tuple(s.shape)) for s in out_shape),
        compiler_params=pltpu.CompilerParams(vmem_limit_bytes=16 * 1024 * 1024),
    )

    @jax.jit
    def forward(x, *prep):
        B, C, H, W = x.shape
        x2 = jnp.transpose(x, (0, 2, 3, 1)).reshape(B * H, W * C)
        gen2, lat_i, lat_o = call(x2, *prep)
        gen = jnp.transpose(gen2.reshape(B, H, W, C), (0, 3, 1, 2))
        return gen, lat_i.reshape(B, nz, 1, 1), lat_o.reshape(B, nz, 1, 1)

    return lambda x: forward(x, *prepared)


# ----------------------------------------------------------------------------
# Pure-JAX reference (lax convolutions) for the correctness check
# ----------------------------------------------------------------------------
def _ref_bn(y, gamma, beta):
    mean = jnp.mean(y, axis=(0, 2, 3), keepdims=True)
    var = jnp.mean((y - mean) ** 2, axis=(0, 2, 3), keepdims=True)
    yhat = (y - mean) * lax.rsqrt(var + BN_EPS)
    return yhat * gamma.reshape(1, -1, 1, 1) + beta.reshape(1, -1, 1, 1)


def _ref_conv(x, w, s, p):
    return lax.conv_general_dilated(
        x, w, (s, s), [(p, p), (p, p)],
        dimension_numbers=("NCHW", "OIHW", "NCHW"),
        precision=lax.Precision.HIGHEST)


def _ref_convT(x, wT, s, p):
    w = jnp.flip(wT, (2, 3)).transpose(1, 0, 2, 3)
    return lax.conv_general_dilated(
        x, w, (1, 1), [(K - 1 - p, K - 1 - p)] * 2, lhs_dilation=(s, s),
        dimension_numbers=("NCHW", "OIHW", "NCHW"),
        precision=lax.Precision.HIGHEST)


def ref_netg(params, x):
    def run_encoder(layers, y):
        specs = [(2, 1)] * (len(layers) - 1) + [(1, 0)]
        for layer, (s, p) in zip(layers, specs):
            y = _ref_conv(y, layer['w'], s, p)
            if layer['bn']:
                y = _ref_bn(y, layer['gamma'], layer['beta'])
            if layer['act'] == 'lrelu':
                y = jnp.where(y >= 0, y, NEG_SLOPE * y)
        return y

    def run_decoder(layers, y):
        specs = [(1, 0)] + [(2, 1)] * (len(layers) - 1)
        for layer, (s, p) in zip(layers, specs):
            y = _ref_convT(y, layer['w'], s, p)
            if layer['bn']:
                y = _ref_bn(y, layer['gamma'], layer['beta'])
            if layer['act'] == 'relu':
                y = jnp.maximum(y, 0.0)
            elif layer['act'] == 'tanh':
                y = jnp.tanh(y)
        return y

    lat_i = run_encoder(params['enc1'], x)
    gen = run_decoder(params['dec'], lat_i)
    lat_o = run_encoder(params['enc2'], gen)
    return gen, lat_i, lat_o


if __name__ == "__main__":
    B, NC, ISIZE, NGF, NZ = 2, 3, 16, 8, 8

    key = jax.random.PRNGKey(0)
    kx, kp = jax.random.split(key)
    x = jax.random.normal(kx, (B, NC, ISIZE, ISIZE), jnp.float32)
    params = init_netg_params(kp, ISIZE, NZ, NC, NGF)

    netg = build_netg(params, B, ISIZE)
    gen, lat_i, lat_o = jax.block_until_ready(netg(x))

    assert gen.shape == (B, NC, ISIZE, ISIZE), gen.shape
    assert lat_i.shape == (B, NZ, 1, 1), lat_i.shape
    assert lat_o.shape == (B, NZ, 1, 1), lat_o.shape

    gen_r, lat_i_r, lat_o_r = ref_netg(params, x)
    for name, a, b in (("gen_imag", gen, gen_r),
                       ("latent_i", lat_i, lat_i_r),
                       ("latent_o", lat_o, lat_o_r)):
        err = float(jnp.max(jnp.abs(a - b)))
        assert err < 3e-3, (name, err)

    print("KERNEL_OK")
</pallas_src>

<mosaic_0001>
module attributes {stable_mosaic.version = 11 : i64} {
  func.func @kernel(%arg0: memref<32x48xf32, #tpu.memory_space<vmem>>, %arg1: memref<4x16x32xf32, #tpu.memory_space<vmem>>, %arg2: memref<4x48x64xf32, #tpu.memory_space<vmem>>, %arg3: memref<4x8x16xf32, #tpu.memory_space<vmem>>, %arg4: memref<4x64x64xf32, #tpu.memory_space<vmem>>, %arg5: memref<1x16xf32, #tpu.memory_space<vmem>>, %arg6: memref<1x16xf32, #tpu.memory_space<vmem>>, %arg7: memref<64x16xf32, #tpu.memory_space<vmem>>, %arg8: memref<16x64xf32, #tpu.memory_space<vmem>>, %arg9: memref<4x2x8xf32, #tpu.memory_space<vmem>>, %arg10: memref<4x64x8xf32, #tpu.memory_space<vmem>>, %arg11: memref<4x8x2xf32, #tpu.memory_space<vmem>>, %arg12: memref<4x8x64xf32, #tpu.memory_space<vmem>>, %arg13: memref<1x16xf32, #tpu.memory_space<vmem>>, %arg14: memref<1x16xf32, #tpu.memory_space<vmem>>, %arg15: memref<64x16xf32, #tpu.memory_space<vmem>>, %arg16: memref<16x64xf32, #tpu.memory_space<vmem>>, %arg17: memref<4x16x8xf32, #tpu.memory_space<vmem>>, %arg18: memref<4x64x64xf32, #tpu.memory_space<vmem>>, %arg19: memref<1x8xf32, #tpu.memory_space<vmem>>, %arg20: memref<1x8xf32, #tpu.memory_space<vmem>>, %arg21: memref<64x8xf32, #tpu.memory_space<vmem>>, %arg22: memref<8x64xf32, #tpu.memory_space<vmem>>, %arg23: memref<4x32x16xf32, #tpu.memory_space<vmem>>, %arg24: memref<4x64x48xf32, #tpu.memory_space<vmem>>, %arg25: memref<4x16x32xf32, #tpu.memory_space<vmem>>, %arg26: memref<4x48x64xf32, #tpu.memory_space<vmem>>, %arg27: memref<4x8x16xf32, #tpu.memory_space<vmem>>, %arg28: memref<4x64x64xf32, #tpu.memory_space<vmem>>, %arg29: memref<1x16xf32, #tpu.memory_space<vmem>>, %arg30: memref<1x16xf32, #tpu.memory_space<vmem>>, %arg31: memref<64x16xf32, #tpu.memory_space<vmem>>, %arg32: memref<16x64xf32, #tpu.memory_space<vmem>>, %arg33: memref<4x2x8xf32, #tpu.memory_space<vmem>>, %arg34: memref<4x64x8xf32, #tpu.memory_space<vmem>>, %arg35: memref<32x48xf32, #tpu.memory_space<vmem>>, %arg36: memref<2x8xf32, #tpu.memory_space<vmem>>, %arg37: memref<2x8xf32, #tpu.memory_space<vmem>>) attributes {dimension_semantics = [], scalar_prefetch = 0 : i64, scratch_operands = 0 : i64, tpu.core_type = #tpu.core_type<tc>} {
    %c0 = arith.constant 0 : index
    %c0_0 = arith.constant 0 : index
    %0 = vector.load %arg0[%c0, %c0_0] : memref<32x48xf32, #tpu.memory_space<vmem>>, vector<32x48xf32>
    %c0_1 = arith.constant 0 : index
    %c0_2 = arith.constant 0 : index
    %c0_3 = arith.constant 0 : index
    %1 = vector.load %arg1[%c0_1, %c0_2, %c0_3] : memref<4x16x32xf32, #tpu.memory_space<vmem>>, vector<1x16x32xf32>
    %2 = vector.shape_cast %1 : vector<1x16x32xf32> to vector<16x32xf32>
    %cst = arith.constant dense<0.000000e+00> : vector<16x48xf32>
    %3 = tpu.matmul %2, %0, %cst {dimension_numbers = #tpu.dot_dimension_numbers<[1], [0], [0], [1], [0, 0, 1, 1], [], []>} : vector<16x32xf32>, vector<32x48xf32>, vector<16x48xf32> -> vector<16x48xf32>
    %c0_4 = arith.constant 0 : index
    %c0_5 = arith.constant 0 : index
    %c0_6 = arith.constant 0 : index
    %4 = vector.load %arg2[%c0_4, %c0_5, %c0_6] : memref<4x48x64xf32, #tpu.memory_space<vmem>>, vector<1x48x64xf32>
    %5 = vector.shape_cast %4 : vector<1x48x64xf32> to vector<48x64xf32>
    %cst_7 = arith.constant dense<0.000000e+00> : vector<16x64xf32>
    %6 = tpu.matmul %3, %5, %cst_7 {dimension_numbers = #tpu.dot_dimension_numbers<[1], [0], [0], [1], [0, 0, 1, 1], [], []>} : vector<16x48xf32>, vector<48x64xf32>, vector<16x64xf32> -> vector<16x64xf32>
    %c1 = arith.constant 1 : index
    %c0_8 = arith.constant 0 : index
    %c0_9 = arith.constant 0 : index
    %7 = vector.load %arg1[%c1, %c0_8, %c0_9] : memref<4x16x32xf32, #tpu.memory_space<vmem>>, vector<1x16x32xf32>
    %8 = vector.shape_cast %7 : vector<1x16x32xf32> to vector<16x32xf32>
    %cst_10 = arith.constant dense<0.000000e+00> : vector<16x48xf32>
    %9 = tpu.matmul %8, %0, %cst_10 {dimension_numbers = #tpu.dot_dimension_numbers<[1], [0], [0], [1], [0, 0, 1, 1], [], []>} : vector<16x32xf32>, vector<32x48xf32>, vector<16x48xf32> -> vector<16x48xf32>
    %c1_11 = arith.constant 1 : index
    %c0_12 = arith.constant 0 : index
    %c0_13 = arith.constant 0 : index
    %10 = vector.load %arg2[%c1_11, %c0_12, %c0_13] : memref<4x48x64xf32, #tpu.memory_space<vmem>>, vector<1x48x64xf32>
    %11 = vector.shape_cast %10 : vector<1x48x64xf32> to vector<48x64xf32>
    %cst_14 = arith.constant dense<0.000000e+00> : vector<16x64xf32>
    %12 = tpu.matmul %9, %11, %cst_14 {dimension_numbers = #tpu.dot_dimension_numbers<[1], [0], [0], [1], [0, 0, 1, 1], [], []>} : vector<16x48xf32>, vector<48x64xf32>, vector<16x64xf32> -> vector<16x64xf32>
    %13 = arith.addf %6, %12 : vector<16x64xf32>
    %c2 = arith.constant 2 : index
    %c0_15 = arith.constant 0 : index
    %c0_16 = arith.constant 0 : index
    %14 = vector.load %arg1[%c2, %c0_15, %c0_16] : memref<4x16x32xf32, #tpu.memory_space<vmem>>, vector<1x16x32xf32>
    %15 = vector.shape_cast %14 : vector<1x16x32xf32> to vector<16x32xf32>
    %cst_17 = arith.constant dense<0.000000e+00> : vector<16x48xf32>
    %16 = tpu.matmul %15, %0, %cst_17 {dimension_numbers = #tpu.dot_dimension_numbers<[1], [0], [0], [1], [0, 0, 1, 1], [], []>} : vector<16x32xf32>, vector<32x48xf32>, vector<16x48xf32> -> vector<16x48xf32>
    %c2_18 = arith.constant 2 : index
    %c0_19 = arith.constant 0 : index
    %c0_20 = arith.constant 0 : index
    %17 = vector.load %arg2[%c2_18, %c0_19, %c0_20] : memref<4x48x64xf32, #tpu.memory_space<vmem>>, vector<1x48x64xf32>
    %18 = vector.shape_cast %17 : vector<1x48x64xf32> to vector<48x64xf32>
    %cst_21 = arith.constant dense<0.000000e+00> : vector<16x64xf32>
    %19 = tpu.matmul %16, %18, %cst_21 {dimension_numbers = #tpu.dot_dimension_numbers<[1], [0], [0], [1], [0, 0, 1, 1], [], []>} : vector<16x48xf32>, vector<48x64xf32>, vector<16x64xf32> -> vector<16x64xf32>
    %20 = arith.addf %13, %19 : vector<16x64xf32>
    %c3 = arith.constant 3 : index
    %c0_22 = arith.constant 0 : index
    %c0_23 = arith.constant 0 : index
    %21 = vector.load %arg1[%c3, %c0_22, %c0_23] : memref<4x16x32xf32, #tpu.memory_space<vmem>>, vector<1x16x32xf32>
    %22 = vector.shape_cast %21 : vector<1x16x32xf32> to vector<16x32xf32>
    %cst_24 = arith.constant dense<0.000000e+00> : vector<16x48xf32>
    %23 = tpu.matmul %22, %0, %cst_24 {dimension_numbers = #tpu.dot_dimension_numbers<[1], [0], [0], [1], [0, 0, 1, 1], [], []>} : vector<16x32xf32>, vector<32x48xf32>, vector<16x48xf32> -> vector<16x48xf32>
    %c3_25 = arith.constant 3 : index
    %c0_26 = arith.constant 0 : index
    %c0_27 = arith.constant 0 : index
    %24 = vector.load %arg2[%c3_25, %c0_26, %c0_27] : memref<4x48x64xf32, #tpu.memory_space<vmem>>, vector<1x48x64xf32>
    %25 = vector.shape_cast %24 : vector<1x48x64xf32> to vector<48x64xf32>
    %cst_28 = arith.constant dense<0.000000e+00> : vector<16x64xf32>
    %26 = tpu.matmul %23, %25, %cst_28 {dimension_numbers = #tpu.dot_dimension_numbers<[1], [0], [0], [1], [0, 0, 1, 1], [], []>} : vector<16x48xf32>, vector<48x64xf32>, vector<16x64xf32> -> vector<16x64xf32>
    %27 = arith.addf %20, %26 : vector<16x64xf32>
    %cst_29 = arith.constant 0.000000e+00 : f32
    %28 = vector.broadcast %cst_29 : f32 to vector<16x64xf32>
    %29 = arith.cmpf oge, %27, %28 : vector<16x64xf32>
    %cst_30 = arith.constant 2.000000e-01 : f32
    %30 = vector.broadcast %cst_30 : f32 to vector<16x64xf32>
    %31 = arith.mulf %30, %27 : vector<16x64xf32>
    %32 = arith.select %29, %27, %31 : vector<16x64xi1>, vector<16x64xf32>
    %c0_31 = arith.constant 0 : index
    %c0_32 = arith.constant 0 : index
    %c0_33 = arith.constant 0 : index
    %33 = vector.load %arg3[%c0_31, %c0_32, %c0_33] : memref<4x8x16xf32, #tpu.memory_space<vmem>>, vector<1x8x16xf32>
    %34 = vector.shape_cast %33 : vector<1x8x16xf32> to vector<8x16xf32>
    %cst_34 = arith.constant dense<0.000000e+00> : vector<8x64xf32>
    %35 = tpu.matmul %34, %32, %cst_34 {dimension_numbers = #tpu.dot_dimension_numbers<[1], [0], [0], [1], [0, 0, 1, 1], [], []>} : vector<8x16xf32>, vector<16x64xf32>, vector<8x64xf32> -> vector<8x64xf32>
    %c0_35 = arith.constant 0 : index
    %c0_36 = arith.constant 0 : index
    %c0_37 = arith.constant 0 : index
    %36 = vector.load %arg4[%c0_35, %c0_36, %c0_37] : memref<4x64x64xf32, #tpu.memory_space<vmem>>, vector<1x64x64xf32>
    %37 = vector.shape_cast %36 : vector<1x64x64xf32> to vector<64x64xf32>
    %cst_38 = arith.constant dense<0.000000e+00> : vector<8x64xf32>
    %38 = tpu.matmul %35, %37, %cst_38 {dimension_numbers = #tpu.dot_dimension_numbers<[1], [0], [0], [1], [0, 0, 1, 1], [], []>} : vector<8x64xf32>, vector<64x64xf32>, vector<8x64xf32> -> vector<8x64xf32>
    %c1_39 = arith.constant 1 : index
    %c0_40 = arith.constant 0 : index
    %c0_41 = arith.constant 0 : index
    %39 = vector.load %arg3[%c1_39, %c0_40, %c0_41] : memref<4x8x16xf32, #tpu.memory_space<vmem>>, vector<1x8x16xf32>
    %40 = vector.shape_cast %39 : vector<1x8x16xf32> to vector<8x16xf32>
    %cst_42 = arith.constant dense<0.000000e+00> : vector<8x64xf32>
    %41 = tpu.matmul %40, %32, %cst_42 {dimension_numbers = #tpu.dot_dimension_numbers<[1], [0], [0], [1], [0, 0, 1, 1], [], []>} : vector<8x16xf32>, vector<16x64xf32>, vector<8x64xf32> -> vector<8x64xf32>
    %c1_43 = arith.constant 1 : index
    %c0_44 = arith.constant 0 : index
    %c0_45 = arith.constant 0 : index
    %42 = vector.load %arg4[%c1_43, %c0_44, %c0_45] : memref<4x64x64xf32, #tpu.memory_space<vmem>>, vector<1x64x64xf32>
    %43 = vector.shape_cast %42 : vector<1x64x64xf32> to vector<64x64xf32>
    %cst_46 = arith.constant dense<0.000000e+00> : vector<8x64xf32>
    %44 = tpu.matmul %41, %43, %cst_46 {dimension_numbers = #tpu.dot_dimension_numbers<[1], [0], [0], [1], [0, 0, 1, 1], [], []>} : vector<8x64xf32>, vector<64x64xf32>, vector<8x64xf32> -> vector<8x64xf32>
    %45 = arith.addf %38, %44 : vector<8x64xf32>
    %c2_47 = arith.constant 2 : index
    %c0_48 = arith.constant 0 : index
    %c0_49 = arith.constant 0 : index
    %46 = vector.load %arg3[%c2_47, %c0_48, %c0_49] : memref<4x8x16xf32, #tpu.memory_space<vmem>>, vector<1x8x16xf32>
    %47 = vector.shape_cast %46 : vector<1x8x16xf32> to vector<8x16xf32>
    %cst_50 = arith.constant dense<0.000000e+00> : vector<8x64xf32>
    %48 = tpu.matmul %47, %32, %cst_50 {dimension_numbers = #tpu.dot_dimension_numbers<[1], [0], [0], [1], [0, 0, 1, 1], [], []>} : vector<8x16xf32>, vector<16x64xf32>, vector<8x64xf32> -> vector<8x64xf32>
    %c2_51 = arith.constant 2 : index
    %c0_52 = arith.constant 0 : index
    %c0_53 = arith.constant 0 : index
    %49 = vector.load %arg4[%c2_51, %c0_52, %c0_53] : memref<4x64x64xf32, #tpu.memory_space<vmem>>, vector<1x64x64xf32>
    %50 = vector.shape_cast %49 : vector<1x64x64xf32> to vector<64x64xf32>
    %cst_54 = arith.constant dense<0.000000e+00> : vector<8x64xf32>
    %51 = tpu.matmul %48, %50, %cst_54 {dimension_numbers = #tpu.dot_dimension_numbers<[1], [0], [0], [1], [0, 0, 1, 1], [], []>} : vector<8x64xf32>, vector<64x64xf32>, vector<8x64xf32> -> vector<8x64xf32>
    %52 = arith.addf %45, %51 : vector<8x64xf32>
    %c3_55 = arith.constant 3 : index
    %c0_56 = arith.constant 0 : index
    %c0_57 = arith.constant 0 : index
    %53 = vector.load %arg3[%c3_55, %c0_56, %c0_57] : memref<4x8x16xf32, #tpu.memory_space<vmem>>, vector<1x8x16xf32>
    %54 = vector.shape_cast %53 : vector<1x8x16xf32> to vector<8x16xf32>
    %cst_58 = arith.constant dense<0.000000e+00> : vector<8x64xf32>
    %55 = tpu.matmul %54, %32, %cst_58 {dimension_numbers = #tpu.dot_dimension_numbers<[1], [0], [0], [1], [0, 0, 1, 1], [], []>} : vector<8x16xf32>, vector<16x64xf32>, vector<8x64xf32> -> vector<8x64xf32>
    %c3_59 = arith.constant 3 : index
    %c0_60 = arith.constant 0 : index
    %c0_61 = arith.constant 0 : index
    %56 = vector.load %arg4[%c3_59, %c0_60, %c0_61] : memref<4x64x64xf32, #tpu.memory_space<vmem>>, vector<1x64x64xf32>
    %57 = vector.shape_cast %56 : vector<1x64x64xf32> to vector<64x64xf32>
    %cst_62 = arith.constant dense<0.000000e+00> : vector<8x64xf32>
    %58 = tpu.matmul %55, %57, %cst_62 {dimension_numbers = #tpu.dot_dimension_numbers<[1], [0], [0], [1], [0, 0, 1, 1], [], []>} : vector<8x64xf32>, vector<64x64xf32>, vector<8x64xf32> -> vector<8x64xf32>
    %59 = arith.addf %52, %58 : vector<8x64xf32>
    %cst_63 = arith.constant dense<0.000000e+00> : vector<64xf32>
    %60 = vector.multi_reduction <add>, %59, %cst_63 [0] : vector<8x64xf32> to vector<64xf32>
    %61 = vector.shape_cast %60 : vector<64xf32> to vector<1x64xf32>
    %c0_64 = arith.constant 0 : index
    %c0_65 = arith.constant 0 : index
    %62 = vector.load %arg7[%c0_64, %c0_65] : memref<64x16xf32, #tpu.memory_space<vmem>>, vector<64x16xf32>
    %cst_66 = arith.constant dense<0.000000e+00> : vector<1x16xf32>
    %63 = tpu.matmul %61, %62, %cst_66 {dimension_numbers = #tpu.dot_dimension_numbers<[1], [0], [0], [1], [0, 0, 1, 1], [], []>} : vector<1x64xf32>, vector<64x16xf32>, vector<1x16xf32> -> vector<1x16xf32>
    %cst_67 = arith.constant 3.125000e-02 : f32
    %64 = vector.broadcast %cst_67 : f32 to vector<1x16xf32>
    %65 = arith.mulf %63, %64 : vector<1x16xf32>
    %c0_68 = arith.constant 0 : index
    %c0_69 = arith.constant 0 : index
    %66 = vector.load %arg8[%c0_68, %c0_69] : memref<16x64xf32, #tpu.memory_space<vmem>>, vector<16x64xf32>
    %cst_70 = arith.constant dense<0.000000e+00> : vector<1x64xf32>
    %67 = tpu.matmul %65, %66, %cst_70 {dimension_numbers = #tpu.dot_dimension_numbers<[1], [0], [0], [1], [0, 0, 1, 1], [], []>} : vector<1x16xf32>, vector<16x64xf32>, vector<1x64xf32> -> vector<1x64xf32>
    %68 = vector.broadcast %67 : vector<1x64xf32> to vector<8x64xf32>
    %69 = arith.subf %59, %68 : vector<8x64xf32>
    %70 = arith.mulf %69, %69 : vector<8x64xf32>
    %cst_71 = arith.constant dense<0.000000e+00> : vector<64xf32>
    %71 = vector.multi_reduction <add>, %70, %cst_71 [0] : vector<8x64xf32> to vector<64xf32>
    %72 = vector.shape_cast %71 : vector<64xf32> to vector<1x64xf32>
    %c0_72 = arith.constant 0 : index
    %c0_73 = arith.constant 0 : index
    %73 = vector.load %arg7[%c0_72, %c0_73] : memref<64x16xf32, #tpu.memory_space<vmem>>, vector<64x16xf32>
    %cst_74 = arith.constant dense<0.000000e+00> : vector<1x16xf32>
    %74 = tpu.matmul %72, %73, %cst_74 {dimension_numbers = #tpu.dot_dimension_numbers<[1], [0], [0], [1], [0, 0, 1, 1], [], []>} : vector<1x64xf32>, vector<64x16xf32>, vector<1x16xf32> -> vector<1x16xf32>
    %cst_75 = arith.constant 3.125000e-02 : f32
    %75 = vector.broadcast %cst_75 : f32 to vector<1x16xf32>
    %76 = arith.mulf %74, %75 : vector<1x16xf32>
    %c0_76 = arith.constant 0 : index
    %c0_77 = arith.constant 0 : index
    %77 = vector.load %arg5[%c0_76, %c0_77] : memref<1x16xf32, #tpu.memory_space<vmem>>, vector<1x16xf32>
    %cst_78 = arith.constant 9.99999974E-6 : f32
    %78 = vector.broadcast %cst_78 : f32 to vector<1x16xf32>
    %79 = arith.addf %76, %78 : vector<1x16xf32>
    %80 = math.rsqrt %79 : vector<1x16xf32>
    %81 = arith.mulf %77, %80 : vector<1x16xf32>
    %c0_79 = arith.constant 0 : index
    %c0_80 = arith.constant 0 : index
    %82 = vector.load %arg8[%c0_79, %c0_80] : memref<16x64xf32, #tpu.memory_space<vmem>>, vector<16x64xf32>
    %cst_81 = arith.constant dense<0.000000e+00> : vector<1x64xf32>
    %83 = tpu.matmul %81, %82, %cst_81 {dimension_numbers = #tpu.dot_dimension_numbers<[1], [0], [0], [1], [0, 0, 1, 1], [], []>} : vector<1x16xf32>, vector<16x64xf32>, vector<1x64xf32> -> vector<1x64xf32>
    %c0_82 = arith.constant 0 : index
    %c0_83 = arith.constant 0 : index
    %84 = vector.load %arg6[%c0_82, %c0_83] : memref<1x16xf32, #tpu.memory_space<vmem>>, vector<1x16xf32>
    %c0_84 = arith.constant 0 : index
    %c0_85 = arith.constant 0 : index
    %85 = vector.load %arg8[%c0_84, %c0_85] : memref<16x64xf32, #tpu.memory_space<vmem>>, vector<16x64xf32>
    %cst_86 = arith.constant dense<0.000000e+00> : vector<1x64xf32>
    %86 = tpu.matmul %84, %85, %cst_86 {dimension_numbers = #tpu.dot_dimension_numbers<[1], [0], [0], [1], [0, 0, 1, 1], [], []>} : vector<1x16xf32>, vector<16x64xf32>, vector<1x64xf32> -> vector<1x64xf32>
    %87 = vector.broadcast %83 : vector<1x64xf32> to vector<8x64xf32>
    %88 = arith.mulf %69, %87 : vector<8x64xf32>
    %89 = vector.broadcast %86 : vector<1x64xf32> to vector<8x64xf32>
    %90 = arith.addf %88, %89 : vector<8x64xf32>
    %cst_87 = arith.constant 0.000000e+00 : f32
    %91 = vector.broadcast %cst_87 : f32 to vector<8x64xf32>
    %92 = arith.cmpf oge, %90, %91 : vector<8x64xf32>
    %cst_88 = arith.constant 2.000000e-01 : f32
    %93 = vector.broadcast %cst_88 : f32 to vector<8x64xf32>
    %94 = arith.mulf %93, %90 : vector<8x64xf32>
    %95 = arith.select %92, %90, %94 : vector<8x64xi1>, vector<8x64xf32>
    %c0_89 = arith.constant 0 : index
    %c0_90 = arith.constant 0 : index
    %c0_91 = arith.constant 0 : index
    %96 = vector.load %arg9[%c0_89, %c0_90, %c0_91] : memref<4x2x8xf32, #tpu.memory_space<vmem>>, vector<1x2x8xf32>
    %97 = vector.shape_cast %96 : vector<1x2x8xf32> to vector<2x8xf32>
    %cst_92 = arith.constant dense<0.000000e+00> : vector<2x64xf32>
    %98 = tpu.matmul %97, %95, %cst_92 {dimension_numbers = #tpu.dot_dimension_numbers<[1], [0], [0], [1], [0, 0, 1, 1], [], []>} : vector<2x8xf32>, vector<8x64xf32>, vector<2x64xf32> -> vector<2x64xf32>
    %c0_93 = arith.constant 0 : index
    %c0_94 = arith.constant 0 : index
    %c0_95 = arith.constant 0 : index
    %99 = vector.load %arg10[%c0_93, %c0_94, %c0_95] : memref<4x64x8xf32, #tpu.memory_space<vmem>>, vector<1x64x8xf32>
    %100 = vector.shape_cast %99 : vector<1x64x8xf32> to vector<64x8xf32>
    %cst_96 = arith.constant dense<0.000000e+00> : vector<2x8xf32>
    %101 = tpu.matmul %98, %100, %cst_96 {dimension_numbers = #tpu.dot_dimension_numbers<[1], [0], [0], [1], [0, 0, 1, 1], [], []>} : vector<2x64xf32>, vector<64x8xf32>, vector<2x8xf32> -> vector<2x8xf32>
    %c1_97 = arith.constant 1 : index
    %c0_98 = arith.constant 0 : index
    %c0_99 = arith.constant 0 : index
    %102 = vector.load %arg9[%c1_97, %c0_98, %c0_99] : memref<4x2x8xf32, #tpu.memory_space<vmem>>, vector<1x2x8xf32>
    %103 = vector.shape_cast %102 : vector<1x2x8xf32> to vector<2x8xf32>
    %cst_100 = arith.constant dense<0.000000e+00> : vector<2x64xf32>
    %104 = tpu.matmul %103, %95, %cst_100 {dimension_numbers = #tpu.dot_dimension_numbers<[1], [0], [0], [1], [0, 0, 1, 1], [], []>} : vector<2x8xf32>, vector<8x64xf32>, vector<2x64xf32> -> vector<2x64xf32>
    %c1_101 = arith.constant 1 : index
    %c0_102 = arith.constant 0 : index
    %c0_103 = arith.constant 0 : index
    %105 = vector.load %arg10[%c1_101, %c0_102, %c0_103] : memref<4x64x8xf32, #tpu.memory_space<vmem>>, vector<1x64x8xf32>
    %106 = vector.shape_cast %105 : vector<1x64x8xf32> to vector<64x8xf32>
    %cst_104 = arith.constant dense<0.000000e+00> : vector<2x8xf32>
    %107 = tpu.matmul %104, %106, %cst_104 {dimension_numbers = #tpu.dot_dimension_numbers<[1], [0], [0], [1], [0, 0, 1, 1], [], []>} : vector<2x64xf32>, vector<64x8xf32>, vector<2x8xf32> -> vector<2x8xf32>
    %108 = arith.addf %101, %107 : vector<2x8xf32>
    %c2_105 = arith.constant 2 : index
    %c0_106 = arith.constant 0 : index
    %c0_107 = arith.constant 0 : index
    %109 = vector.load %arg9[%c2_105, %c0_106, %c0_107] : memref<4x2x8xf32, #tpu.memory_space<vmem>>, vector<1x2x8xf32>
    %110 = vector.shape_cast %109 : vector<1x2x8xf32> to vector<2x8xf32>
    %cst_108 = arith.constant dense<0.000000e+00> : vector<2x64xf32>
    %111 = tpu.matmul %110, %95, %cst_108 {dimension_numbers = #tpu.dot_dimension_numbers<[1], [0], [0], [1], [0, 0, 1, 1], [], []>} : vector<2x8xf32>, vector<8x64xf32>, vector<2x64xf32> -> vector<2x64xf32>
    %c2_109 = arith.constant 2 : index
    %c0_110 = arith.constant 0 : index
    %c0_111 = arith.constant 0 : index
    %112 = vector.load %arg10[%c2_109, %c0_110, %c0_111] : memref<4x64x8xf32, #tpu.memory_space<vmem>>, vector<1x64x8xf32>
    %113 = vector.shape_cast %112 : vector<1x64x8xf32> to vector<64x8xf32>
    %cst_112 = arith.constant dense<0.000000e+00> : vector<2x8xf32>
    %114 = tpu.matmul %111, %113, %cst_112 {dimension_numbers = #tpu.dot_dimension_numbers<[1], [0], [0], [1], [0, 0, 1, 1], [], []>} : vector<2x64xf32>, vector<64x8xf32>, vector<2x8xf32> -> vector<2x8xf32>
    %115 = arith.addf %108, %114 : vector<2x8xf32>
    %c3_113 = arith.constant 3 : index
    %c0_114 = arith.constant 0 : index
    %c0_115 = arith.constant 0 : index
    %116 = vector.load %arg9[%c3_113, %c0_114, %c0_115] : memref<4x2x8xf32, #tpu.memory_space<vmem>>, vector<1x2x8xf32>
    %117 = vector.shape_cast %116 : vector<1x2x8xf32> to vector<2x8xf32>
    %cst_116 = arith.constant dense<0.000000e+00> : vector<2x64xf32>
    %118 = tpu.matmul %117, %95, %cst_116 {dimension_numbers = #tpu.dot_dimension_numbers<[1], [0], [0], [1], [0, 0, 1, 1], [], []>} : vector<2x8xf32>, vector<8x64xf32>, vector<2x64xf32> -> vector<2x64xf32>
    %c3_117 = arith.constant 3 : index
    %c0_118 = arith.constant 0 : index
    %c0_119 = arith.constant 0 : index
    %119 = vector.load %arg10[%c3_117, %c0_118, %c0_119] : memref<4x64x8xf32, #tpu.memory_space<vmem>>, vector<1x64x8xf32>
    %120 = vector.shape_cast %119 : vector<1x64x8xf32> to vector<64x8xf32>
    %cst_120 = arith.constant dense<0.000000e+00> : vector<2x8xf32>
    %121 = tpu.matmul %118, %120, %cst_120 {dimension_numbers = #tpu.dot_dimension_numbers<[1], [0], [0], [1], [0, 0, 1, 1], [], []>} : vector<2x64xf32>, vector<64x8xf32>, vector<2x8xf32> -> vector<2x8xf32>
    %122 = arith.addf %115, %121 : vector<2x8xf32>
    %c0_121 = arith.constant 0 : index
    %c0_122 = arith.constant 0 : index
    %123 = vector.load %arg36[%c0_121, %c0_122] : memref<2x8xf32, #tpu.memory_space<vmem>>, vector<2x8xf32>
    tpu.vector_store %arg36[%c0_121, %c0_122], %122 {strides = array<i32>} : memref<2x8xf32, #tpu.memory_space<vmem>>, vector<2x8xf32>,
    %c0_123 = arith.constant 0 : index
    %c0_124 = arith.constant 0 : index
    %c0_125 = arith.constant 0 : index
    %124 = vector.load %arg11[%c0_123, %c0_124, %c0_125] : memref<4x8x2xf32, #tpu.memory_space<vmem>>, vector<1x8x2xf32>
    %125 = vector.shape_cast %124 : vector<1x8x2xf32> to vector<8x2xf32>
    %cst_126 = arith.constant dense<0.000000e+00> : vector<8x8xf32>
    %126 = tpu.matmul %125, %122, %cst_126 {dimension_numbers = #tpu.dot_dimension_numbers<[1], [0], [0], [1], [0, 0, 1, 1], [], []>} : vector<8x2xf32>, vector<2x8xf32>, vector<8x8xf32> -> vector<8x8xf32>
    %c0_127 = arith.constant 0 : index
    %c0_128 = arith.constant 0 : index
    %c0_129 = arith.constant 0 : index
    %127 = vector.load %arg12[%c0_127, %c0_128, %c0_129] : memref<4x8x64xf32, #tpu.memory_space<vmem>>, vector<1x8x64xf32>
    %128 = vector.shape_cast %127 : vector<1x8x64xf32> to vector<8x64xf32>
    %cst_130 = arith.constant dense<0.000000e+00> : vector<8x64xf32>
    %129 = tpu.matmul %126, %128, %cst_130 {dimension_numbers = #tpu.dot_dimension_numbers<[1], [0], [0], [1], [0, 0, 1, 1], [], []>} : vector<8x8xf32>, vector<8x64xf32>, vector<8x64xf32> -> vector<8x64xf32>
    %c1_131 = arith.constant 1 : index
    %c0_132 = arith.constant 0 : index
    %c0_133 = arith.constant 0 : index
    %130 = vector.load %arg11[%c1_131, %c0_132, %c0_133] : memref<4x8x2xf32, #tpu.memory_space<vmem>>, vector<1x8x2xf32>
    %131 = vector.shape_cast %130 : vector<1x8x2xf32> to vector<8x2xf32>
    %cst_134 = arith.constant dense<0.000000e+00> : vector<8x8xf32>
    %132 = tpu.matmul %131, %122, %cst_134 {dimension_numbers = #tpu.dot_dimension_numbers<[1], [0], [0], [1], [0, 0, 1, 1], [], []>} : vector<8x2xf32>, vector<2x8xf32>, vector<8x8xf32> -> vector<8x8xf32>
    %c1_135 = arith.constant 1 : index
    %c0_136 = arith.constant 0 : index
    %c0_137 = arith.constant 0 : index
    %133 = vector.load %arg12[%c1_135, %c0_136, %c0_137] : memref<4x8x64xf32, #tpu.memory_space<vmem>>, vector<1x8x64xf32>
    %134 = vector.shape_cast %133 : vector<1x8x64xf32> to vector<8x64xf32>
    %cst_138 = arith.constant dense<0.000000e+00> : vector<8x64xf32>
    %135 = tpu.matmul %132, %134, %cst_138 {dimension_numbers = #tpu.dot_dimension_numbers<[1], [0], [0], [1], [0, 0, 1, 1], [], []>} : vector<8x8xf32>, vector<8x64xf32>, vector<8x64xf32> -> vector<8x64xf32>
    %136 = arith.addf %129, %135 : vector<8x64xf32>
    %c2_139 = arith.constant 2 : index
    %c0_140 = arith.constant 0 : index
    %c0_141 = arith.constant 0 : index
    %137 = vector.load %arg11[%c2_139, %c0_140, %c0_141] : memref<4x8x2xf32, #tpu.memory_space<vmem>>, vector<1x8x2xf32>
    %138 = vector.shape_cast %137 : vector<1x8x2xf32> to vector<8x2xf32>
    %cst_142 = arith.constant dense<0.000000e+00> : vector<8x8xf32>
    %139 = tpu.matmul %138, %122, %cst_142 {dimension_numbers = #tpu.dot_dimension_numbers<[1], [0], [0], [1], [0, 0, 1, 1], [], []>} : vector<8x2xf32>, vector<2x8xf32>, vector<8x8xf32> -> vector<8x8xf32>
    %c2_143 = arith.constant 2 : index
    %c0_144 = arith.constant 0 : index
    %c0_145 = arith.constant 0 : index
    %140 = vector.load %arg12[%c2_143, %c0_144, %c0_145] : memref<4x8x64xf32, #tpu.memory_space<vmem>>, vector<1x8x64xf32>
    %141 = vector.shape_cast %140 : vector<1x8x64xf32> to vector<8x64xf32>
    %cst_146 = arith.constant dense<0.000000e+00> : vector<8x64xf32>
    %142 = tpu.matmul %139, %141, %cst_146 {dimension_numbers = #tpu.dot_dimension_numbers<[1], [0], [0], [1], [0, 0, 1, 1], [], []>} : vector<8x8xf32>, vector<8x64xf32>, vector<8x64xf32> -> vector<8x64xf32>
    %143 = arith.addf %136, %142 : vector<8x64xf32>
    %c3_147 = arith.constant 3 : index
    %c0_148 = arith.constant 0 : index
    %c0_149 = arith.constant 0 : index
    %144 = vector.load %arg11[%c3_147, %c0_148, %c0_149] : memref<4x8x2xf32, #tpu.memory_space<vmem>>, vector<1x8x2xf32>
    %145 = vector.shape_cast %144 : vector<1x8x2xf32> to vector<8x2xf32>
    %cst_150 = arith.constant dense<0.000000e+00> : vector<8x8xf32>
    %146 = tpu.matmul %145, %122, %cst_150 {dimension_numbers = #tpu.dot_dimension_numbers<[1], [0], [0], [1], [0, 0, 1, 1], [], []>} : vector<8x2xf32>, vector<2x8xf32>, vector<8x8xf32> -> vector<8x8xf32>
    %c3_151 = arith.constant 3 : index
    %c0_152 = arith.constant 0 : index
    %c0_153 = arith.constant 0 : index
    %147 = vector.load %arg12[%c3_151, %c0_152, %c0_153] : memref<4x8x64xf32, #tpu.memory_space<vmem>>, vector<1x8x64xf32>
    %148 = vector.shape_cast %147 : vector<1x8x64xf32> to vector<8x64xf32>
    %cst_154 = arith.constant dense<0.000000e+00> : vector<8x64xf32>
    %149 = tpu.matmul %146, %148, %cst_154 {dimension_numbers = #tpu.dot_dimension_numbers<[1], [0], [0], [1], [0, 0, 1, 1], [], []>} : vector<8x8xf32>, vector<8x64xf32>, vector<8x64xf32> -> vector<8x64xf32>
    %150 = arith.addf %143, %149 : vector<8x64xf32>
    %cst_155 = arith.constant dense<0.000000e+00> : vector<64xf32>
    %151 = vector.multi_reduction <add>, %150, %cst_155 [0] : vector<8x64xf32> to vector<64xf32>
    %152 = vector.shape_cast %151 : vector<64xf32> to vector<1x64xf32>
    %c0_156 = arith.constant 0 : index
    %c0_157 = arith.constant 0 : index
    %153 = vector.load %arg15[%c0_156, %c0_157] : memref<64x16xf32, #tpu.memory_space<vmem>>, vector<64x16xf32>
    %cst_158 = arith.constant dense<0.000000e+00> : vector<1x16xf32>
    %154 = tpu.matmul %152, %153, %cst_158 {dimension_numbers = #tpu.dot_dimension_numbers<[1], [0], [0], [1], [0, 0, 1, 1], [], []>} : vector<1x64xf32>, vector<64x16xf32>, vector<1x16xf32> -> vector<1x16xf32>
    %cst_159 = arith.constant 3.125000e-02 : f32
    %155 = vector.broadcast %cst_159 : f32 to vector<1x16xf32>
    %156 = arith.mulf %154, %155 : vector<1x16xf32>
    %c0_160 = arith.constant 0 : index
    %c0_161 = arith.constant 0 : index
    %157 = vector.load %arg16[%c0_160, %c0_161] : memref<16x64xf32, #tpu.memory_space<vmem>>, vector<16x64xf32>
    %cst_162 = arith.constant dense<0.000000e+00> : vector<1x64xf32>
    %158 = tpu.matmul %156, %157, %cst_162 {dimension_numbers = #tpu.dot_dimension_numbers<[1], [0], [0], [1], [0, 0, 1, 1], [], []>} : vector<1x16xf32>, vector<16x64xf32>, vector<1x64xf32> -> vector<1x64xf32>
    %159 = vector.broadcast %158 : vector<1x64xf32> to vector<8x64xf32>
    %160 = arith.subf %150, %159 : vector<8x64xf32>
    %161 = arith.mulf %160, %160 : vector<8x64xf32>
    %cst_163 = arith.constant dense<0.000000e+00> : vector<64xf32>
    %162 = vector.multi_reduction <add>, %161, %cst_163 [0] : vector<8x64xf32> to vector<64xf32>
    %163 = vector.shape_cast %162 : vector<64xf32> to vector<1x64xf32>
    %c0_164 = arith.constant 0 : index
    %c0_165 = arith.constant 0 : index
    %164 = vector.load %arg15[%c0_164, %c0_165] : memref<64x16xf32, #tpu.memory_space<vmem>>, vector<64x16xf32>
    %cst_166 = arith.constant dense<0.000000e+00> : vector<1x16xf32>
    %165 = tpu.matmul %163, %164, %cst_166 {dimension_numbers = #tpu.dot_dimension_numbers<[1], [0], [0], [1], [0, 0, 1, 1], [], []>} : vector<1x64xf32>, vector<64x16xf32>, vector<1x16xf32> -> vector<1x16xf32>
    %cst_167 = arith.constant 3.125000e-02 : f32
    %166 = vector.broadcast %cst_167 : f32 to vector<1x16xf32>
    %167 = arith.mulf %165, %166 : vector<1x16xf32>
    %c0_168 = arith.constant 0 : index
    %c0_169 = arith.constant 0 : index
    %168 = vector.load %arg13[%c0_168, %c0_169] : memref<1x16xf32, #tpu.memory_space<vmem>>, vector<1x16xf32>
    %cst_170 = arith.constant 9.99999974E-6 : f32
    %169 = vector.broadcast %cst_170 : f32 to vector<1x16xf32>
    %170 = arith.addf %167, %169 : vector<1x16xf32>
    %171 = math.rsqrt %170 : vector<1x16xf32>
    %172 = arith.mulf %168, %171 : vector<1x16xf32>
    %c0_171 = arith.constant 0 : index
    %c0_172 = arith.constant 0 : index
    %173 = vector.load %arg16[%c0_171, %c0_172] : memref<16x64xf32, #tpu.memory_space<vmem>>, vector<16x64xf32>
    %cst_173 = arith.constant dense<0.000000e+00> : vector<1x64xf32>
    %174 = tpu.matmul %172, %173, %cst_173 {dimension_numbers = #tpu.dot_dimension_numbers<[1], [0], [0], [1], [0, 0, 1, 1], [], []>} : vector<1x16xf32>, vector<16x64xf32>, vector<1x64xf32> -> vector<1x64xf32>
    %c0_174 = arith.constant 0 : index
    %c0_175 = arith.constant 0 : index
    %175 = vector.load %arg14[%c0_174, %c0_175] : memref<1x16xf32, #tpu.memory_space<vmem>>, vector<1x16xf32>
    %c0_176 = arith.constant 0 : index
    %c0_177 = arith.constant 0 : index
    %176 = vector.load %arg16[%c0_176, %c0_177] : memref<16x64xf32, #tpu.memory_space<vmem>>, vector<16x64xf32>
    %cst_178 = arith.constant dense<0.000000e+00> : vector<1x64xf32>
    %177 = tpu.matmul %175, %176, %cst_178 {dimension_numbers = #tpu.dot_dimension_numbers<[1], [0], [0], [1], [0, 0, 1, 1], [], []>} : vector<1x16xf32>, vector<16x64xf32>, vector<1x64xf32> -> vector<1x64xf32>
    %178 = vector.broadcast %174 : vector<1x64xf32> to vector<8x64xf32>
    %179 = arith.mulf %160, %178 : vector<8x64xf32>
    %180 = vector.broadcast %177 : vector<1x64xf32> to vector<8x64xf32>
    %181 = arith.addf %179, %180 : vector<8x64xf32>
    %cst_179 = arith.constant 0.000000e+00 : f32
    %182 = vector.broadcast %cst_179 : f32 to vector<8x64xf32>
    %183 = arith.maximumf %181, %182 : vector<8x64xf32>
    %c0_180 = arith.constant 0 : index
    %c0_181 = arith.constant 0 : index
    %c0_182 = arith.constant 0 : index
    %184 = vector.load %arg17[%c0_180, %c0_181, %c0_182] : memref<4x16x8xf32, #tpu.memory_space<vmem>>, vector<1x16x8xf32>
    %185 = vector.shape_cast %184 : vector<1x16x8xf32> to vector<16x8xf32>
    %cst_183 = arith.constant dense<0.000000e+00> : vector<16x64xf32>
    %186 = tpu.matmul %185, %183, %cst_183 {dimension_numbers = #tpu.dot_dimension_numbers<[1], [0], [0], [1], [0, 0, 1, 1], [], []>} : vector<16x8xf32>, vector<8x64xf32>, vector<16x64xf32> -> vector<16x64xf32>
    %c0_184 = arith.constant 0 : index
    %c0_185 = arith.constant 0 : index
    %c0_186 = arith.constant 0 : index
    %187 = vector.load %arg18[%c0_184, %c0_185, %c0_186] : memref<4x64x64xf32, #tpu.memory_space<vmem>>, vector<1x64x64xf32>
    %188 = vector.shape_cast %187 : vector<1x64x64xf32> to vector<64x64xf32>
    %cst_187 = arith.constant dense<0.000000e+00> : vector<16x64xf32>
    %189 = tpu.matmul %186, %188, %cst_187 {dimension_numbers = #tpu.dot_dimension_numbers<[1], [0], [0], [1], [0, 0, 1, 1], [], []>} : vector<16x64xf32>, vector<64x64xf32>, vector<16x64xf32> -> vector<16x64xf32>
    %c1_188 = arith.constant 1 : index
    %c0_189 = arith.constant 0 : index
    %c0_190 = arith.constant 0 : index
    %190 = vector.load %arg17[%c1_188, %c0_189, %c0_190] : memref<4x16x8xf32, #tpu.memory_space<vmem>>, vector<1x16x8xf32>
    %191 = vector.shape_cast %190 : vector<1x16x8xf32> to vector<16x8xf32>
    %cst_191 = arith.constant dense<0.000000e+00> : vector<16x64xf32>
    %192 = tpu.matmul %191, %183, %cst_191 {dimension_numbers = #tpu.dot_dimension_numbers<[1], [0], [0], [1], [0, 0, 1, 1], [], []>} : vector<16x8xf32>, vector<8x64xf32>, vector<16x64xf32> -> vector<16x64xf32>
    %c1_192 = arith.constant 1 : index
    %c0_193 = arith.constant 0 : index
    %c0_194 = arith.constant 0 : index
    %193 = vector.load %arg18[%c1_192, %c0_193, %c0_194] : memref<4x64x64xf32, #tpu.memory_space<vmem>>, vector<1x64x64xf32>
    %194 = vector.shape_cast %193 : vector<1x64x64xf32> to vector<64x64xf32>
    %cst_195 = arith.constant dense<0.000000e+00> : vector<16x64xf32>
    %195 = tpu.matmul %192, %194, %cst_195 {dimension_numbers = #tpu.dot_dimension_numbers<[1], [0], [0], [1], [0, 0, 1, 1], [], []>} : vector<16x64xf32>, vector<64x64xf32>, vector<16x64xf32> -> vector<16x64xf32>
    %196 = arith.addf %189, %195 : vector<16x64xf32>
    %c2_196 = arith.constant 2 : index
    %c0_197 = arith.constant 0 : index
    %c0_198 = arith.constant 0 : index
    %197 = vector.load %arg17[%c2_196, %c0_197, %c0_198] : memref<4x16x8xf32, #tpu.memory_space<vmem>>, vector<1x16x8xf32>
    %198 = vector.shape_cast %197 : vector<1x16x8xf32> to vector<16x8xf32>
    %cst_199 = arith.constant dense<0.000000e+00> : vector<16x64xf32>
    %199 = tpu.matmul %198, %183, %cst_199 {dimension_numbers = #tpu.dot_dimension_numbers<[1], [0], [0], [1], [0, 0, 1, 1], [], []>} : vector<16x8xf32>, vector<8x64xf32>, vector<16x64xf32> -> vector<16x64xf32>
    %c2_200 = arith.constant 2 : index
    %c0_201 = arith.constant 0 : index
    %c0_202 = arith.constant 0 : index
    %200 = vector.load %arg18[%c2_200, %c0_201, %c0_202] : memref<4x64x64xf32, #tpu.memory_space<vmem>>, vector<1x64x64xf32>
    %201 = vector.shape_cast %200 : vector<1x64x64xf32> to vector<64x64xf32>
    %cst_203 = arith.constant dense<0.000000e+00> : vector<16x64xf32>
    %202 = tpu.matmul %199, %201, %cst_203 {dimension_numbers = #tpu.dot_dimension_numbers<[1], [0], [0], [1], [0, 0, 1, 1], [], []>} : vector<16x64xf32>, vector<64x64xf32>, vector<16x64xf32> -> vector<16x64xf32>
    %203 = arith.addf %196, %202 : vector<16x64xf32>
    %c3_204 = arith.constant 3 : index
    %c0_205 = arith.constant 0 : index
    %c0_206 = arith.constant 0 : index
    %204 = vector.load %arg17[%c3_204, %c0_205, %c0_206] : memref<4x16x8xf32, #tpu.memory_space<vmem>>, vector<1x16x8xf32>
    %205 = vector.shape_cast %204 : vector<1x16x8xf32> to vector<16x8xf32>
    %cst_207 = arith.constant dense<0.000000e+00> : vector<16x64xf32>
    %206 = tpu.matmul %205, %183, %cst_207 {dimension_numbers = #tpu.dot_dimension_numbers<[1], [0], [0], [1], [0, 0, 1, 1], [], []>} : vector<16x8xf32>, vector<8x64xf32>, vector<16x64xf32> -> vector<16x64xf32>
    %c3_208 = arith.constant 3 : index
    %c0_209 = arith.constant 0 : index
    %c0_210 = arith.constant 0 : index
    %207 = vector.load %arg18[%c3_208, %c0_209, %c0_210] : memref<4x64x64xf32, #tpu.memory_space<vmem>>, vector<1x64x64xf32>
    %208 = vector.shape_cast %207 : vector<1x64x64xf32> to vector<64x64xf32>
    %cst_211 = arith.constant dense<0.000000e+00> : vector<16x64xf32>
    %209 = tpu.matmul %206, %208, %cst_211 {dimension_numbers = #tpu.dot_dimension_numbers<[1], [0], [0], [1], [0, 0, 1, 1], [], []>} : vector<16x64xf32>, vector<64x64xf32>, vector<16x64xf32> -> vector<16x64xf32>
    %210 = arith.addf %203, %209 : vector<16x64xf32>
    %cst_212 = arith.constant dense<0.000000e+00> : vector<64xf32>
    %211 = vector.multi_reduction <add>, %210, %cst_212 [0] : vector<16x64xf32> to vector<64xf32>
    %212 = vector.shape_cast %211 : vector<64xf32> to vector<1x64xf32>
    %c0_213 = arith.constant 0 : index
    %c0_214 = arith.constant 0 : index
    %213 = vector.load %arg21[%c0_213, %c0_214] : memref<64x8xf32, #tpu.memory_space<vmem>>, vector<64x8xf32>
    %cst_215 = arith.constant dense<0.000000e+00> : vector<1x8xf32>
    %214 = tpu.matmul %212, %213, %cst_215 {dimension_numbers = #tpu.dot_dimension_numbers<[1], [0], [0], [1], [0, 0, 1, 1], [], []>} : vector<1x64xf32>, vector<64x8xf32>, vector<1x8xf32> -> vector<1x8xf32>
    %cst_216 = arith.constant 7.812500e-03 : f32
    %215 = vector.broadcast %cst_216 : f32 to vector<1x8xf32>
    %216 = arith.mulf %214, %215 : vector<1x8xf32>
    %c0_217 = arith.constant 0 : index
    %c0_218 = arith.constant 0 : index
    %217 = vector.load %arg22[%c0_217, %c0_218] : memref<8x64xf32, #tpu.memory_space<vmem>>, vector<8x64xf32>
    %cst_219 = arith.constant dense<0.000000e+00> : vector<1x64xf32>
    %218 = tpu.matmul %216, %217, %cst_219 {dimension_numbers = #tpu.dot_dimension_numbers<[1], [0], [0], [1], [0, 0, 1, 1], [], []>} : vector<1x8xf32>, vector<8x64xf32>, vector<1x64xf32> -> vector<1x64xf32>
    %219 = vector.broadcast %218 : vector<1x64xf32> to vector<16x64xf32>
    %220 = arith.subf %210, %219 : vector<16x64xf32>
    %221 = arith.mulf %220, %220 : vector<16x64xf32>
    %cst_220 = arith.constant dense<0.000000e+00> : vector<64xf32>
    %222 = vector.multi_reduction <add>, %221, %cst_220 [0] : vector<16x64xf32> to vector<64xf32>
    %223 = vector.shape_cast %222 : vector<64xf32> to vector<1x64xf32>
    %c0_221 = arith.constant 0 : index
    %c0_222 = arith.constant 0 : index
    %224 = vector.load %arg21[%c0_221, %c0_222] : memref<64x8xf32, #tpu.memory_space<vmem>>, vector<64x8xf32>
    %cst_223 = arith.constant dense<0.000000e+00> : vector<1x8xf32>
    %225 = tpu.matmul %223, %224, %cst_223 {dimension_numbers = #tpu.dot_dimension_numbers<[1], [0], [0], [1], [0, 0, 1, 1], [], []>} : vector<1x64xf32>, vector<64x8xf32>, vector<1x8xf32> -> vector<1x8xf32>
    %cst_224 = arith.constant 7.812500e-03 : f32
    %226 = vector.broadcast %cst_224 : f32 to vector<1x8xf32>
    %227 = arith.mulf %225, %226 : vector<1x8xf32>
    %c0_225 = arith.constant 0 : index
    %c0_226 = arith.constant 0 : index
    %228 = vector.load %arg19[%c0_225, %c0_226] : memref<1x8xf32, #tpu.memory_space<vmem>>, vector<1x8xf32>
    %cst_227 = arith.constant 9.99999974E-6 : f32
    %229 = vector.broadcast %cst_227 : f32 to vector<1x8xf32>
    %230 = arith.addf %227, %229 : vector<1x8xf32>
    %231 = math.rsqrt %230 : vector<1x8xf32>
    %232 = arith.mulf %228, %231 : vector<1x8xf32>
    %c0_228 = arith.constant 0 : index
    %c0_229 = arith.constant 0 : index
    %233 = vector.load %arg22[%c0_228, %c0_229] : memref<8x64xf32, #tpu.memory_space<vmem>>, vector<8x64xf32>
    %cst_230 = arith.constant dense<0.000000e+00> : vector<1x64xf32>
    %234 = tpu.matmul %232, %233, %cst_230 {dimension_numbers = #tpu.dot_dimension_numbers<[1], [0], [0], [1], [0, 0, 1, 1], [], []>} : vector<1x8xf32>, vector<8x64xf32>, vector<1x64xf32> -> vector<1x64xf32>
    %c0_231 = arith.constant 0 : index
    %c0_232 = arith.constant 0 : index
    %235 = vector.load %arg20[%c0_231, %c0_232] : memref<1x8xf32, #tpu.memory_space<vmem>>, vector<1x8xf32>
    %c0_233 = arith.constant 0 : index
    %c0_234 = arith.constant 0 : index
    %236 = vector.load %arg22[%c0_233, %c0_234] : memref<8x64xf32, #tpu.memory_space<vmem>>, vector<8x64xf32>
    %cst_235 = arith.constant dense<0.000000e+00> : vector<1x64xf32>
    %237 = tpu.matmul %235, %236, %cst_235 {dimension_numbers = #tpu.dot_dimension_numbers<[1], [0], [0], [1], [0, 0, 1, 1], [], []>} : vector<1x8xf32>, vector<8x64xf32>, vector<1x64xf32> -> vector<1x64xf32>
    %238 = vector.broadcast %234 : vector<1x64xf32> to vector<16x64xf32>
    %239 = arith.mulf %220, %238 : vector<16x64xf32>
    %240 = vector.broadcast %237 : vector<1x64xf32> to vector<16x64xf32>
    %241 = arith.addf %239, %240 : vector<16x64xf32>
    %cst_236 = arith.constant 0.000000e+00 : f32
    %242 = vector.broadcast %cst_236 : f32 to vector<16x64xf32>
    %243 = arith.maximumf %241, %242 : vector<16x64xf32>
    %c0_237 = arith.constant 0 : index
    %c0_238 = arith.constant 0 : index
    %c0_239 = arith.constant 0 : index
    %244 = vector.load %arg23[%c0_237, %c0_238, %c0_239] : memref<4x32x16xf32, #tpu.memory_space<vmem>>, vector<1x32x16xf32>
    %245 = vector.shape_cast %244 : vector<1x32x16xf32> to vector<32x16xf32>
    %cst_240 = arith.constant dense<0.000000e+00> : vector<32x64xf32>
    %246 = tpu.matmul %245, %243, %cst_240 {dimension_numbers = #tpu.dot_dimension_numbers<[1], [0], [0], [1], [0, 0, 1, 1], [], []>} : vector<32x16xf32>, vector<16x64xf32>, vector<32x64xf32> -> vector<32x64xf32>
    %c0_241 = arith.constant 0 : index
    %c0_242 = arith.constant 0 : index
    %c0_243 = arith.constant 0 : index
    %247 = vector.load %arg24[%c0_241, %c0_242, %c0_243] : memref<4x64x48xf32, #tpu.memory_space<vmem>>, vector<1x64x48xf32>
    %248 = vector.shape_cast %247 : vector<1x64x48xf32> to vector<64x48xf32>
    %cst_244 = arith.constant dense<0.000000e+00> : vector<32x48xf32>
    %249 = tpu.matmul %246, %248, %cst_244 {dimension_numbers = #tpu.dot_dimension_numbers<[1], [0], [0], [1], [0, 0, 1, 1], [], []>} : vector<32x64xf32>, vector<64x48xf32>, vector<32x48xf32> -> vector<32x48xf32>
    %c1_245 = arith.constant 1 : index
    %c0_246 = arith.constant 0 : index
    %c0_247 = arith.constant 0 : index
    %250 = vector.load %arg23[%c1_245, %c0_246, %c0_247] : memref<4x32x16xf32, #tpu.memory_space<vmem>>, vector<1x32x16xf32>
    %251 = vector.shape_cast %250 : vector<1x32x16xf32> to vector<32x16xf32>
    %cst_248 = arith.constant dense<0.000000e+00> : vector<32x64xf32>
    %252 = tpu.matmul %251, %243, %cst_248 {dimension_numbers = #tpu.dot_dimension_numbers<[1], [0], [0], [1], [0, 0, 1, 1], [], []>} : vector<32x16xf32>, vector<16x64xf32>, vector<32x64xf32> -> vector<32x64xf32>
    %c1_249 = arith.constant 1 : index
    %c0_250 = arith.constant 0 : index
    %c0_251 = arith.constant 0 : index
    %253 = vector.load %arg24[%c1_249, %c0_250, %c0_251] : memref<4x64x48xf32, #tpu.memory_space<vmem>>, vector<1x64x48xf32>
    %254 = vector.shape_cast %253 : vector<1x64x48xf32> to vector<64x48xf32>
    %cst_252 = arith.constant dense<0.000000e+00> : vector<32x48xf32>
    %255 = tpu.matmul %252, %254, %cst_252 {dimension_numbers = #tpu.dot_dimension_numbers<[1], [0], [0], [1], [0, 0, 1, 1], [], []>} : vector<32x64xf32>, vector<64x48xf32>, vector<32x48xf32> -> vector<32x48xf32>
    %256 = arith.addf %249, %255 : vector<32x48xf32>
    %c2_253 = arith.constant 2 : index
    %c0_254 = arith.constant 0 : index
    %c0_255 = arith.constant 0 : index
    %257 = vector.load %arg23[%c2_253, %c0_254, %c0_255] : memref<4x32x16xf32, #tpu.memory_space<vmem>>, vector<1x32x16xf32>
    %258 = vector.shape_cast %257 : vector<1x32x16xf32> to vector<32x16xf32>
    %cst_256 = arith.constant dense<0.000000e+00> : vector<32x64xf32>
    %259 = tpu.matmul %258, %243, %cst_256 {dimension_numbers = #tpu.dot_dimension_numbers<[1], [0], [0], [1], [0, 0, 1, 1], [], []>} : vector<32x16xf32>, vector<16x64xf32>, vector<32x64xf32> -> vector<32x64xf32>
    %c2_257 = arith.constant 2 : index
    %c0_258 = arith.constant 0 : index
    %c0_259 = arith.constant 0 : index
    %260 = vector.load %arg24[%c2_257, %c0_258, %c0_259] : memref<4x64x48xf32, #tpu.memory_space<vmem>>, vector<1x64x48xf32>
    %261 = vector.shape_cast %260 : vector<1x64x48xf32> to vector<64x48xf32>
    %cst_260 = arith.constant dense<0.000000e+00> : vector<32x48xf32>
    %262 = tpu.matmul %259, %261, %cst_260 {dimension_numbers = #tpu.dot_dimension_numbers<[1], [0], [0], [1], [0, 0, 1, 1], [], []>} : vector<32x64xf32>, vector<64x48xf32>, vector<32x48xf32> -> vector<32x48xf32>
    %263 = arith.addf %256, %262 : vector<32x48xf32>
    %c3_261 = arith.constant 3 : index
    %c0_262 = arith.constant 0 : index
    %c0_263 = arith.constant 0 : index
    %264 = vector.load %arg23[%c3_261, %c0_262, %c0_263] : memref<4x32x16xf32, #tpu.memory_space<vmem>>, vector<1x32x16xf32>
    %265 = vector.shape_cast %264 : vector<1x32x16xf32> to vector<32x16xf32>
    %cst_264 = arith.constant dense<0.000000e+00> : vector<32x64xf32>
    %266 = tpu.matmul %265, %243, %cst_264 {dimension_numbers = #tpu.dot_dimension_numbers<[1], [0], [0], [1], [0, 0, 1, 1], [], []>} : vector<32x16xf32>, vector<16x64xf32>, vector<32x64xf32> -> vector<32x64xf32>
    %c3_265 = arith.constant 3 : index
    %c0_266 = arith.constant 0 : index
    %c0_267 = arith.constant 0 : index
    %267 = vector.load %arg24[%c3_265, %c0_266, %c0_267] : memref<4x64x48xf32, #tpu.memory_space<vmem>>, vector<1x64x48xf32>
    %268 = vector.shape_cast %267 : vector<1x64x48xf32> to vector<64x48xf32>
    %cst_268 = arith.constant dense<0.000000e+00> : vector<32x48xf32>
    %269 = tpu.matmul %266, %268, %cst_268 {dimension_numbers = #tpu.dot_dimension_numbers<[1], [0], [0], [1], [0, 0, 1, 1], [], []>} : vector<32x64xf32>, vector<64x48xf32>, vector<32x48xf32> -> vector<32x48xf32>
    %270 = arith.addf %263, %269 : vector<32x48xf32>
    %271 = math.tanh %270 : vector<32x48xf32>
    %c0_269 = arith.constant 0 : index
    %c0_270 = arith.constant 0 : index
    %272 = vector.load %arg35[%c0_269, %c0_270] : memref<32x48xf32, #tpu.memory_space<vmem>>, vector<32x48xf32>
    tpu.vector_store %arg35[%c0_269, %c0_270], %271 {strides = array<i32>} : memref<32x48xf32, #tpu.memory_space<vmem>>, vector<32x48xf32>,
    %c0_271 = arith.constant 0 : index
    %c0_272 = arith.constant 0 : index
    %c0_273 = arith.constant 0 : index
    %273 = vector.load %arg25[%c0_271, %c0_272, %c0_273] : memref<4x16x32xf32, #tpu.memory_space<vmem>>, vector<1x16x32xf32>
    %274 = vector.shape_cast %273 : vector<1x16x32xf32> to vector<16x32xf32>
    %cst_274 = arith.constant dense<0.000000e+00> : vector<16x48xf32>
    %275 = tpu.matmul %274, %271, %cst_274 {dimension_numbers = #tpu.dot_dimension_numbers<[1], [0], [0], [1], [0, 0, 1, 1], [], []>} : vector<16x32xf32>, vector<32x48xf32>, vector<16x48xf32> -> vector<16x48xf32>
    %c0_275 = arith.constant 0 : index
    %c0_276 = arith.constant 0 : index
    %c0_277 = arith.constant 0 : index
    %276 = vector.load %arg26[%c0_275, %c0_276, %c0_277] : memref<4x48x64xf32, #tpu.memory_space<vmem>>, vector<1x48x64xf32>
    %277 = vector.shape_cast %276 : vector<1x48x64xf32> to vector<48x64xf32>
    %cst_278 = arith.constant dense<0.000000e+00> : vector<16x64xf32>
    %278 = tpu.matmul %275, %277, %cst_278 {dimension_numbers = #tpu.dot_dimension_numbers<[1], [0], [0], [1], [0, 0, 1, 1], [], []>} : vector<16x48xf32>, vector<48x64xf32>, vector<16x64xf32> -> vector<16x64xf32>
    %c1_279 = arith.constant 1 : index
    %c0_280 = arith.constant 0 : index
    %c0_281 = arith.constant 0 : index
    %279 = vector.load %arg25[%c1_279, %c0_280, %c0_281] : memref<4x16x32xf32, #tpu.memory_space<vmem>>, vector<1x16x32xf32>
    %280 = vector.shape_cast %279 : vector<1x16x32xf32> to vector<16x32xf32>
    %cst_282 = arith.constant dense<0.000000e+00> : vector<16x48xf32>
    %281 = tpu.matmul %280, %271, %cst_282 {dimension_numbers = #tpu.dot_dimension_numbers<[1], [0], [0], [1], [0, 0, 1, 1], [], []>} : vector<16x32xf32>, vector<32x48xf32>, vector<16x48xf32> -> vector<16x48xf32>
    %c1_283 = arith.constant 1 : index
    %c0_284 = arith.constant 0 : index
    %c0_285 = arith.constant 0 : index
    %282 = vector.load %arg26[%c1_283, %c0_284, %c0_285] : memref<4x48x64xf32, #tpu.memory_space<vmem>>, vector<1x48x64xf32>
    %283 = vector.shape_cast %282 : vector<1x48x64xf32> to vector<48x64xf32>
    %cst_286 = arith.constant dense<0.000000e+00> : vector<16x64xf32>
    %284 = tpu.matmul %281, %283, %cst_286 {dimension_numbers = #tpu.dot_dimension_numbers<[1], [0], [0], [1], [0, 0, 1, 1], [], []>} : vector<16x48xf32>, vector<48x64xf32>, vector<16x64xf32> -> vector<16x64xf32>
    %285 = arith.addf %278, %284 : vector<16x64xf32>
    %c2_287 = arith.constant 2 : index
    %c0_288 = arith.constant 0 : index
    %c0_289 = arith.constant 0 : index
    %286 = vector.load %arg25[%c2_287, %c0_288, %c0_289] : memref<4x16x32xf32, #tpu.memory_space<vmem>>, vector<1x16x32xf32>
    %287 = vector.shape_cast %286 : vector<1x16x32xf32> to vector<16x32xf32>
    %cst_290 = arith.constant dense<0.000000e+00> : vector<16x48xf32>
    %288 = tpu.matmul %287, %271, %cst_290 {dimension_numbers = #tpu.dot_dimension_numbers<[1], [0], [0], [1], [0, 0, 1, 1], [], []>} : vector<16x32xf32>, vector<32x48xf32>, vector<16x48xf32> -> vector<16x48xf32>
    %c2_291 = arith.constant 2 : index
    %c0_292 = arith.constant 0 : index
    %c0_293 = arith.constant 0 : index
    %289 = vector.load %arg26[%c2_291, %c0_292, %c0_293] : memref<4x48x64xf32, #tpu.memory_space<vmem>>, vector<1x48x64xf32>
    %290 = vector.shape_cast %289 : vector<1x48x64xf32> to vector<48x64xf32>
    %cst_294 = arith.constant dense<0.000000e+00> : vector<16x64xf32>
    %291 = tpu.matmul %288, %290, %cst_294 {dimension_numbers = #tpu.dot_dimension_numbers<[1], [0], [0], [1], [0, 0, 1, 1], [], []>} : vector<16x48xf32>, vector<48x64xf32>, vector<16x64xf32> -> vector<16x64xf32>
    %292 = arith.addf %285, %291 : vector<16x64xf32>
    %c3_295 = arith.constant 3 : index
    %c0_296 = arith.constant 0 : index
    %c0_297 = arith.constant 0 : index
    %293 = vector.load %arg25[%c3_295, %c0_296, %c0_297] : memref<4x16x32xf32, #tpu.memory_space<vmem>>, vector<1x16x32xf32>
    %294 = vector.shape_cast %293 : vector<1x16x32xf32> to vector<16x32xf32>
    %cst_298 = arith.constant dense<0.000000e+00> : vector<16x48xf32>
    %295 = tpu.matmul %294, %271, %cst_298 {dimension_numbers = #tpu.dot_dimension_numbers<[1], [0], [0], [1], [0, 0, 1, 1], [], []>} : vector<16x32xf32>, vector<32x48xf32>, vector<16x48xf32> -> vector<16x48xf32>
    %c3_299 = arith.constant 3 : index
    %c0_300 = arith.constant 0 : index
    %c0_301 = arith.constant 0 : index
    %296 = vector.load %arg26[%c3_299, %c0_300, %c0_301] : memref<4x48x64xf32, #tpu.memory_space<vmem>>, vector<1x48x64xf32>
    %297 = vector.shape_cast %296 : vector<1x48x64xf32> to vector<48x64xf32>
    %cst_302 = arith.constant dense<0.000000e+00> : vector<16x64xf32>
    %298 = tpu.matmul %295, %297, %cst_302 {dimension_numbers = #tpu.dot_dimension_numbers<[1], [0], [0], [1], [0, 0, 1, 1], [], []>} : vector<16x48xf32>, vector<48x64xf32>, vector<16x64xf32> -> vector<16x64xf32>
    %299 = arith.addf %292, %298 : vector<16x64xf32>
    %cst_303 = arith.constant 0.000000e+00 : f32
    %300 = vector.broadcast %cst_303 : f32 to vector<16x64xf32>
    %301 = arith.cmpf oge, %299, %300 : vector<16x64xf32>
    %cst_304 = arith.constant 2.000000e-01 : f32
    %302 = vector.broadcast %cst_304 : f32 to vector<16x64xf32>
    %303 = arith.mulf %302, %299 : vector<16x64xf32>
    %304 = arith.select %301, %299, %303 : vector<16x64xi1>, vector<16x64xf32>
    %c0_305 = arith.constant 0 : index
    %c0_306 = arith.constant 0 : index
    %c0_307 = arith.constant 0 : index
    %305 = vector.load %arg27[%c0_305, %c0_306, %c0_307] : memref<4x8x16xf32, #tpu.memory_space<vmem>>, vector<1x8x16xf32>
    %306 = vector.shape_cast %305 : vector<1x8x16xf32> to vector<8x16xf32>
    %cst_308 = arith.constant dense<0.000000e+00> : vector<8x64xf32>
    %307 = tpu.matmul %306, %304, %cst_308 {dimension_numbers = #tpu.dot_dimension_numbers<[1], [0], [0], [1], [0, 0, 1, 1], [], []>} : vector<8x16xf32>, vector<16x64xf32>, vector<8x64xf32> -> vector<8x64xf32>
    %c0_309 = arith.constant 0 : index
    %c0_310 = arith.constant 0 : index
    %c0_311 = arith.constant 0 : index
    %308 = vector.load %arg28[%c0_309, %c0_310, %c0_311] : memref<4x64x64xf32, #tpu.memory_space<vmem>>, vector<1x64x64xf32>
    %309 = vector.shape_cast %308 : vector<1x64x64xf32> to vector<64x64xf32>
    %cst_312 = arith.constant dense<0.000000e+00> : vector<8x64xf32>
    %310 = tpu.matmul %307, %309, %cst_312 {dimension_numbers = #tpu.dot_dimension_numbers<[1], [0], [0], [1], [0, 0, 1, 1], [], []>} : vector<8x64xf32>, vector<64x64xf32>, vector<8x64xf32> -> vector<8x64xf32>
    %c1_313 = arith.constant 1 : index
    %c0_314 = arith.constant 0 : index
    %c0_315 = arith.constant 0 : index
    %311 = vector.load %arg27[%c1_313, %c0_314, %c0_315] : memref<4x8x16xf32, #tpu.memory_space<vmem>>, vector<1x8x16xf32>
    %312 = vector.shape_cast %311 : vector<1x8x16xf32> to vector<8x16xf32>
    %cst_316 = arith.constant dense<0.000000e+00> : vector<8x64xf32>
    %313 = tpu.matmul %312, %304, %cst_316 {dimension_numbers = #tpu.dot_dimension_numbers<[1], [0], [0], [1], [0, 0, 1, 1], [], []>} : vector<8x16xf32>, vector<16x64xf32>, vector<8x64xf32> -> vector<8x64xf32>
    %c1_317 = arith.constant 1 : index
    %c0_318 = arith.constant 0 : index
    %c0_319 = arith.constant 0 : index
    %314 = vector.load %arg28[%c1_317, %c0_318, %c0_319] : memref<4x64x64xf32, #tpu.memory_space<vmem>>, vector<1x64x64xf32>
    %315 = vector.shape_cast %314 : vector<1x64x64xf32> to vector<64x64xf32>
    %cst_320 = arith.constant dense<0.000000e+00> : vector<8x64xf32>
    %316 = tpu.matmul %313, %315, %cst_320 {dimension_numbers = #tpu.dot_dimension_numbers<[1], [0], [0], [1], [0, 0, 1, 1], [], []>} : vector<8x64xf32>, vector<64x64xf32>, vector<8x64xf32> -> vector<8x64xf32>
    %317 = arith.addf %310, %316 : vector<8x64xf32>
    %c2_321 = arith.constant 2 : index
    %c0_322 = arith.constant 0 : index
    %c0_323 = arith.constant 0 : index
    %318 = vector.load %arg27[%c2_321, %c0_322, %c0_323] : memref<4x8x16xf32, #tpu.memory_space<vmem>>, vector<1x8x16xf32>
    %319 = vector.shape_cast %318 : vector<1x8x16xf32> to vector<8x16xf32>
    %cst_324 = arith.constant dense<0.000000e+00> : vector<8x64xf32>
    %320 = tpu.matmul %319, %304, %cst_324 {dimension_numbers = #tpu.dot_dimension_numbers<[1], [0], [0], [1], [0, 0, 1, 1], [], []>} : vector<8x16xf32>, vector<16x64xf32>, vector<8x64xf32> -> vector<8x64xf32>
    %c2_325 = arith.constant 2 : index
    %c0_326 = arith.constant 0 : index
    %c0_327 = arith.constant 0 : index
    %321 = vector.load %arg28[%c2_325, %c0_326, %c0_327] : memref<4x64x64xf32, #tpu.memory_space<vmem>>, vector<1x64x64xf32>
    %322 = vector.shape_cast %321 : vector<1x64x64xf32> to vector<64x64xf32>
    %cst_328 = arith.constant dense<0.000000e+00> : vector<8x64xf32>
    %323 = tpu.matmul %320, %322, %cst_328 {dimension_numbers = #tpu.dot_dimension_numbers<[1], [0], [0], [1], [0, 0, 1, 1], [], []>} : vector<8x64xf32>, vector<64x64xf32>, vector<8x64xf32> -> vector<8x64xf32>
    %324 = arith.addf %317, %323 : vector<8x64xf32>
    %c3_329 = arith.constant 3 : index
    %c0_330 = arith.constant 0 : index
    %c0_331 = arith.constant 0 : index
    %325 = vector.load %arg27[%c3_329, %c0_330, %c0_331] : memref<4x8x16xf32, #tpu.memory_space<vmem>>, vector<1x8x16xf32>
    %326 = vector.shape_cast %325 : vector<1x8x16xf32> to vector<8x16xf32>
    %cst_332 = arith.constant dense<0.000000e+00> : vector<8x64xf32>
    %327 = tpu.matmul %326, %304, %cst_332 {dimension_numbers = #tpu.dot_dimension_numbers<[1], [0], [0], [1], [0, 0, 1, 1], [], []>} : vector<8x16xf32>, vector<16x64xf32>, vector<8x64xf32> -> vector<8x64xf32>
    %c3_333 = arith.constant 3 : index
    %c0_334 = arith.constant 0 : index
    %c0_335 = arith.constant 0 : index
    %328 = vector.load %arg28[%c3_333, %c0_334, %c0_335] : memref<4x64x64xf32, #tpu.memory_space<vmem>>, vector<1x64x64xf32>
    %329 = vector.shape_cast %328 : vector<1x64x64xf32> to vector<64x64xf32>
    %cst_336 = arith.constant dense<0.000000e+00> : vector<8x64xf32>
    %330 = tpu.matmul %327, %329, %cst_336 {dimension_numbers = #tpu.dot_dimension_numbers<[1], [0], [0], [1], [0, 0, 1, 1], [], []>} : vector<8x64xf32>, vector<64x64xf32>, vector<8x64xf32> -> vector<8x64xf32>
    %331 = arith.addf %324, %330 : vector<8x64xf32>
    %cst_337 = arith.constant dense<0.000000e+00> : vector<64xf32>
    %332 = vector.multi_reduction <add>, %331, %cst_337 [0] : vector<8x64xf32> to vector<64xf32>
    %333 = vector.shape_cast %332 : vector<64xf32> to vector<1x64xf32>
    %c0_338 = arith.constant 0 : index
    %c0_339 = arith.constant 0 : index
    %334 = vector.load %arg31[%c0_338, %c0_339] : memref<64x16xf32, #tpu.memory_space<vmem>>, vector<64x16xf32>
    %cst_340 = arith.constant dense<0.000000e+00> : vector<1x16xf32>
    %335 = tpu.matmul %333, %334, %cst_340 {dimension_numbers = #tpu.dot_dimension_numbers<[1], [0], [0], [1], [0, 0, 1, 1], [], []>} : vector<1x64xf32>, vector<64x16xf32>, vector<1x16xf32> -> vector<1x16xf32>
    %cst_341 = arith.constant 3.125000e-02 : f32
    %336 = vector.broadcast %cst_341 : f32 to vector<1x16xf32>
    %337 = arith.mulf %335, %336 : vector<1x16xf32>
    %c0_342 = arith.constant 0 : index
    %c0_343 = arith.constant 0 : index
    %338 = vector.load %arg32[%c0_342, %c0_343] : memref<16x64xf32, #tpu.memory_space<vmem>>, vector<16x64xf32>
    %cst_344 = arith.constant dense<0.000000e+00> : vector<1x64xf32>
    %339 = tpu.matmul %337, %338, %cst_344 {dimension_numbers = #tpu.dot_dimension_numbers<[1], [0], [0], [1], [0, 0, 1, 1], [], []>} : vector<1x16xf32>, vector<16x64xf32>, vector<1x64xf32> -> vector<1x64xf32>
    %340 = vector.broadcast %339 : vector<1x64xf32> to vector<8x64xf32>
    %341 = arith.subf %331, %340 : vector<8x64xf32>
    %342 = arith.mulf %341, %341 : vector<8x64xf32>
    %cst_345 = arith.constant dense<0.000000e+00> : vector<64xf32>
    %343 = vector.multi_reduction <add>, %342, %cst_345 [0] : vector<8x64xf32> to vector<64xf32>
    %344 = vector.shape_cast %343 : vector<64xf32> to vector<1x64xf32>
    %c0_346 = arith.constant 0 : index
    %c0_347 = arith.constant 0 : index
    %345 = vector.load %arg31[%c0_346, %c0_347] : memref<64x16xf32, #tpu.memory_space<vmem>>, vector<64x16xf32>
    %cst_348 = arith.constant dense<0.000000e+00> : vector<1x16xf32>
    %346 = tpu.matmul %344, %345, %cst_348 {dimension_numbers = #tpu.dot_dimension_numbers<[1], [0], [0], [1], [0, 0, 1, 1], [], []>} : vector<1x64xf32>, vector<64x16xf32>, vector<1x16xf32> -> vector<1x16xf32>
    %cst_349 = arith.constant 3.125000e-02 : f32
    %347 = vector.broadcast %cst_349 : f32 to vector<1x16xf32>
    %348 = arith.mulf %346, %347 : vector<1x16xf32>
    %c0_350 = arith.constant 0 : index
    %c0_351 = arith.constant 0 : index
    %349 = vector.load %arg29[%c0_350, %c0_351] : memref<1x16xf32, #tpu.memory_space<vmem>>, vector<1x16xf32>
    %cst_352 = arith.constant 9.99999974E-6 : f32
    %350 = vector.broadcast %cst_352 : f32 to vector<1x16xf32>
    %351 = arith.addf %348, %350 : vector<1x16xf32>
    %352 = math.rsqrt %351 : vector<1x16xf32>
    %353 = arith.mulf %349, %352 : vector<1x16xf32>
    %c0_353 = arith.constant 0 : index
    %c0_354 = arith.constant 0 : index
    %354 = vector.load %arg32[%c0_353, %c0_354] : memref<16x64xf32, #tpu.memory_space<vmem>>, vector<16x64xf32>
    %cst_355 = arith.constant dense<0.000000e+00> : vector<1x64xf32>
    %355 = tpu.matmul %353, %354, %cst_355 {dimension_numbers = #tpu.dot_dimension_numbers<[1], [0], [0], [1], [0, 0, 1, 1], [], []>} : vector<1x16xf32>, vector<16x64xf32>, vector<1x64xf32> -> vector<1x64xf32>
    %c0_356 = arith.constant 0 : index
    %c0_357 = arith.constant 0 : index
    %356 = vector.load %arg30[%c0_356, %c0_357] : memref<1x16xf32, #tpu.memory_space<vmem>>, vector<1x16xf32>
    %c0_358 = arith.constant 0 : index
    %c0_359 = arith.constant 0 : index
    %357 = vector.load %arg32[%c0_358, %c0_359] : memref<16x64xf32, #tpu.memory_space<vmem>>, vector<16x64xf32>
    %cst_360 = arith.constant dense<0.000000e+00> : vector<1x64xf32>
    %358 = tpu.matmul %356, %357, %cst_360 {dimension_numbers = #tpu.dot_dimension_numbers<[1], [0], [0], [1], [0, 0, 1, 1], [], []>} : vector<1x16xf32>, vector<16x64xf32>, vector<1x64xf32> -> vector<1x64xf32>
    %359 = vector.broadcast %355 : vector<1x64xf32> to vector<8x64xf32>
    %360 = arith.mulf %341, %359 : vector<8x64xf32>
    %361 = vector.broadcast %358 : vector<1x64xf32> to vector<8x64xf32>
    %362 = arith.addf %360, %361 : vector<8x64xf32>
    %cst_361 = arith.constant 0.000000e+00 : f32
    %363 = vector.broadcast %cst_361 : f32 to vector<8x64xf32>
    %364 = arith.cmpf oge, %362, %363 : vector<8x64xf32>
    %cst_362 = arith.constant 2.000000e-01 : f32
    %365 = vector.broadcast %cst_362 : f32 to vector<8x64xf32>
    %366 = arith.mulf %365, %362 : vector<8x64xf32>
    %367 = arith.select %364, %362, %366 : vector<8x64xi1>, vector<8x64xf32>
    %c0_363 = arith.constant 0 : index
    %c0_364 = arith.constant 0 : index
    %c0_365 = arith.constant 0 : index
    %368 = vector.load %arg33[%c0_363, %c0_364, %c0_365] : memref<4x2x8xf32, #tpu.memory_space<vmem>>, vector<1x2x8xf32>
    %369 = vector.shape_cast %368 : vector<1x2x8xf32> to vector<2x8xf32>
    %cst_366 = arith.constant dense<0.000000e+00> : vector<2x64xf32>
    %370 = tpu.matmul %369, %367, %cst_366 {dimension_numbers = #tpu.dot_dimension_numbers<[1], [0], [0], [1], [0, 0, 1, 1], [], []>} : vector<2x8xf32>, vector<8x64xf32>, vector<2x64xf32> -> vector<2x64xf32>
    %c0_367 = arith.constant 0 : index
    %c0_368 = arith.constant 0 : index
    %c0_369 = arith.constant 0 : index
    %371 = vector.load %arg34[%c0_367, %c0_368, %c0_369] : memref<4x64x8xf32, #tpu.memory_space<vmem>>, vector<1x64x8xf32>
    %372 = vector.shape_cast %371 : vector<1x64x8xf32> to vector<64x8xf32>
    %cst_370 = arith.constant dense<0.000000e+00> : vector<2x8xf32>
    %373 = tpu.matmul %370, %372, %cst_370 {dimension_numbers = #tpu.dot_dimension_numbers<[1], [0], [0], [1], [0, 0, 1, 1], [], []>} : vector<2x64xf32>, vector<64x8xf32>, vector<2x8xf32> -> vector<2x8xf32>
    %c1_371 = arith.constant 1 : index
    %c0_372 = arith.constant 0 : index
    %c0_373 = arith.constant 0 : index
    %374 = vector.load %arg33[%c1_371, %c0_372, %c0_373] : memref<4x2x8xf32, #tpu.memory_space<vmem>>, vector<1x2x8xf32>
    %375 = vector.shape_cast %374 : vector<1x2x8xf32> to vector<2x8xf32>
    %cst_374 = arith.constant dense<0.000000e+00> : vector<2x64xf32>
    %376 = tpu.matmul %375, %367, %cst_374 {dimension_numbers = #tpu.dot_dimension_numbers<[1], [0], [0], [1], [0, 0, 1, 1], [], []>} : vector<2x8xf32>, vector<8x64xf32>, vector<2x64xf32> -> vector<2x64xf32>
    %c1_375 = arith.constant 1 : index
    %c0_376 = arith.constant 0 : index
    %c0_377 = arith.constant 0 : index
    %377 = vector.load %arg34[%c1_375, %c0_376, %c0_377] : memref<4x64x8xf32, #tpu.memory_space<vmem>>, vector<1x64x8xf32>
    %378 = vector.shape_cast %377 : vector<1x64x8xf32> to vector<64x8xf32>
    %cst_378 = arith.constant dense<0.000000e+00> : vector<2x8xf32>
    %379 = tpu.matmul %376, %378, %cst_378 {dimension_numbers = #tpu.dot_dimension_numbers<[1], [0], [0], [1], [0, 0, 1, 1], [], []>} : vector<2x64xf32>, vector<64x8xf32>, vector<2x8xf32> -> vector<2x8xf32>
    %380 = arith.addf %373, %379 : vector<2x8xf32>
    %c2_379 = arith.constant 2 : index
    %c0_380 = arith.constant 0 : index
    %c0_381 = arith.constant 0 : index
    %381 = vector.load %arg33[%c2_379, %c0_380, %c0_381] : memref<4x2x8xf32, #tpu.memory_space<vmem>>, vector<1x2x8xf32>
    %382 = vector.shape_cast %381 : vector<1x2x8xf32> to vector<2x8xf32>
    %cst_382 = arith.constant dense<0.000000e+00> : vector<2x64xf32>
    %383 = tpu.matmul %382, %367, %cst_382 {dimension_numbers = #tpu.dot_dimension_numbers<[1], [0], [0], [1], [0, 0, 1, 1], [], []>} : vector<2x8xf32>, vector<8x64xf32>, vector<2x64xf32> -> vector<2x64xf32>
    %c2_383 = arith.constant 2 : index
    %c0_384 = arith.constant 0 : index
    %c0_385 = arith.constant 0 : index
    %384 = vector.load %arg34[%c2_383, %c0_384, %c0_385] : memref<4x64x8xf32, #tpu.memory_space<vmem>>, vector<1x64x8xf32>
    %385 = vector.shape_cast %384 : vector<1x64x8xf32> to vector<64x8xf32>
    %cst_386 = arith.constant dense<0.000000e+00> : vector<2x8xf32>
    %386 = tpu.matmul %383, %385, %cst_386 {dimension_numbers = #tpu.dot_dimension_numbers<[1], [0], [0], [1], [0, 0, 1, 1], [], []>} : vector<2x64xf32>, vector<64x8xf32>, vector<2x8xf32> -> vector<2x8xf32>
    %387 = arith.addf %380, %386 : vector<2x8xf32>
    %c3_387 = arith.constant 3 : index
    %c0_388 = arith.constant 0 : index
    %c0_389 = arith.constant 0 : index
    %388 = vector.load %arg33[%c3_387, %c0_388, %c0_389] : memref<4x2x8xf32, #tpu.memory_space<vmem>>, vector<1x2x8xf32>
    %389 = vector.shape_cast %388 : vector<1x2x8xf32> to vector<2x8xf32>
    %cst_390 = arith.constant dense<0.000000e+00> : vector<2x64xf32>
    %390 = tpu.matmul %389, %367, %cst_390 {dimension_numbers = #tpu.dot_dimension_numbers<[1], [0], [0], [1], [0, 0, 1, 1], [], []>} : vector<2x8xf32>, vector<8x64xf32>, vector<2x64xf32> -> vector<2x64xf32>
    %c3_391 = arith.constant 3 : index
    %c0_392 = arith.constant 0 : index
    %c0_393 = arith.constant 0 : index
    %391 = vector.load %arg34[%c3_391, %c0_392, %c0_393] : memref<4x64x8xf32, #tpu.memory_space<vmem>>, vector<1x64x8xf32>
    %392 = vector.shape_cast %391 : vector<1x64x8xf32> to vector<64x8xf32>
    %cst_394 = arith.constant dense<0.000000e+00> : vector<2x8xf32>
    %393 = tpu.matmul %390, %392, %cst_394 {dimension_numbers = #tpu.dot_dimension_numbers<[1], [0], [0], [1], [0, 0, 1, 1], [], []>} : vector<2x64xf32>, vector<64x8xf32>, vector<2x8xf32> -> vector<2x8xf32>
    %394 = arith.addf %387, %393 : vector<2x8xf32>
    %c0_395 = arith.constant 0 : index
    %c0_396 = arith.constant 0 : index
    %395 = vector.load %arg37[%c0_395, %c0_396] : memref<2x8xf32, #tpu.memory_space<vmem>>, vector<2x8xf32>
    tpu.vector_store %arg37[%c0_395, %c0_396], %394 {strides = array<i32>} : memref<2x8xf32, #tpu.memory_space<vmem>>, vector<2x8xf32>,
    return
  }
}

</mosaic_0001>

<bundles_post_ra>
// kernel: forward.1
= control target key start
LH: loop header
LB: loop body
LE: loop exit
PB: predicated region body
PF: predicated region fallthrough
CT: control target
= control target key end

     0   :  { %s10067_s6 = smov 1   ;;  %s10068_s10 = smov 2   ;;  %s11353_s0 = inlined_call_operand.smem [shape: u32[38], index: -1, kind: input, shape index: {}] }
   0x1   :  { %s10116_s5 = sld [smem:[%s11353_s0]]   ;;  %s10069_s14 = smov 3  }
   0x2   :  { %s10121_s9 = sld [smem:[%s11353_s0 + %s10067_s6]]   ;;  %s10070_s18 = smov 4  }
   0x3   :  { %s10126_s13 = sld [smem:[%s11353_s0 + %s10068_s10]]   ;;  %s10071_s22 = smov 5  }
   0x4   :  { %s10131_s17 = sld [smem:[%s11353_s0 + %s10069_s14]]   ;;  %s10072_s26 = smov 6  }
   0x5   :  { %s10136_s21 = sld [smem:[%s11353_s0 + %s10070_s18]]   ;;  %s10073_s30 = smov 7  }
   0x6   :  { %s10141_s25 = sld [smem:[%s11353_s0 + %s10071_s22]]   ;;  %s10074_s4 = smov 8  }
   0x7   :  { %s10146_s29 = sld [smem:[%s11353_s0 + %s10072_s26]]   ;;  %s10075_s10 = smov 9  }
   0x8   :  { %s10151_s3 = sld [smem:[%s11353_s0 + %s10073_s30]]   ;;  %s10076_s15 = smov 10  }
   0x9   :  { %s10156_s8 = sld [smem:[%s11353_s0 + %s10074_s4]]   ;;  %s10077_s20 = smov 11  }
   0xa   :  { %s10161_s14 = sld [smem:[%s11353_s0 + %s10075_s10]]   ;;  %s10078_s26 = smov 12  }
   0xb   :  { %s10166_s19 = sld [smem:[%s11353_s0 + %s10076_s15]]   ;;  %s10079_s1 = smov 13  }
   0xc   :  { %s10171_s24 = sld [smem:[%s11353_s0 + %s10077_s20]]   ;;  %s10080_s7 = smov 14  }
   0xd   :  { %s10176_s30 = sld [smem:[%s11353_s0 + %s10078_s26]]   ;;  %s10081_s15 = smov 15  }
   0xe   :  { %s10181_s6 = sld [smem:[%s11353_s0 + %s10079_s1]]   ;;  %s10082_s22 = smov 16  }
   0xf   :  { %s10186_s12 = sld [smem:[%s11353_s0 + %s10080_s7]]   ;;  %s10083_s28 = smov 17  }
  0x10   :  { %s10191_s20 = sld [smem:[%s11353_s0 + %s10081_s15]]   ;;  %s10084_s7 = smov 18  }
  0x11   :  { %s10196_s27 = sld [smem:[%s11353_s0 + %s10082_s22]]   ;;  %s10085_s15 = smov 19  }
  0x12   :  { %s10201_s4 = sld [smem:[%s11353_s0 + %s10083_s28]]   ;;  %s10086_s22 = smov 20  }
  0x13   :  { %s10087_s28 = smov 21  }
  0x14   :  { %11367 = sst [smem:[#allocation8_spill]] %s10181_s6 }
  0x15   :  { %11368 = sst [smem:[#allocation9_spill]] %s10186_s12 }
  0x16   :  { %s10206_s12 = sld [smem:[%s11353_s0 + %s10084_s7]]   ;;  %s10088_s7 = smov 22  }
  0x17   :  { %11369 = sst [smem:[#allocation10_spill]] %s10196_s27 }
  0x18   :  { %11370 = sst [smem:[#allocation11_spill]] %s10201_s4 }
  0x19   :  { %s10211_s6 = sld [smem:[%s11353_s0 + %s10085_s15]]   ;;  %s10089_s15 = smov 23  }
  0x1a   :  { %s10216_s27 = sld [smem:[%s11353_s0 + %s10086_s22]]   ;;  %s10090_s22 = smov 24  }
  0x1b   :  { %s10221_s4 = sld [smem:[%s11353_s0 + %s10087_s28]]   ;;  %s10091_s28 = smov 25  }
  0x1c   :  { %11371 = sst [smem:[#allocation12_spill]] %s10206_s12 }
  0x1d   :  { %s10226_s12 = sld [smem:[%s11353_s0 + %s10088_s7]]   ;;  %s10092_s7 = smov 26  }
  0x1f   :  { %11372 = sst [smem:[#allocation13_spill]] %s10211_s6 }
  0x20   :  { %11373 = sst [smem:[#allocation14_spill]] %s10216_s27 }
  0x21   :  { %11374 = sst [smem:[#allocation15_spill]] %s10221_s4 }
  0x22   :  { %s10231_s6 = sld [smem:[%s11353_s0 + %s10089_s15]]   ;;  %s10093_s15 = smov 27  }
  0x23   :  { %11375 = sst [smem:[#allocation16_spill]] %s10226_s12 }
  0x24   :  { %s10236_s27 = sld [smem:[%s11353_s0 + %s10090_s22]]   ;;  %s10094_s22 = smov 28  }
  0x25   :  { %s10241_s4 = sld [smem:[%s11353_s0 + %s10091_s28]]   ;;  %s10095_s28 = smov 29  }
  0x26   :  { %s10246_s12 = sld [smem:[%s11353_s0 + %s10092_s7]]   ;;  %s10096_s7 = smov 30  }
  0x28   :  { %11376 = sst [smem:[#allocation17_spill]] %s10231_s6 }
  0x29   :  { %s10251_s6 = sld [smem:[%s11353_s0 + %s10093_s15]]   ;;  %s10097_s15 = smov 31  }
  0x2a   :  { %11377 = sst [smem:[#allocation18_spill]] %s10236_s27 }
  0x2b   :  { %11378 = sst [smem:[#allocation19_spill]] %s10241_s4 }
  0x2c   :  { %11379 = sst [smem:[#allocation20_spill]] %s10246_s12 }
  0x2d   :  { %s10256_s27 = sld [smem:[%s11353_s0 + %s10094_s22]]   ;;  %s10098_s22 = smov 32  }
  0x2e   :  { %s10261_s4 = sld [smem:[%s11353_s0 + %s10095_s28]]   ;;  %s10099_s28 = smov 33  }
  0x2f   :  { %11380 = sst [smem:[#allocation21_spill]] %s10251_s6 }
  0x30   :  { %s10266_s12 = sld [smem:[%s11353_s0 + %s10096_s7]]   ;;  %s10100_s7 = smov 34  }
  0x31   :  { %s10271_s6 = sld [smem:[%s11353_s0 + %s10097_s15]]   ;;  %s10101_s15 = smov 35  }
  0x33   :  { %11381 = sst [smem:[#allocation22_spill]] %s10256_s27 }
  0x34   :  { %11382 = sst [smem:[#allocation23_spill]] %s10261_s4 }
  0x35   :  { %s10276_s27 = sld [smem:[%s11353_s0 + %s10098_s22]]   ;;  %s10102_s22 = smov 36  }
  0x36   :  { %11383 = sst [smem:[#allocation24_spill]] %s10266_s12 }
  0x37   :  { %11384 = sst [smem:[#allocation25_spill]] %s10271_s6 }
  0x38   :  { %s10281_s4 = sld [smem:[%s11353_s0 + %s10099_s28]]   ;;  %s10103_s28 = smov 37  }
  0x39   :  { %s10286_s12 = sld [smem:[%s11353_s0 + %s10100_s7]]  }
  0x3a   :  { %s10291_s6 = sld [smem:[%s11353_s0 + %s10101_s15]]  }
  0x3b   :  { %11385 = sst [smem:[#allocation26_spill]] %s10276_s27 }
  0x3c   :  { %s10296_s27 = sld [smem:[%s11353_s0 + %s10102_s22]]  }
  0x3e   :  { %11386 = sst [smem:[#allocation27_spill]] %s10281_s4 }
  0x3f   :  { %s10301_s4 = sld [smem:[%s11353_s0 + %s10103_s28]]  }
  0x40   :  { %81 = vsyncpa [#allocation3], 0  ;;  %v10304_v0 = vld [vmem:[%s10116_s5 + $0x18] sm:$0xff]  ;;  %v10307_v1 = vld [vmem:[%s10116_s5 + $0x10] sm:$0xff]  ;;  %vm159_vm0 = vcmask 261120  }
  0x41   :  { %8864 = vmatprep.subr.mxu0 %v10304_v0  ;;  %8875 = vmatprep.subr.mxu1 %v10304_v0  ;;  %v10314_v2 = vld [vmem:[%s10116_s5 + $0x8] sm:$0xff]  ;;  %v10321_v3 = vld [vmem:[%s10116_s5] sm:$0xff] }
  0x42   :  { %8865 = vmatpush3.msra.mxu0 %v10304_v0  ;;  %8876 = vmatpush3.msra.mxu1 %v10304_v0  ;;  %v157_v4 = vld [vmem:[%s10121_s9] sm:$0xff] }
  0x43   :  { %8866 = vmatprep.subr.mxu0 %v10307_v1  ;;  %8877 = vmatprep.subr.mxu1 %v10307_v1 }
  0x44   :  { %8867 = vmatpush3.msra.mxu0 %v10307_v1  ;;  %8878 = vmatpush3.msra.mxu1 %v10307_v1 }
  0x45   :  { %8868 = vmatprep.subr.mxu0 %v10314_v2  ;;  %8879 = vmatprep.subr.mxu1 %v10314_v2 }
  0x46   :  { %82 = vsyncpa [#allocation5], 0  ;;  %8869 = vmatpush3.msra.mxu0 %v10314_v2  ;;  %8880 = vmatpush3.msra.mxu1 %v10314_v2  ;;  %v7953_v5 = vld [vmem:[%s10121_s9 + $0x10] sm:$0xff]  ;;  %v158_v6 = vld [vmem:[%s10121_s9 + $0x8] sm:$0xff]  ;;  %vm338_vm1 = vcmask 392192   ;;  %v10104_v46 = vmov 0.0  }
  0x47   :  { %8870 = vmatprep.subr.mxu0 %v10321_v3  ;;  %8881 = vmatprep.subr.mxu1 %v10321_v3  ;;  %v7954_v7 = vld [vmem:[%s10121_s9 + $0x18] sm:$0xff]  ;;  %v246_v9 = vld [vmem:[%s10126_s13 + $0x28] sm:$0xff]  ;;  %v7961_v10 = vld [vmem:[%s10126_s13 + $0x50] sm:$0xff]  ;;  %vm10105_vm2 = vmmov 0   ;;  %vm856_vm5 = vcmask 130048   ;;  %vm1022_vm6 = vcmask 523264  }
  0x48   :  { %8871 = vmatpush3.msra.mxu0 %v10321_v3  ;;  %8872 = vmatprep.mubr.msk.f32.mxu0 %vm159_vm0, %v157_v4  ;;  %v7962_v8 = vld [vmem:[%s10126_s13 + $0x58] sm:$0xff]  ;;  %v245_v11 = vld [vmem:[%s10126_s13 + $0x20] sm:$0xff]  ;;  %v7960_v12 = vld [vmem:[%s10126_s13 + $0x48] sm:$0xff]  ;;  %vm1901_vm8 = vcmask 64512   ;;  %vm2536_vm9 = vcmask 1041408   ;;  %vm2529_vm10 = vcmask 58368  }
  0x49   :  { %8882 = vmatpush3.msra.mxu1 %v10321_v3  ;;  %8883 = vmatprep.mubr.msk.f32.mxu1 %vm159_vm0, %v7953_v5  ;;  %v244_v13 = vld [vmem:[%s10126_s13 + $0x18] sm:$0xff]  ;;  %v7959_v14 = vld [vmem:[%s10126_s13 + $0x40] sm:$0xff]  ;;  %v243_v15 = vld [vmem:[%s10126_s13 + $0x10] sm:$0xff]  ;;  %vm2532_vm11 = vcmask 15360   ;;  %s11387_s0 = sld [smem:[#allocation10_spill]]  ;;  %s10106_s16 = smov [#allocation2]  }
  0x4a   :  { %8873 = vmatmul.mubr.msk.f32.vlgmr.msra.gmra.mxu0 %vm159_vm0, %v158_v6  ;;  %8884 = vmatmul.mubr.msk.f32.vlgmr.msra.gmra.mxu1 %vm159_vm0, %v7954_v7  ;;  %v7958_v16 = vld [vmem:[%s10126_s13 + $0x38] sm:$0xff]  ;;  %v242_v17 = vld [vmem:[%s10126_s13 + $0x8] sm:$0xff]  ;;  %v7957_v18 = vld [vmem:[%s10126_s13 + $0x30] sm:$0xff]  ;;  %s11388_s5 = sld [smem:[#allocation8_spill]]  ;;  %s7890_s18 = sshll.u32 %s10106_s16, 4  ;;  %s7891_s18 = int_to_ptr.vmem [resolvable:$true] %s7890_s18 }
  0x4b   :  { %8886 = vmatprep.subr.mxu0 %v7962_v8  ;;  %8901 = vmatprep.subr.mxu1 %v246_v9  ;;  %v241_v19 = vld [vmem:[%s10126_s13] sm:$0xff]  ;;  %v7976_v20 = vld [vmem:[%s10126_s13 + $0x88] sm:$0xff]  ;;  %v7979_v27 = vld [vmem:[%s10121_s9 + $0x30] sm:$0xff]  ;;  %s11403_s7 = sld [smem:[#allocation26_spill]]  ;;  %s10023_s22 = scalar_lea.vmem %s7891_s18, 32 }
  0x4c   :  { %8887 = vmatpush3.msra.mxu0 %v7962_v8  ;;  %8902 = vmatpush3.msra.mxu1 %v246_v9  ;;  %v7967_v25 = vld [vmem:[%s10121_s9 + $0x20] sm:$0xff]  ;;  %v7968_v26 = vld [vmem:[%s10121_s9 + $0x28] sm:$0xff]  ;;  %v7980_v28 = vld [vmem:[%s10121_s9 + $0x38] sm:$0xff]  ;;  %s11389_s9 = sld [smem:[#allocation9_spill]]  ;;  %p10024_p0 = scmp.ne.s32.totalorder %s7891_s18, %s10023_s22 }
  0x4d   :  { %8888 = vmatprep.subr.mxu0 %v7961_v10  ;;  %8903 = vmatprep.subr.mxu1 %v245_v11  ;;  %v7975_v29 = vld [vmem:[%s10126_s13 + $0x80] sm:$0xff]  ;;  %v7974_v30 = vld [vmem:[%s10126_s13 + $0x78] sm:$0xff]  ;;  %v7973_v31 = vld [vmem:[%s10126_s13 + $0x70] sm:$0xff]  ;;  %s11404_s10 = sld [smem:[#allocation23_spill]]  ;;  %p10028_p1 = scmp.lt.s32.totalorder %s7891_s18, %s7891_s18 }
  0x4e   :  { %8889 = vmatpush3.msra.mxu0 %v7961_v10  ;;  %8904 = vmatpush3.msra.mxu1 %v245_v11  ;;  %v7972_v32 = vld [vmem:[%s10126_s13 + $0x68] sm:$0xff]  ;;  %v7971_v33 = vld [vmem:[%s10126_s13 + $0x60] sm:$0xff]  ;;  %v7988_v34 = vld [vmem:[%s10126_s13 + $0xb8] sm:$0xff]  ;;  %s11405_s11 = sld [smem:[#allocation24_spill]]  ;;  %p10029_p2 = scmp.lt.s32.totalorder %s10023_s22, %s10023_s22 }
  0x4f   :  { %8890 = vmatprep.subr.mxu0 %v7960_v12  ;;  %8905 = vmatprep.subr.mxu1 %v244_v13  ;;  %v7987_v39 = vld [vmem:[%s10126_s13 + $0xb0] sm:$0xff]  ;;  %v7986_v40 = vld [vmem:[%s10126_s13 + $0xa8] sm:$0xff]  ;;  %v7985_v41 = vld [vmem:[%s10126_s13 + $0xa0] sm:$0xff]  ;;  %s11406_s15 = sld [smem:[#allocation27_spill]] }
  0x50   :  { %8891 = vmatpush3.msra.mxu0 %v7960_v12  ;;  %8906 = vmatpush3.msra.mxu1 %v244_v13  ;;  %v7984_v43 = vld [vmem:[%s10126_s13 + $0x98] sm:$0xff]  ;;  %v7983_v45 = vld [vmem:[%s10126_s13 + $0x90] sm:$0xff]  ;;  %v855_v62 = vld [vmem:[%s10131_s17] sm:$0xff]  ;;  %s11390_s13 = sld [smem:[#allocation11_spill]]  ;;  %p10030_p3 = por %p10029_p2, %p10028_p1 }
  0x51   :  { %8892 = vmatprep.subr.mxu0 %v7959_v14  ;;  %8907 = vmatprep.subr.mxu1 %v243_v15  ;;  %v7992_v63 = vld [vmem:[%s10131_s17 + $0x8] sm:$0xff]  ;;  %v936_v4 = vld [vmem:[%s10136_s21 + $0x30] sm:$0xff]  ;;  %v7998_v7 = vld [vmem:[%s10136_s21 + $0x60] sm:$0xff] }
  0x52   :  { %8893 = vmatpush3.msra.mxu0 %v7959_v14  ;;  %8908 = vmatpush3.msra.mxu1 %v243_v15  ;;  %v7999_v5 = vld [vmem:[%s10136_s21 + $0x68] sm:$0xff]  ;;  %v934_v8 = vld [vmem:[%s10136_s21 + $0x20] sm:$0xff]  ;;  %v7997_v9 = vld [vmem:[%s10136_s21 + $0x58] sm:$0xff]  ;;  %p10031_p4 = pnand %p10030_p3, %p10024_p0 }
  0x53   :  { %8894 = vmatprep.subr.mxu0 %v7958_v16  ;;  %8909 = vmatprep.subr.mxu1 %v242_v17  ;;  %v935_v6 = vld [vmem:[%s10136_s21 + $0x28] sm:$0xff]  ;;  %v933_v10 = vld [vmem:[%s10136_s21 + $0x18] sm:$0xff]  ;;  %v7996_v11 = vld [vmem:[%s10136_s21 + $0x50] sm:$0xff] }
  0x54   :  { %8895 = vmatpush3.msra.mxu0 %v7958_v16  ;;  %8910 = vmatpush3.msra.mxu1 %v242_v17  ;;  %v932_v12 = vld [vmem:[%s10136_s21 + $0x10] sm:$0xff]  ;;  %v7995_v13 = vld [vmem:[%s10136_s21 + $0x48] sm:$0xff]  ;;  %v7994_v15 = vld [vmem:[%s10136_s21 + $0x40] sm:$0xff] }
  0x55   :  { %8896 = vmatprep.subr.mxu0 %v7957_v18  ;;  %8911 = vmatprep.subr.mxu1 %v241_v19  ;;  %v931_v14 = vld [vmem:[%s10136_s21 + $0x8] sm:$0xff]  ;;  %v930_v16 = vld [vmem:[%s10136_s21] sm:$0xff] }
  0x56   :  { %8897 = vmatpush3.msra.mxu0 %v7957_v18  ;;  %8912 = vmatpush3.msra.mxu1 %v241_v19  ;;  %v8013_v19 = vld [vmem:[%s10136_s21 + $0xb8] sm:$0xff] }
  0x57   :  { %8916 = vmatprep.subr.mxu0 %v10304_v0  ;;  %8927 = vmatprep.subr.mxu1 %v7976_v20 }
 0x10a   :  { %v8874_v21 = vpop.f32.mrf.mxu0  ;;  %v8885_v22 = vpop.f32.mrf.mxu1 }
 0x10c   :  { %v232_v23 = vpop.f32.mrf.mxu0  ;;  %v322_v24 = vpop.f32.mrf.mxu1 }
 0x10d   :  { %8898 = vmatprep.mubr.msk.f32.mxu0 %vm338_vm1, %v322_v24  ;;  %8913 = vmatprep.mubr.msk.f32.mxu1 %vm338_vm1, %v232_v23  ;;  %v8012_v23 = vld [vmem:[%s10136_s21 + $0xb0] sm:$0xff]  ;;  %v8015_v24 = vld [vmem:[%s10131_s17 + $0x18] sm:$0xff] }
 0x10e   :  { %8899 = vmatmul.mubr.msk.f32.vlgmr.msra.gmra.mxu0 %vm338_vm1, %v8885_v22  ;;  %8914 = vmatmul.mubr.msk.f32.vlgmr.msra.gmra.mxu1 %vm338_vm1, %v8874_v21  ;;  %v8004_v21 = vld [vmem:[%s10131_s17 + $0x10] sm:$0xff]  ;;  %s11391_s17 = sld [smem:[#allocation12_spill]] }
 0x10f   :  { %8917 = vmatpush3.msra.mxu0 %v10304_v0  ;;  %8924 = vmatprep.mubr.msk.f32.mxu0 %vm159_vm0, %v7967_v25  ;;  %v8011_v25 = vld [vmem:[%s10136_s21 + $0xa8] sm:$0xff] }
 0x110   :  { %8918 = vmatprep.subr.mxu0 %v10307_v1  ;;  %8928 = vmatpush3.msra.mxu1 %v7976_v20 }
 0x111   :  { %8919 = vmatpush3.msra.mxu0 %v10307_v1  ;;  %8929 = vmatprep.subr.mxu1 %v7975_v29 }
 0x112   :  { %8920 = vmatprep.subr.mxu0 %v10314_v2  ;;  %8930 = vmatpush3.msra.mxu1 %v7975_v29  ;;  %v8009_v29 = vld [vmem:[%s10136_s21 + $0x98] sm:$0xff] }
 0x113   :  { %8921 = vmatpush3.msra.mxu0 %v10314_v2  ;;  %8931 = vmatprep.subr.mxu1 %v7974_v30 }
 0x114   :  { %8922 = vmatprep.subr.mxu0 %v10321_v3  ;;  %8932 = vmatpush3.msra.mxu1 %v7974_v30  ;;  %v8022_v30 = vld [vmem:[%s10136_s21 + $0xe8] sm:$0xff] }
 0x115   :  { %8923 = vmatpush3.msra.mxu0 %v10321_v3  ;;  %8933 = vmatprep.subr.mxu1 %v7973_v31 }
 0x116   :  { %8925 = vmatmul.mubr.msk.f32.vlgmr.msra.gmra.mxu0 %vm159_vm0, %v7968_v26  ;;  %8942 = vmatprep.subr.mxu0 %v10304_v0  ;;  %v8024_v26 = vld [vmem:[%s10136_s21 + $0xf8] sm:$0xff] }
 0x117   :  { %8943 = vmatpush3.msra.mxu0 %v10304_v0  ;;  %8950 = vmatprep.mubr.msk.f32.mxu0 %vm159_vm0, %v7979_v27  ;;  %v8010_v27 = vld [vmem:[%s10136_s21 + $0xa0] sm:$0xff] }
 0x118   :  { %8944 = vmatprep.subr.mxu0 %v10307_v1  ;;  %8934 = vmatpush3.msra.mxu1 %v7973_v31  ;;  %v8008_v31 = vld [vmem:[%s10136_s21 + $0x90] sm:$0xff] }
 0x119   :  { %8945 = vmatpush3.msra.mxu0 %v10307_v1  ;;  %8935 = vmatprep.subr.mxu1 %v7972_v32  ;;  %v8001_v1 = vld [vmem:[%s10136_s21 + $0x78] sm:$0xff] }
 0x11a   :  { %8946 = vmatprep.subr.mxu0 %v10314_v2  ;;  %8936 = vmatpush3.msra.mxu1 %v7972_v32  ;;  %v8021_v32 = vld [vmem:[%s10136_s21 + $0xe0] sm:$0xff] }
 0x11b   :  { %8947 = vmatpush3.msra.mxu0 %v10314_v2  ;;  %8937 = vmatprep.subr.mxu1 %v7971_v33  ;;  %v937_v2 = vld [vmem:[%s10136_s21 + $0x38] sm:$0xff] }
 0x11c   :  { %8948 = vmatprep.subr.mxu0 %v10321_v3  ;;  %8938 = vmatpush3.msra.mxu1 %v7971_v33  ;;  %v8007_v33 = vld [vmem:[%s10136_s21 + $0x88] sm:$0xff] }
 0x11d   :  { %8949 = vmatpush3.msra.mxu0 %v10321_v3  ;;  %8953 = vmatprep.subr.mxu1 %v7988_v34  ;;  %v8000_v3 = vld [vmem:[%s10136_s21 + $0x70] sm:$0xff] }
 0x11e   :  { %8951 = vmatmul.mubr.msk.f32.vlgmr.msra.gmra.mxu0 %vm159_vm0, %v7980_v28  ;;  %8975 = vmatprep.subr.mxu0 %v10104_v46  ;;  %v8023_v28 = vld [vmem:[%s10136_s21 + $0xf0] sm:$0xff] }
 0x11f   :  { %8979 = vmatprep.mubr.msk.f32.mxu0 %vm10105_vm2, %v10104_v46 }
 0x1ce   :  { %v8900_v35 = vpop.f32.mrf.mxu0  ;;  %v8915_v47 = vpop.f32.mrf.mxu1 }
 0x1cf   :  { %v498_v50 = vadd.f32 %v8915_v47, %v8900_v35  ;;  %v8006_v35 = vld [vmem:[%s10136_s21 + $0x80] sm:$0xff] }
 0x1d0   :  { %v411_v36 = vpop.f32.mrf.mxu0  ;;  %v492_v48 = vpop.f32.mrf.mxu1 }
 0x1d1   :  { %v493_v52 = vadd.f32 %v492_v48, %v411_v36  ;;  %v8019_v36 = vld [vmem:[%s10136_s21 + $0xd0] sm:$0xff] }
 0x1d6   :  { %v8926_v37 = vpop.f32.mrf.mxu0 }
 0x1d8   :  { %v576_v38 = vpop.f32.mrf.mxu0 }
 0x1d9   :  { %8939 = vmatprep.mubr.msk.f32.mxu1 %vm338_vm1, %v576_v38  ;;  %v8017_v38 = vld [vmem:[%s10136_s21 + $0xc0] sm:$0xff] }
 0x1da   :  { %8940 = vmatmul.mubr.msk.f32.vlgmr.msra.gmra.mxu1 %vm338_vm1, %v8926_v37  ;;  %v8018_v37 = vld [vmem:[%s10136_s21 + $0xc8] sm:$0xff] }
 0x1db   :  { %8954 = vmatpush3.msra.mxu1 %v7988_v34  ;;  %v8020_v34 = vld [vmem:[%s10136_s21 + $0xd8] sm:$0xff]  ;;  %s11392_s21 = sld [smem:[#allocation15_spill]] }
 0x1dc   :  { %8955 = vmatprep.subr.mxu1 %v7987_v39 }
 0x1dd   :  { %8956 = vmatpush3.msra.mxu1 %v7987_v39 }
 0x1de   :  { %8957 = vmatprep.subr.mxu1 %v7986_v40  ;;  %v8952_v42 = vpop.f32.mrf.mxu0 }
 0x1df   :  { %8958 = vmatpush3.msra.mxu1 %v7986_v40 }
 0x1e0   :  { %8959 = vmatprep.subr.mxu1 %v7985_v41  ;;  %v750_v44 = vpop.f32.mrf.mxu0 }
 0x1e1   :  { %8960 = vmatpush3.msra.mxu1 %v7985_v41  ;;  %8965 = vmatprep.mubr.msk.f32.mxu1 %vm338_vm1, %v750_v44 }
 0x1e2   :  { %8961 = vmatprep.subr.mxu1 %v7984_v43 }
 0x1e3   :  { %8962 = vmatpush3.msra.mxu1 %v7984_v43 }
 0x1e4   :  { %8963 = vmatprep.subr.mxu1 %v7983_v45 }
 0x1e5   :  { %8964 = vmatpush3.msra.mxu1 %v7983_v45 }
 0x1e6   :  { %8966 = vmatmul.mubr.msk.f32.vlgmr.msra.gmra.mxu1 %vm338_vm1, %v8952_v42  ;;  %8968 = vmatprep.subr.mxu1 %v10104_v46 }
 0x1e7   :  { %8972 = vmatprep.mubr.msk.f32.mxu1 %vm10105_vm2, %v10104_v46 }
 0x29a   :  { %v8941_v49 = vpop.f32.mrf.mxu1 }
 0x29b   :  { %v674_v53 = vadd.f32 %v8941_v49, %v498_v50  ;;  %v1499_v49 = vld [vmem:[%s10151_s3 + $0x38] sm:$0xff]  ;;  %v1498_v50 = vld [vmem:[%s10151_s3 + $0x30] sm:$0xff] }
 0x29c   :  { %v664_v51 = vpop.f32.mrf.mxu1 }
 0x29d   :  { %v673_v55 = vadd.f32 %v664_v51, %v493_v52  ;;  %v1497_v51 = vld [vmem:[%s10151_s3 + $0x28] sm:$0xff]  ;;  %v1496_v52 = vld [vmem:[%s10151_s3 + $0x20] sm:$0xff] }
 0x2a6   :  { %v8967_v54 = vpop.f32.mrf.mxu1 }
 0x2a7   :  { %v848_v56 = vadd.f32 %v8967_v54, %v674_v53  ;;  %v1495_v53 = vld [vmem:[%s10151_s3 + $0x18] sm:$0xff]  ;;  %v1494_v54 = vld [vmem:[%s10151_s3 + $0x10] sm:$0xff] }
 0x2a8   :  { %v838_v57 = vpop.f32.mrf.mxu1 }
 0x2a9   :  { %vm850_vm3 = vcmp.ge.f32.partialorder %v848_v56, 0.0  ;;  %v852_v58 = vmul.f32 0.2, %v848_v56  ;;  %v847_v59 = vadd.f32 %v838_v57, %v673_v55  ;;  %v1493_v55 = vld [vmem:[%s10151_s3 + $0x8] sm:$0xff] }
 0x2ab   :  { %vm849_vm4 = vcmp.ge.f32.partialorder %v847_v59, 0.0  ;;  %v851_v60 = vmul.f32 0.2, %v847_v59  ;;  %v10401_v61 = vsel %vm850_vm3, %v848_v56, %v852_v58  ;;  %v1492_v56 = vld [vmem:[%s10151_s3] sm:$0xff]  ;;  %s11395_s3 = sld [smem:[#allocation14_spill]] }
 0x2ac   :  { %8969 = vmatpush3.msra.mxu1 %v10401_v61  ;;  %8976 = vmatpush3.msra.mxu0 %v10401_v61 }
 0x2ad   :  { %8970 = vmatprep.subr.mxu1 %v10104_v46  ;;  %8977 = vmatprep.subr.mxu0 %v10104_v46  ;;  %v10409_v0 = vsel %vm849_vm4, %v847_v59, %v851_v60 }
 0x2ae   :  { %8971 = vmatpush3.msra.mxu1 %v10409_v0  ;;  %8978 = vmatpush3.msra.mxu0 %v10409_v0 }
 0x2af   :  { %8973 = vmatmul.mubr.msk.f32.vlgmr.msra.gmra.mxu1 %vm856_vm5, %v855_v62  ;;  %8980 = vmatmul.mubr.msk.f32.vlgmr.msra.gmra.mxu0 %vm856_vm5, %v7992_v63 }
 0x2b0   :  { %8982 = vmatprep.subr.mxu0 %v10104_v46  ;;  %9001 = vmatprep.subr.mxu1 %v10104_v46 }
 0x2b1   :  { %8983 = vmatpush3.msra.mxu0 %v8001_v1  ;;  %9002 = vmatpush3.msra.mxu1 %v937_v2 }
 0x2b2   :  { %8984 = vmatprep.subr.mxu0 %v10104_v46  ;;  %9003 = vmatprep.subr.mxu1 %v10104_v46 }
 0x2b3   :  { %8985 = vmatpush3.msra.mxu0 %v8000_v3  ;;  %9004 = vmatpush3.msra.mxu1 %v936_v4 }
 0x2b4   :  { %8986 = vmatprep.subr.mxu0 %v10104_v46  ;;  %9005 = vmatprep.subr.mxu1 %v10104_v46 }
 0x2b5   :  { %8987 = vmatpush3.msra.mxu0 %v7999_v5  ;;  %9006 = vmatpush3.msra.mxu1 %v935_v6  ;;  %v1575_v6 = vld [vmem:[%s10156_s8 + $0x8] sm:$0xff] }
 0x2b6   :  { %8988 = vmatprep.subr.mxu0 %v10104_v46  ;;  %9007 = vmatprep.subr.mxu1 %v10104_v46 }
 0x2b7   :  { %8989 = vmatpush3.msra.mxu0 %v7998_v7  ;;  %9008 = vmatpush3.msra.mxu1 %v934_v8  ;;  %v1574_v7 = vld [vmem:[%s10156_s8] sm:$0xff]  ;;  %s11396_s8 = sld [smem:[#allocation17_spill]] }
 0x2b8   :  { %8990 = vmatprep.subr.mxu0 %v10104_v46  ;;  %9009 = vmatprep.subr.mxu1 %v10104_v46 }
 0x2b9   :  { %8991 = vmatpush3.msra.mxu0 %v7997_v9  ;;  %9010 = vmatpush3.msra.mxu1 %v933_v10 }
 0x2ba   :  { %8992 = vmatprep.subr.mxu0 %v10104_v46  ;;  %9011 = vmatprep.subr.mxu1 %v10104_v46 }
 0x2bb   :  { %8993 = vmatpush3.msra.mxu0 %v7996_v11  ;;  %9012 = vmatpush3.msra.mxu1 %v932_v12  ;;  %v1649_v11 = vlaneseq }
 0x2bc   :  { %8994 = vmatprep.subr.mxu0 %v10104_v46  ;;  %9013 = vmatprep.subr.mxu1 %v10104_v46 }
 0x2bd   :  { %8995 = vmatpush3.msra.mxu0 %v7995_v13  ;;  %9014 = vmatpush3.msra.mxu1 %v931_v14  ;;  %v1650_v12 = vshrl.u32 %v1649_v11, 7  ;;  %v8049_v11 = vld [vmem:[%s10166_s19 + $0x98] sm:$0xff] }
 0x2be   :  { %8996 = vmatprep.subr.mxu0 %v10104_v46  ;;  %9015 = vmatprep.subr.mxu1 %v10104_v46 }
 0x2bf   :  { %8997 = vmatpush3.msra.mxu0 %v7994_v15  ;;  %8998 = vmatprep.mubr.msk.f32.mxu0 %vm10105_vm2, %v10104_v46  ;;  %v10550_v13 = vsub.s32 0, %v1650_v12  ;;  %v8062_v12 = vld [vmem:[%s10166_s19 + $0xe8] sm:$0xff] }
 0x2c0   :  { %9017 = vmatprep.mubr.msk.f32.mxu1 %vm10105_vm2, %v10104_v46  ;;  %9020 = vmatprep.subr.mxu0 %v10104_v46 }
 0x2c1   :  { %9016 = vmatpush3.msra.mxu1 %v930_v16 }
 0x2c2   :  { %9027 = vmatprep.subr.mxu1 %v10104_v46 }
 0x36f   :  { %v926_v17 = vpop.f32.mrf.mxu1  ;;  %v1009_v18 = vpop.f32.mrf.mxu0 }
 0x370   :  { %8999 = vmatmul.mubr.msk.f32.vlgmr.msra.gmra.mxu0 %vm1022_vm6, %v1009_v18  ;;  %9018 = vmatmul.mubr.msk.f32.vlgmr.msra.gmra.mxu1 %vm1022_vm6, %v926_v17 }
 0x371   :  { %9021 = vmatpush3.msra.mxu0 %v10401_v61  ;;  %v8981_v20 = vpop.f32.mrf.mxu0  ;;  %9024 = vmatprep.mubr.msk.f32.mxu0 %vm10105_vm2, %v10104_v46  ;;  %v8974_v22 = vpop.f32.mrf.mxu1 }
 0x372   :  { %9022 = vmatprep.subr.mxu0 %v10104_v46  ;;  %9028 = vmatpush3.msra.mxu1 %v8013_v19 }
 0x373   :  { %9023 = vmatpush3.msra.mxu0 %v10409_v0  ;;  %9029 = vmatprep.subr.mxu1 %v10104_v46 }
 0x374   :  { %9046 = vmatprep.subr.mxu0 %v10104_v46  ;;  %9025 = vmatmul.mubr.msk.f32.vlgmr.msra.gmra.mxu0 %vm856_vm5, %v8004_v21 }
 0x375   :  { %9047 = vmatpush3.msra.mxu0 %v10401_v61  ;;  %9050 = vmatprep.mubr.msk.f32.mxu0 %vm10105_vm2, %v10104_v46 }
 0x376   :  { %9048 = vmatprep.subr.mxu0 %v10104_v46  ;;  %9030 = vmatpush3.msra.mxu1 %v8012_v23 }
 0x377   :  { %9049 = vmatpush3.msra.mxu0 %v10409_v0  ;;  %9031 = vmatprep.subr.mxu1 %v10104_v46 }
 0x378   :  { %9051 = vmatmul.mubr.msk.f32.vlgmr.msra.gmra.mxu0 %vm856_vm5, %v8015_v24  ;;  %9053 = vmatprep.subr.mxu0 %v10104_v46 }
 0x379   :  { %9032 = vmatpush3.msra.mxu1 %v8011_v25  ;;  %9054 = vmatpush3.msra.mxu0 %v8024_v26 }
 0x37a   :  { %9033 = vmatprep.subr.mxu1 %v10104_v46  ;;  %9055 = vmatprep.subr.mxu0 %v10104_v46 }
 0x37b   :  { %9034 = vmatpush3.msra.mxu1 %v8010_v27  ;;  %9056 = vmatpush3.msra.mxu0 %v8023_v28 }
 0x37c   :  { %9035 = vmatprep.subr.mxu1 %v10104_v46  ;;  %9057 = vmatprep.subr.mxu0 %v10104_v46 }
 0x37d   :  { %9036 = vmatpush3.msra.mxu1 %v8009_v29  ;;  %9058 = vmatpush3.msra.mxu0 %v8022_v30  ;;  %v1736_v30 = vld [vmem:[%s10141_s25] sm:$0x1]  ;;  %s11393_s25 = sld [smem:[#allocation16_spill]] }
 0x37e   :  { %9037 = vmatprep.subr.mxu1 %v10104_v46  ;;  %9059 = vmatprep.subr.mxu0 %v10104_v46 }
 0x37f   :  { %9043 = vmatprep.mubr.msk.f32.mxu1 %vm10105_vm2, %v10104_v46  ;;  %9069 = vmatprep.mubr.msk.f32.mxu0 %vm10105_vm2, %v10104_v46 }
 0x380   :  { %9038 = vmatpush3.msra.mxu1 %v8008_v31  ;;  %9060 = vmatpush3.msra.mxu0 %v8021_v32 }
 0x381   :  { %9039 = vmatprep.subr.mxu1 %v10104_v46  ;;  %9061 = vmatprep.subr.mxu0 %v10104_v46 }
 0x382   :  { %9040 = vmatpush3.msra.mxu1 %v8007_v33  ;;  %9062 = vmatpush3.msra.mxu0 %v8020_v34  ;;  %v1813_v33 = vld [vmem:[%s10146_s29] sm:$0x1]  ;;  %s11394_s29 = sld [smem:[#allocation13_spill]] }
 0x383   :  { %9041 = vmatprep.subr.mxu1 %v10104_v46  ;;  %9063 = vmatprep.subr.mxu0 %v10104_v46 }
 0x384   :  { %9042 = vmatpush3.msra.mxu1 %v8006_v35  ;;  %9064 = vmatpush3.msra.mxu0 %v8019_v36 }
 0x385   :  { %9065 = vmatprep.subr.mxu0 %v10104_v46  ;;  %9072 = vmatprep.subr.mxu1 %v10104_v46 }
 0x386   :  { %9066 = vmatpush3.msra.mxu0 %v8018_v37 }
 0x387   :  { %9067 = vmatprep.subr.mxu0 %v10104_v46 }
 0x388   :  { %9068 = vmatpush3.msra.mxu0 %v8017_v38 }
 0x389   :  { %9091 = vmatprep.subr.mxu0 %v10104_v46 }
 0x430   :  { %v1092_v39 = vpop.f32.mrf.mxu0  ;;  %v1165_v40 = vpop.f32.mrf.mxu1 }
 0x431   :  { %v1166_v41 = vadd.f32 %v1165_v40, %v1092_v39 }
 0x432   :  { %v9000_v42 = vpop.f32.mrf.mxu0  ;;  %v9019_v43 = vpop.f32.mrf.mxu1 }
 0x433   :  { %v1900_v43 = vld [vmem:[%s10161_s14] sm:$0x3] }
 0x434   :  { %v1240_v44 = vpop.f32.mrf.mxu0 }
 0x435   :  { %9044 = vmatmul.mubr.msk.f32.vlgmr.msra.gmra.mxu1 %vm1022_vm6, %v1240_v44  ;;  %v8032_v44 = vld [vmem:[%s10161_s14 + $0x2] sm:$0x3] }
 0x436   :  { %v9026_v45 = vpop.f32.mrf.mxu0  ;;  %9088 = vmatprep.mubr.msk.f32.mxu1 %vm10105_vm2, %v10104_v46  ;;  %9073 = vmatpush3.msra.mxu1 %v1499_v49 }
 0x437   :  { %9074 = vmatprep.subr.mxu1 %v10104_v46 }
 0x438   :  { %v1398_v47 = vpop.f32.mrf.mxu0  ;;  %9075 = vmatpush3.msra.mxu1 %v1498_v50 }
 0x439   :  { %9070 = vmatmul.mubr.msk.f32.vlgmr.msra.gmra.mxu0 %vm1022_vm6, %v1398_v47  ;;  %9076 = vmatprep.subr.mxu1 %v10104_v46  ;;  %v8041_v47 = vld [vmem:[%s10166_s19 + $0x78] sm:$0xff] }
 0x43a   :  { %v9052_v48 = vpop.f32.mrf.mxu0  ;;  %9095 = vmatprep.mubr.msk.f32.mxu0 %vm10105_vm2, %v10104_v46  ;;  %9077 = vmatpush3.msra.mxu1 %v1497_v51 }
 0x43b   :  { %9078 = vmatprep.subr.mxu1 %v10104_v46  ;;  %9092 = vmatpush3.msra.mxu0 %v1575_v6  ;;  %v1982_v48 = vld [vmem:[%s10166_s19 + $0x38] sm:$0xff] }
 0x43c   :  { %9079 = vmatpush3.msra.mxu1 %v1496_v52  ;;  %9093 = vmatprep.subr.mxu0 %v10104_v46 }
 0x43d   :  { %9080 = vmatprep.subr.mxu1 %v10104_v46  ;;  %9094 = vmatpush3.msra.mxu0 %v1574_v7 }
 0x43e   :  { %9081 = vmatpush3.msra.mxu1 %v1495_v53  ;;  %9098 = vmatprep.subr.mxu0 %v10104_v46 }
 0x43f   :  { %9082 = vmatprep.subr.mxu1 %v10104_v46 }
 0x440   :  { %9083 = vmatpush3.msra.mxu1 %v1494_v54 }
 0x441   :  { %9084 = vmatprep.subr.mxu1 %v10104_v46 }
 0x442   :  { %9085 = vmatpush3.msra.mxu1 %v1493_v55 }
 0x443   :  { %9086 = vmatprep.subr.mxu1 %v10104_v46 }
 0x444   :  { %9087 = vmatpush3.msra.mxu1 %v1492_v56 }
 0x445   :  { %9117 = vmatprep.subr.mxu1 %v10104_v46 }
 0x4f5   :  { %v1322_v57 = vpop.f32.mrf.mxu1 }
 0x4f6   :  { %v1326_v59 = vadd.f32 %v1322_v57, %v1166_v41  ;;  %v8036_v57 = vld [vmem:[%s10166_s19 + $0x50] sm:$0xff] }
 0x4f7   :  { %v9045_v58 = vpop.f32.mrf.mxu1 }
 0x4f8   :  { %v1977_v58 = vld [vmem:[%s10166_s19 + $0x10] sm:$0xff] }
 0x4f9   :  { %v1480_v60 = vpop.f32.mrf.mxu0 }
 0x4fa   :  { %v1484_v61 = vadd.f32 %v1480_v60, %v1326_v59  ;;  %v8035_v59 = vld [vmem:[%s10166_s19 + $0x48] sm:$0xff] }
 0x4fb   :  { %v9071_v62 = vpop.f32.mrf.mxu0  ;;  %v1976_v60 = vld [vmem:[%s10166_s19 + $0x8] sm:$0xff] }
 0x4fc   :  { %v1485_v63 = vsel %vm1022_vm6, %v1484_v61, 0.0  ;;  %v1975_v62 = vld [vmem:[%s10166_s19] sm:$0xff] }
 0x4fd   :  { %v1486_v0 = vrot.slane %v1485_v63, 4 }
 0x4ff   :  { %v1487_v1 = vadd.f32 %v1486_v0, %v1485_v63 }
 0x501   :  { %v1488_v2 = vrot.slane %v1487_v1, 2 }
 0x503   :  { %v1489_v3 = vadd.f32 %v1488_v2, %v1487_v1  ;;  %v8053_v1 = vld [vmem:[%s10166_s19 + $0xb8] sm:$0xff] }
 0x505   :  { %v1490_v4 = vrot.slane %v1489_v3, 1 }
 0x507   :  { %v1491_v5 = vadd.f32 %v1490_v4, %v1489_v3  ;;  %v8044_v3 = vld [vmem:[%s10161_s14 + $0x4] sm:$0x3] }
 0x509   :  { %9089 = vmatmul.mubr.msk.f32.vlgmr.msra.gmra.mxu1 %vm1022_vm6, %v1491_v5  ;;  %v8052_v5 = vld [vmem:[%s10166_s19 + $0xb0] sm:$0xff] }
 0x50a   :  { %9121 = vmatprep.mubr.msk.f32.mxu1 %vm10105_vm2, %v10104_v46  ;;  %9118 = vmatpush3.msra.mxu1 %v1575_v6 }
 0x50b   :  { %9119 = vmatprep.subr.mxu1 %v10104_v46 }
 0x50c   :  { %9120 = vmatpush3.msra.mxu1 %v1574_v7 }
 0x50d   :  { %9124 = vmatprep.subr.mxu1 %v10104_v46 }
 0x5c9   :  { %v1569_v8 = vpop.f32.mrf.mxu1 }
 0x5ca   :  { %v1573_v9 = vmul.f32 0.03125, %v1569_v8  ;;  %v8064_v8 = vld [vmem:[%s10166_s19 + $0xf8] sm:$0xff] }
 0x5cb   :  { %v9090_v10 = vpop.f32.mrf.mxu1 }
 0x5cc   :  { %9096 = vmatmul.mubr.msk.f32.vlgmr.msra.gmra.mxu0 %vm856_vm5, %v1573_v9  ;;  %v8050_v9 = vld [vmem:[%s10166_s19 + $0xa0] sm:$0xff]  ;;  %v8063_v10 = vld [vmem:[%s10166_s19 + $0xf0] sm:$0xff] }
 0x5cd   :  { %9099 = vmatpush3.msra.mxu0 %v1499_v49  ;;  %9114 = vmatprep.mubr.msk.f32.mxu0 %vm10105_vm2, %v10104_v46  ;;  %v8040_v49 = vld [vmem:[%s10166_s19 + $0x70] sm:$0xff] }
 0x5ce   :  { %9100 = vmatprep.subr.mxu0 %v10104_v46 }
 0x5cf   :  { %9101 = vmatpush3.msra.mxu0 %v1498_v50  ;;  %v1981_v50 = vld [vmem:[%s10166_s19 + $0x30] sm:$0xff] }
 0x5d0   :  { %9102 = vmatprep.subr.mxu0 %v10104_v46 }
 0x5d1   :  { %9103 = vmatpush3.msra.mxu0 %v1497_v51  ;;  %v8039_v51 = vld [vmem:[%s10166_s19 + $0x68] sm:$0xff] }
 0x5d2   :  { %9104 = vmatprep.subr.mxu0 %v10104_v46 }
 0x5d3   :  { %9105 = vmatpush3.msra.mxu0 %v1496_v52  ;;  %v1980_v52 = vld [vmem:[%s10166_s19 + $0x28] sm:$0xff] }
 0x5d4   :  { %9106 = vmatprep.subr.mxu0 %v10104_v46 }
 0x5d5   :  { %9107 = vmatpush3.msra.mxu0 %v1495_v53  ;;  %v8038_v53 = vld [vmem:[%s10166_s19 + $0x60] sm:$0xff] }
 0x5d6   :  { %9108 = vmatprep.subr.mxu0 %v10104_v46 }
 0x5d7   :  { %9109 = vmatpush3.msra.mxu0 %v1494_v54  ;;  %v1979_v54 = vld [vmem:[%s10166_s19 + $0x20] sm:$0xff] }
 0x5d8   :  { %9110 = vmatprep.subr.mxu0 %v10104_v46 }
 0x5d9   :  { %9111 = vmatpush3.msra.mxu0 %v1493_v55  ;;  %v8037_v55 = vld [vmem:[%s10166_s19 + $0x58] sm:$0xff] }
 0x5da   :  { %9112 = vmatprep.subr.mxu0 %v10104_v46 }
 0x5db   :  { %9113 = vmatpush3.msra.mxu0 %v1492_v56  ;;  %v1978_v56 = vld [vmem:[%s10166_s19 + $0x18] sm:$0xff] }
 0x5dc   :  { %9136 = vmatprep.subr.mxu0 %v10104_v46 }
 0x68c   :  { %v1645_v14 = vpop.f32.mrf.mxu0 }
 0x68d   :  { %v1652_v15 = vrot.slane %v1645_v14, %v10550_v13  ;;  %v8048_v14 = vld [vmem:[%s10166_s19 + $0x90] sm:$0xff] }
 0x68e   :  { %v9097_v16 = vpop.f32.mrf.mxu0 }
 0x68f   :  { %v1653_v17 = vsub.f32 %v1484_v61, %v1652_v15  ;;  %v8034_v61 = vld [vmem:[%s10166_s19 + $0x40] sm:$0xff]  ;;  %v8047_v16 = vld [vmem:[%s10166_s19 + $0x88] sm:$0xff] }
 0x690   :  { %v8061_v15 = vld [vmem:[%s10166_s19 + $0xe0] sm:$0xff] }
 0x691   :  { %v1654_v18 = vmul.f32 %v1653_v17, %v1653_v17 }
 0x693   :  { %v1655_v19 = vsel %vm1022_vm6, %v1654_v18, 0.0  ;;  %v8046_v18 = vld [vmem:[%s10166_s19 + $0x80] sm:$0xff] }
 0x694   :  { %v1656_v20 = vrot.slane %v1655_v19, 4 }
 0x696   :  { %v1657_v21 = vadd.f32 %v1656_v20, %v1655_v19  ;;  %v8059_v19 = vld [vmem:[%s10166_s19 + $0xd0] sm:$0xff]  ;;  %v8058_v20 = vld [vmem:[%s10166_s19 + $0xc8] sm:$0xff] }
 0x698   :  { %v1658_v22 = vrot.slane %v1657_v21, 2 }
 0x69a   :  { %v1659_v23 = vadd.f32 %v1658_v22, %v1657_v21  ;;  %v8057_v21 = vld [vmem:[%s10166_s19 + $0xc0] sm:$0xff] }
 0x69c   :  { %v1660_v24 = vrot.slane %v1659_v23, 1 }
 0x69e   :  { %v1661_v25 = vadd.f32 %v1660_v24, %v1659_v23 }
 0x6a0   :  { %9115 = vmatmul.mubr.msk.f32.vlgmr.msra.gmra.mxu0 %vm1022_vm6, %v1661_v25 }
 0x6a1   :  { %9138 = vmatprep.mubr.msk.f32.mxu0 %vm10105_vm2, %v10104_v46 }
 0x760   :  { %v1731_v26 = vpop.f32.mrf.mxu0 }
 0x761   :  { %v1735_v27 = vmul.f32 0.03125, %v1731_v26 }
 0x762   :  { %v9116_v28 = vpop.f32.mrf.mxu0 }
 0x763   :  { %v1737_v29 = vadd.f32 1e-05, %v1735_v27 }
 0x765   :  { %10007 = vrsqrt.f32 %v1737_v29 }
 0x772   :  { %v10008_v31 = vpop.eup %10007 }
 0x773   :  { %v1739_v32 = vmul.f32 %v10008_v31, %v1736_v30 }
 0x775   :  { %9122 = vmatmul.mubr.msk.f32.vlgmr.msra.gmra.mxu1 %vm856_vm5, %v1739_v32 }
 0x776   :  { %9125 = vmatpush3.msra.mxu1 %v1575_v6  ;;  %9128 = vmatprep.mubr.msk.f32.mxu1 %vm10105_vm2, %v10104_v46  ;;  %v8051_v6 = vld [vmem:[%s10166_s19 + $0xa8] sm:$0xff] }
 0x777   :  { %9126 = vmatprep.subr.mxu1 %v10104_v46 }
 0x778   :  { %9127 = vmatpush3.msra.mxu1 %v1574_v7  ;;  %v8055_v7 = vld [vmem:[%s10161_s14 + $0x6] sm:$0x3]  ;;  %s11397_s14 = sld [smem:[#allocation18_spill]] }
 0x779   :  { %9129 = vmatmul.mubr.msk.f32.vlgmr.msra.gmra.mxu1 %vm856_vm5, %v1813_v33  ;;  %9131 = vmatprep.subr.mxu1 %v10104_v46 }
 0x77a   :  { %9133 = vmatprep.mubr.msk.f32.mxu1 %vm10105_vm2, %v10104_v46 }
 0x835   :  { %v1809_v34 = vpop.f32.mrf.mxu1 }
 0x836   :  { %v1890_v35 = vrot.slane %v1809_v34, %v10550_v13 }
 0x837   :  { %v9123_v36 = vpop.f32.mrf.mxu1 }
 0x838   :  { %v1891_v38 = vmul.f32 %v1890_v35, %v1653_v17  ;;  %v8060_v17 = vld [vmem:[%s10166_s19 + $0xd8] sm:$0xff]  ;;  %v2531_v36 = vld [vmem:[%s10171_s24] sm:$0xff]  ;;  %s11398_s19 = sld [smem:[#allocation20_spill]] }
 0x839   :  { %v1883_v37 = vpop.f32.mrf.mxu1 }
 0x83a   :  { %v1895_v39 = vrot.slane %v1883_v37, %v10550_v13 }
 0x83b   :  { %v9130_v40 = vpop.f32.mrf.mxu1 }
 0x83c   :  { %v1896_v41 = vadd.f32 %v1895_v39, %v1891_v38  ;;  %v8068_v38 = vld [vmem:[%s10171_s24 + $0x8] sm:$0xff]  ;;  %v2610_v39 = vld [vmem:[%s10176_s30] sm:$0xff] }
 0x83d   :  { %v8071_v40 = vld [vmem:[%s10176_s30 + $0x8] sm:$0xff] }
 0x83e   :  { %v1898_v42 = vmul.f32 0.2, %v1896_v41  ;;  %vm1897_vm7 = vcmp.ge.f32.partialorder %v1896_v41, 0.0 }
 0x840   :  { %v10571_v45 = vsel %vm1897_vm7, %v1896_v41, %v1898_v42 }
 0x841   :  { %9132 = vmatpush3.msra.mxu1 %v10571_v45  ;;  %9137 = vmatpush3.msra.mxu0 %v10571_v45 }
 0x842   :  { %9134 = vmatmul.mubr.msk.f32.vlgmr.msra.gmra.mxu1 %vm1901_vm8, %v1900_v43  ;;  %9139 = vmatmul.mubr.msk.f32.vlgmr.msra.gmra.mxu0 %vm1901_vm8, %v8032_v44 }
 0x843   :  { %9141 = vmatprep.subr.mxu1 %v10104_v46  ;;  %9160 = vmatprep.subr.mxu0 %v10104_v46 }
 0x844   :  { %9142 = vmatpush3.msra.mxu1 %v8041_v47  ;;  %9161 = vmatpush3.msra.mxu0 %v1982_v48  ;;  %v8079_v47 = vld [vmem:[%s10171_s24 + $0x18] sm:$0xff]  ;;  %v8077_v48 = vld [vmem:[%s10176_s30 + $0x10] sm:$0xff] }
 0x845   :  { %9143 = vmatprep.subr.mxu1 %v10104_v46  ;;  %9162 = vmatprep.subr.mxu0 %v10104_v46 }
 0x846   :  { %9144 = vmatpush3.msra.mxu1 %v8040_v49  ;;  %9163 = vmatpush3.msra.mxu0 %v1981_v50 }
 0x847   :  { %9145 = vmatprep.subr.mxu1 %v10104_v46  ;;  %9164 = vmatprep.subr.mxu0 %v10104_v46 }
 0x848   :  { %9146 = vmatpush3.msra.mxu1 %v8039_v51  ;;  %9165 = vmatpush3.msra.mxu0 %v1980_v52 }
 0x849   :  { %9147 = vmatprep.subr.mxu1 %v10104_v46  ;;  %9166 = vmatprep.subr.mxu0 %v10104_v46 }
 0x84a   :  { %9148 = vmatpush3.msra.mxu1 %v8038_v53  ;;  %9167 = vmatpush3.msra.mxu0 %v1979_v54  ;;  %v8082_v54 = vld [vmem:[%s10176_s30 + $0x18] sm:$0xff]  ;;  %s11400_s30 = sld [smem:[#allocation22_spill]] }
 0x84b   :  { %9149 = vmatprep.subr.mxu1 %v10104_v46  ;;  %9168 = vmatprep.subr.mxu0 %v10104_v46 }
 0x84c   :  { %9150 = vmatpush3.msra.mxu1 %v8037_v55  ;;  %9169 = vmatpush3.msra.mxu0 %v1978_v56 }
 0x84d   :  { %9151 = vmatprep.subr.mxu1 %v10104_v46  ;;  %9170 = vmatprep.subr.mxu0 %v10104_v46 }
 0x84e   :  { %9152 = vmatpush3.msra.mxu1 %v8036_v57  ;;  %9171 = vmatpush3.msra.mxu0 %v1977_v58 }
 0x84f   :  { %9153 = vmatprep.subr.mxu1 %v10104_v46  ;;  %9172 = vmatprep.subr.mxu0 %v10104_v46 }
 0x850   :  { %9154 = vmatpush3.msra.mxu1 %v8035_v59  ;;  %9173 = vmatpush3.msra.mxu0 %v1976_v60  ;;  %v3150_v59 = vld [vmem:[%s10191_s20 + $0x38] sm:$0xff]  ;;  %v3149_v60 = vld [vmem:[%s10191_s20 + $0x30] sm:$0xff] }
 0x851   :  { %9155 = vmatprep.subr.mxu1 %v10104_v46  ;;  %9174 = vmatprep.subr.mxu0 %v10104_v46 }
 0x852   :  { %9156 = vmatpush3.msra.mxu1 %v8034_v61  ;;  %9157 = vmatprep.mubr.msk.f32.mxu1 %vm10105_vm2, %v10104_v46  ;;  %v3148_v61 = vld [vmem:[%s10191_s20 + $0x28] sm:$0xff] }
 0x853   :  { %9176 = vmatprep.mubr.msk.f32.mxu0 %vm10105_vm2, %v10104_v46  ;;  %9179 = vmatprep.subr.mxu1 %v10104_v46 }
 0x854   :  { %9175 = vmatpush3.msra.mxu0 %v1975_v62  ;;  %v3147_v62 = vld [vmem:[%s10191_s20 + $0x20] sm:$0xff] }
 0x855   :  { %9184 = vmatprep.subr.mxu0 %v10104_v46 }
 0x902   :  { %v1971_v63 = vpop.f32.mrf.mxu1  ;;  %v2054_v0 = vpop.f32.mrf.mxu0 }
 0x903   :  { %9158 = vmatmul.mubr.msk.f32.vlgmr.msra.gmra.mxu1 %vm1022_vm6, %v2054_v0  ;;  %9177 = vmatmul.mubr.msk.f32.vlgmr.msra.gmra.mxu0 %vm1022_vm6, %v1971_v63  ;;  %v3146_v63 = vld [vmem:[%s10191_s20 + $0x18] sm:$0xff]  ;;  %v3145_v0 = vld [vmem:[%s10191_s20 + $0x10] sm:$0xff] }
 0x904   :  { %9180 = vmatpush3.msra.mxu1 %v10571_v45  ;;  %v9140_v2 = vpop.f32.mrf.mxu0  ;;  %9181 = vmatprep.mubr.msk.f32.mxu1 %vm10105_vm2, %v10104_v46  ;;  %v9135_v4 = vpop.f32.mrf.mxu1 }
 0x905   :  { %9203 = vmatprep.subr.mxu1 %v10104_v46  ;;  %9185 = vmatpush3.msra.mxu0 %v8053_v1  ;;  %v3144_v1 = vld [vmem:[%s10191_s20 + $0x8] sm:$0xff]  ;;  %v3143_v2 = vld [vmem:[%s10191_s20] sm:$0xff]  ;;  %s11402_s20 = sld [smem:[#allocation25_spill]] }
 0x906   :  { %9186 = vmatprep.subr.mxu0 %v10104_v46  ;;  %9200 = vmatprep.mubr.msk.f32.mxu0 %vm10105_vm2, %v10104_v46 }
 0x907   :  { %9182 = vmatmul.mubr.msk.f32.vlgmr.msra.gmra.mxu1 %vm1901_vm8, %v8044_v3  ;;  %9187 = vmatpush3.msra.mxu0 %v8052_v5 }
 0x908   :  { %9204 = vmatpush3.msra.mxu1 %v10571_v45  ;;  %9205 = vmatprep.mubr.msk.f32.mxu1 %vm10105_vm2, %v10104_v46  ;;  %v8074_v45 = vld [vmem:[%s10171_s24 + $0x10] sm:$0xff]  ;;  %s11399_s24 = sld [smem:[#allocation19_spill]] }
 0x909   :  { %9188 = vmatprep.subr.mxu0 %v10104_v46  ;;  %9208 = vmatprep.subr.mxu1 %v10104_v46 }
 0x90a   :  { %9189 = vmatpush3.msra.mxu0 %v8051_v6 }
 0x90b   :  { %9206 = vmatmul.mubr.msk.f32.vlgmr.msra.gmra.mxu1 %vm1901_vm8, %v8055_v7  ;;  %9190 = vmatprep.subr.mxu0 %v10104_v46 }
 0x90c   :  { %9209 = vmatpush3.msra.mxu1 %v8064_v8  ;;  %9191 = vmatpush3.msra.mxu0 %v8050_v9 }
 0x90d   :  { %9210 = vmatprep.subr.mxu1 %v10104_v46  ;;  %9192 = vmatprep.subr.mxu0 %v10104_v46 }
 0x90e   :  { %9211 = vmatpush3.msra.mxu1 %v8063_v10  ;;  %9193 = vmatpush3.msra.mxu0 %v8049_v11 }
 0x90f   :  { %9212 = vmatprep.subr.mxu1 %v10104_v46  ;;  %9194 = vmatprep.subr.mxu0 %v10104_v46 }
 0x910   :  { %9213 = vmatpush3.msra.mxu1 %v8062_v12  ;;  %9224 = vmatprep.mubr.msk.f32.mxu1 %vm10105_vm2, %v10104_v46 }
 0x911   :  { %9214 = vmatprep.subr.mxu1 %v10104_v46  ;;  %9195 = vmatpush3.msra.mxu0 %v8048_v14 }
 0x912   :  { %9215 = vmatpush3.msra.mxu1 %v8061_v15  ;;  %9196 = vmatprep.subr.mxu0 %v10104_v46 }
 0x913   :  { %9216 = vmatprep.subr.mxu1 %v10104_v46  ;;  %9197 = vmatpush3.msra.mxu0 %v8047_v16 }
 0x914   :  { %9217 = vmatpush3.msra.mxu1 %v8060_v17  ;;  %9198 = vmatprep.subr.mxu0 %v10104_v46  ;;  %v3226_v17 = vld [vmem:[%s11387_s0 + $0x8] sm:$0xff] }
 0x915   :  { %9218 = vmatprep.subr.mxu1 %v10104_v46  ;;  %9199 = vmatpush3.msra.mxu0 %v8046_v18  ;;  %v3225_v18 = vld [vmem:[%s11387_s0] sm:$0xff] }
 0x916   :  { %9219 = vmatpush3.msra.mxu1 %v8059_v19  ;;  %9227 = vmatprep.subr.mxu0 %v10104_v46 }
 0x917   :  { %9220 = vmatprep.subr.mxu1 %v10104_v46 }
 0x918   :  { %9221 = vmatpush3.msra.mxu1 %v8058_v20 }
 0x919   :  { %9222 = vmatprep.subr.mxu1 %v10104_v46 }
 0x91a   :  { %9223 = vmatpush3.msra.mxu1 %v8057_v21 }
 0x91b   :  { %9237 = vmatprep.subr.mxu1 %v10104_v46 }
 0x9c3   :  { %v2136_v22 = vpop.f32.mrf.mxu1  ;;  %v2209_v23 = vpop.f32.mrf.mxu0 }
 0x9c4   :  { %v2210_v24 = vadd.f32 %v2209_v23, %v2136_v22 }
 0x9c5   :  { %v9159_v25 = vpop.f32.mrf.mxu1  ;;  %v9178_v26 = vpop.f32.mrf.mxu0 }
 0x9c7   :  { %v2284_v27 = vpop.f32.mrf.mxu1 }
 0x9c8   :  { %9201 = vmatmul.mubr.msk.f32.vlgmr.msra.gmra.mxu0 %vm1022_vm6, %v2284_v27 }
 0x9c9   :  { %v9183_v28 = vpop.f32.mrf.mxu1  ;;  %9229 = vmatprep.mubr.msk.f32.mxu0 %vm10105_vm2, %v10104_v46 }
 0x9cb   :  { %v2442_v29 = vpop.f32.mrf.mxu1 }
 0x9cc   :  { %9225 = vmatmul.mubr.msk.f32.vlgmr.msra.gmra.mxu1 %vm1022_vm6, %v2442_v29 }
 0x9cd   :  { %v9207_v30 = vpop.f32.mrf.mxu1  ;;  %9239 = vmatprep.mubr.msk.f32.mxu1 %vm10105_vm2, %v10104_v46  ;;  %9238 = vmatpush3.msra.mxu1 %v8071_v40 }
 0x9ce   :  { %9247 = vmatprep.subr.mxu1 %v10104_v46 }
 0xa88   :  { %v2366_v31 = vpop.f32.mrf.mxu0 }
 0xa89   :  { %v2370_v33 = vadd.f32 %v2366_v31, %v2210_v24 }
 0xa8a   :  { %v9202_v32 = vpop.f32.mrf.mxu0 }
 0xa8c   :  { %v2524_v34 = vpop.f32.mrf.mxu1 }
 0xa8d   :  { %v2528_v35 = vadd.f32 %v2524_v34, %v2370_v33 }
 0xa8e   :  { %v9226_v37 = vpop.f32.mrf.mxu1 }
 0xa8f   :  { %9228 = vmatpush3.msk.msra.mxu0 %vm2536_vm9, %v2528_v35  ;;  %2530 = vst.msk [vmem:[#allocation2] sm:$0x3] %vm2529_vm10, %v2528_v35 }
 0xa90   :  { %9230 = vmatmul.mubr.msk.f32.vlgmr.msra.gmra.mxu0 %vm2532_vm11, %v2531_v36  ;;  %9232 = vmatprep.subr.mxu0 %v10104_v46 }
 0xa91   :  { %9233 = vmatpush3.msk.msra.mxu0 %vm2536_vm9, %v2528_v35  ;;  %9234 = vmatprep.mubr.msk.f32.mxu0 %vm10105_vm2, %v10104_v46 }
 0xa92   :  { %9242 = vmatprep.subr.mxu0 %v10104_v46 }
 0xa94   :  { %9235 = vmatmul.mubr.msk.f32.vlgmr.msra.gmra.mxu0 %vm2532_vm11, %v8068_v38  ;;  %v3387_v38 = vld [vmem:[%s11388_s5] sm:$0x1] }
 0xa95   :  { %9244 = vmatprep.mubr.msk.f32.mxu0 %vm10105_vm2, %v10104_v46  ;;  %9243 = vmatpush3.msra.mxu0 %v2610_v39 }
 0xa96   :  { %9252 = vmatprep.subr.mxu0 %v10104_v46 }
 0xb50   :  { %v2606_v41 = vpop.f32.mrf.mxu0 }
 0xb51   :  { %9245 = vmatmul.mubr.msk.f32.vlgmr.msra.gmra.mxu0 %vm1901_vm8, %v2606_v41  ;;  %v3464_v41 = vld [vmem:[%s11389_s9] sm:$0x1] }
 0xb52   :  { %v9231_v42 = vpop.f32.mrf.mxu0  ;;  %9254 = vmatprep.mubr.msk.f32.mxu0 %vm10105_vm2, %v10104_v46  ;;  %9253 = vmatpush3.msra.mxu0 %v8077_v48 }
 0xb53   :  { %9262 = vmatprep.subr.mxu0 %v10104_v46  ;;  %v3549_v42 = vld [vmem:[%s11390_s13] sm:$0xff] }
 0xb54   :  { %v2682_v43 = vpop.f32.mrf.mxu0 }
 0xb55   :  { %9240 = vmatmul.mubr.msk.f32.vlgmr.msra.gmra.mxu1 %vm1901_vm8, %v2682_v43  ;;  %v8091_v43 = vld [vmem:[%s11390_s13 + $0x10] sm:$0xff] }
 0xb56   :  { %9248 = vmatpush3.msk.msra.mxu1 %vm2536_vm9, %v2528_v35  ;;  %v9236_v44 = vpop.f32.mrf.mxu0  ;;  %9249 = vmatprep.mubr.msk.f32.mxu1 %vm10105_vm2, %v10104_v46 }
 0xb57   :  { %9257 = vmatprep.subr.mxu1 %v10104_v46 }
 0xb59   :  { %9250 = vmatmul.mubr.msk.f32.vlgmr.msra.gmra.mxu1 %vm2532_vm11, %v8074_v45 }
 0xb5a   :  { %9258 = vmatpush3.msk.msra.mxu1 %vm2536_vm9, %v2528_v35  ;;  %9259 = vmatprep.mubr.msk.f32.mxu1 %vm10105_vm2, %v10104_v46 }
 0xb5b   :  { %9267 = vmatprep.subr.mxu1 %v10104_v46 }
 0xb5d   :  { %9260 = vmatmul.mubr.msk.f32.vlgmr.msra.gmra.mxu1 %vm2532_vm11, %v8079_v47 }
 0xb5e   :  { %9283 = vmatprep.mubr.msk.f32.mxu1 %vm10105_vm2, %v10104_v46  ;;  %9268 = vmatpush3.msra.mxu1 %v3150_v59 }
 0xb5f   :  { %9269 = vmatprep.subr.mxu1 %v10104_v46 }
 0xb60   :  { %9270 = vmatpush3.msra.mxu1 %v3149_v60 }
 0xb61   :  { %9271 = vmatprep.subr.mxu1 %v10104_v46 }
 0xb62   :  { %9272 = vmatpush3.msra.mxu1 %v3148_v61 }
 0xb63   :  { %9273 = vmatprep.subr.mxu1 %v10104_v46 }
 0xb64   :  { %9274 = vmatpush3.msra.mxu1 %v3147_v62 }
 0xb65   :  { %9275 = vmatprep.subr.mxu1 %v10104_v46 }
 0xb66   :  { %9276 = vmatpush3.msra.mxu1 %v3146_v63 }
 0xb67   :  { %9277 = vmatprep.subr.mxu1 %v10104_v46 }
 0xb68   :  { %9278 = vmatpush3.msra.mxu1 %v3145_v0 }
 0xb69   :  { %9279 = vmatprep.subr.mxu1 %v10104_v46 }
 0xb6a   :  { %9280 = vmatpush3.msra.mxu1 %v3144_v1 }
 0xb6b   :  { %9281 = vmatprep.subr.mxu1 %v10104_v46 }
 0xb6c   :  { %9282 = vmatpush3.msra.mxu1 %v3143_v2 }
 0xb6d   :  { %9312 = vmatprep.subr.mxu1 %v10104_v46 }
 0xc11   :  { %v2830_v49 = vpop.f32.mrf.mxu0 }
 0xc13   :  { %v9246_v50 = vpop.f32.mrf.mxu0 }
 0xc15   :  { %v2757_v51 = vpop.f32.mrf.mxu1 }
 0xc16   :  { %v2831_v52 = vadd.f32 %v2830_v49, %v2757_v51 }
 0xc17   :  { %v9241_v53 = vpop.f32.mrf.mxu1 }
 0xc19   :  { %v2905_v55 = vpop.f32.mrf.mxu1 }
 0xc1a   :  { %9255 = vmatmul.mubr.msk.f32.vlgmr.msra.gmra.mxu0 %vm1901_vm8, %v2905_v55  ;;  %v8092_v55 = vld [vmem:[%s11390_s13 + $0x18] sm:$0xff] }
 0xc1b   :  { %v9251_v56 = vpop.f32.mrf.mxu1  ;;  %9263 = vmatpush3.msra.mxu0 %v8082_v54  ;;  %9264 = vmatprep.mubr.msk.f32.mxu0 %vm10105_vm2, %v10104_v46  ;;  %v3550_v54 = vld [vmem:[%s11390_s13 + $0x8] sm:$0xff] }
 0xc1c   :  { %9286 = vmatprep.subr.mxu0 %v10104_v46  ;;  %v8102_v56 = vld [vmem:[%s11391_s17 + $0x78] sm:$0xff] }
 0xc1d   :  { %v3056_v57 = vpop.f32.mrf.mxu1 }
 0xc1e   :  { %9265 = vmatmul.mubr.msk.f32.vlgmr.msra.gmra.mxu0 %vm1901_vm8, %v3056_v57  ;;  %v3639_v57 = vld [vmem:[%s11391_s17 + $0x38] sm:$0xff] }
 0xc1f   :  { %v9261_v58 = vpop.f32.mrf.mxu1  ;;  %9290 = vmatprep.mubr.msk.f32.mxu0 %vm10105_vm2, %v10104_v46  ;;  %9287 = vmatpush3.msra.mxu0 %v3226_v17 }
 0xc20   :  { %9288 = vmatprep.subr.mxu0 %v10104_v46  ;;  %v8101_v58 = vld [vmem:[%s11391_s17 + $0x70] sm:$0xff] }
 0xc21   :  { %9289 = vmatpush3.msra.mxu0 %v3225_v18 }
 0xc22   :  { %9293 = vmatprep.subr.mxu0 %v10104_v46 }
 0xcda   :  { %v2980_v3 = vpop.f32.mrf.mxu0 }
 0xcdb   :  { %v2984_v5 = vadd.f32 %v2980_v3, %v2831_v52  ;;  %v3634_v3 = vld [vmem:[%s11391_s17 + $0x10] sm:$0xff] }
 0xcdc   :  { %v9256_v4 = vpop.f32.mrf.mxu0 }
 0xcdd   :  { %v8096_v4 = vld [vmem:[%s11391_s17 + $0x48] sm:$0xff] }
 0xcde   :  { %v3131_v6 = vpop.f32.mrf.mxu0 }
 0xcdf   :  { %v3135_v7 = vadd.f32 %v3131_v6, %v2984_v5  ;;  %v8095_v5 = vld [vmem:[%s11391_s17 + $0x40] sm:$0xff]  ;;  %v3633_v6 = vld [vmem:[%s11391_s17 + $0x8] sm:$0xff] }
 0xce0   :  { %v9266_v8 = vpop.f32.mrf.mxu0 }
 0xce1   :  { %v3136_v9 = vsel %vm1022_vm6, %v3135_v7, 0.0  ;;  %v8118_v8 = vld [vmem:[%s11391_s17 + $0xb8] sm:$0xff] }
 0xce2   :  { %v3137_v10 = vrot.slane %v3136_v9, 4 }
 0xce4   :  { %v3138_v11 = vadd.f32 %v3137_v10, %v3136_v9 }
 0xce6   :  { %v3139_v12 = vrot.slane %v3138_v11, 2 }
 0xce8   :  { %v3140_v14 = vadd.f32 %v3139_v12, %v3138_v11 }
 0xcea   :  { %v3141_v15 = vrot.slane %v3140_v14, 1 }
 0xcec   :  { %v3142_v16 = vadd.f32 %v3141_v15, %v3140_v14  ;;  %v8107_v14 = vld [vmem:[%s11390_s13 + $0x20] sm:$0xff]  ;;  %v8117_v15 = vld [vmem:[%s11391_s17 + $0xb0] sm:$0xff] }
 0xcee   :  { %9284 = vmatmul.mubr.msk.f32.vlgmr.msra.gmra.mxu1 %vm1022_vm6, %v3142_v16  ;;  %v8108_v16 = vld [vmem:[%s11390_s13 + $0x28] sm:$0xff] }
 0xcef   :  { %9316 = vmatprep.mubr.msk.f32.mxu1 %vm10105_vm2, %v10104_v46  ;;  %9313 = vmatpush3.msra.mxu1 %v3226_v17 }
 0xcf0   :  { %9314 = vmatprep.subr.mxu1 %v10104_v46 }
 0xcf1   :  { %9315 = vmatpush3.msra.mxu1 %v3225_v18 }
 0xcf2   :  { %9319 = vmatprep.subr.mxu1 %v10104_v46 }
 0xdae   :  { %v3220_v19 = vpop.f32.mrf.mxu1 }
 0xdaf   :  { %v3224_v20 = vmul.f32 0.03125, %v3220_v19  ;;  %v8132_v19 = vld [vmem:[%s11391_s17 + $0xf8] sm:$0xff] }
 0xdb0   :  { %v9285_v21 = vpop.f32.mrf.mxu1 }
 0xdb1   :  { %9291 = vmatmul.mubr.msk.f32.vlgmr.msra.gmra.mxu0 %vm856_vm5, %v3224_v20  ;;  %v8122_v20 = vld [vmem:[%s11390_s13 + $0x38] sm:$0xff]  ;;  %v8115_v21 = vld [vmem:[%s11391_s17 + $0xa0] sm:$0xff] }
 0xdb2   :  { %9294 = vmatpush3.msra.mxu0 %v3150_v59  ;;  %9309 = vmatprep.mubr.msk.f32.mxu0 %vm10105_vm2, %v10104_v46  ;;  %v3638_v59 = vld [vmem:[%s11391_s17 + $0x30] sm:$0xff] }
 0xdb3   :  { %9295 = vmatprep.subr.mxu0 %v10104_v46 }
 0xdb4   :  { %9296 = vmatpush3.msra.mxu0 %v3149_v60  ;;  %v8100_v60 = vld [vmem:[%s11391_s17 + $0x68] sm:$0xff] }
 0xdb5   :  { %9297 = vmatprep.subr.mxu0 %v10104_v46 }
 0xdb6   :  { %9298 = vmatpush3.msra.mxu0 %v3148_v61  ;;  %v3637_v61 = vld [vmem:[%s11391_s17 + $0x28] sm:$0xff] }
 0xdb7   :  { %9299 = vmatprep.subr.mxu0 %v10104_v46 }
 0xdb8   :  { %9300 = vmatpush3.msra.mxu0 %v3147_v62  ;;  %v8099_v62 = vld [vmem:[%s11391_s17 + $0x60] sm:$0xff] }
 0xdb9   :  { %9301 = vmatprep.subr.mxu0 %v10104_v46 }
 0xdba   :  { %9302 = vmatpush3.msra.mxu0 %v3146_v63  ;;  %v3636_v63 = vld [vmem:[%s11391_s17 + $0x20] sm:$0xff] }
 0xdbb   :  { %9303 = vmatprep.subr.mxu0 %v10104_v46 }
 0xdbc   :  { %9304 = vmatpush3.msra.mxu0 %v3145_v0  ;;  %v8098_v0 = vld [vmem:[%s11391_s17 + $0x58] sm:$0xff] }
 0xdbd   :  { %9305 = vmatprep.subr.mxu0 %v10104_v46 }
 0xdbe   :  { %9306 = vmatpush3.msra.mxu0 %v3144_v1  ;;  %v3635_v1 = vld [vmem:[%s11391_s17 + $0x18] sm:$0xff] }
 0xdbf   :  { %9307 = vmatprep.subr.mxu0 %v10104_v46 }
 0xdc0   :  { %9308 = vmatpush3.msra.mxu0 %v3143_v2  ;;  %v8097_v2 = vld [vmem:[%s11391_s17 + $0x50] sm:$0xff] }
 0xe71   :  { %v3296_v22 = vpop.f32.mrf.mxu0 }
 0xe72   :  { %v3303_v23 = vrot.slane %v3296_v22, %v10550_v13  ;;  %v8131_v22 = vld [vmem:[%s11391_s17 + $0xf0] sm:$0xff] }
 0xe73   :  { %v9292_v24 = vpop.f32.mrf.mxu0 }
 0xe74   :  { %v3304_v25 = vsub.f32 %v3135_v7, %v3303_v23  ;;  %v3632_v7 = vld [vmem:[%s11391_s17] sm:$0xff]  ;;  %v8114_v23 = vld [vmem:[%s11391_s17 + $0x98] sm:$0xff]  ;;  %v8130_v24 = vld [vmem:[%s11391_s17 + $0xe8] sm:$0xff] }
 0xe76   :  { %v3305_v26 = vmul.f32 %v3304_v25, %v3304_v25 }
 0xe78   :  { %v3306_v27 = vsel %vm1022_vm6, %v3305_v26, 0.0  ;;  %v8129_v26 = vld [vmem:[%s11391_s17 + $0xe0] sm:$0xff] }
 0xe79   :  { %v3307_v28 = vrot.slane %v3306_v27, 4 }
 0xe7b   :  { %v3308_v29 = vadd.f32 %v3307_v28, %v3306_v27  ;;  %v8112_v27 = vld [vmem:[%s11391_s17 + $0x88] sm:$0xff]  ;;  %v8128_v28 = vld [vmem:[%s11391_s17 + $0xd8] sm:$0xff] }
 0xe7d   :  { %v3309_v30 = vrot.slane %v3308_v29, 2 }
 0xe7f   :  { %v3310_v31 = vadd.f32 %v3309_v30, %v3308_v29  ;;  %v8111_v29 = vld [vmem:[%s11391_s17 + $0x80] sm:$0xff]  ;;  %v8127_v30 = vld [vmem:[%s11391_s17 + $0xd0] sm:$0xff] }
 0xe81   :  { %v3311_v32 = vrot.slane %v3310_v31, 1 }
 0xe83   :  { %v3312_v33 = vadd.f32 %v3311_v32, %v3310_v31  ;;  %v8126_v31 = vld [vmem:[%s11391_s17 + $0xc8] sm:$0xff]  ;;  %v8125_v32 = vld [vmem:[%s11391_s17 + $0xc0] sm:$0xff] }
 0xe85   :  { %9310 = vmatmul.mubr.msk.f32.vlgmr.msra.gmra.mxu0 %vm1022_vm6, %v3312_v33 }
 0xe86   :  { %9328 = vmatprep.mubr.msk.f32.mxu0 %vm1901_vm8, %v3549_v42  ;;  %v4260_v42 = vld [vmem:[%s11392_s21 + $0x20] sm:$0xff] }
 0xf45   :  { %v3382_v34 = vpop.f32.mrf.mxu0 }
 0xf46   :  { %v3386_v35 = vmul.f32 0.03125, %v3382_v34 }
 0xf47   :  { %v9311_v36 = vpop.f32.mrf.mxu0 }
 0xf48   :  { %v3388_v37 = vadd.f32 1e-05, %v3386_v35 }
 0xf4a   :  { %10009 = vrsqrt.f32 %v3388_v37 }
 0xf57   :  { %v10010_v39 = vpop.eup %10009 }
 0xf58   :  { %v3390_v40 = vmul.f32 %v10010_v39, %v3387_v38  ;;  %v4263_v39 = vld [vmem:[%s11392_s21 + $0x38] sm:$0xff] }
 0xf5a   :  { %9317 = vmatmul.mubr.msk.f32.vlgmr.msra.gmra.mxu1 %vm856_vm5, %v3390_v40  ;;  %v4262_v40 = vld [vmem:[%s11392_s21 + $0x30] sm:$0xff] }
 0xf5b   :  { %9320 = vmatpush3.msra.mxu1 %v3226_v17  ;;  %9323 = vmatprep.mubr.msk.f32.mxu1 %vm10105_vm2, %v10104_v46  ;;  %v8121_v17 = vld [vmem:[%s11390_s13 + $0x30] sm:$0xff] }
 0xf5c   :  { %9321 = vmatprep.subr.mxu1 %v10104_v46 }
 0xf5d   :  { %9322 = vmatpush3.msra.mxu1 %v3225_v18  ;;  %v8116_v18 = vld [vmem:[%s11391_s17 + $0xa8] sm:$0xff] }
 0xf5e   :  { %9324 = vmatmul.mubr.msk.f32.vlgmr.msra.gmra.mxu1 %vm856_vm5, %v3464_v41  ;;  %v4261_v41 = vld [vmem:[%s11392_s21 + $0x28] sm:$0xff] }
 0xf5f   :  { %9333 = vmatprep.mubr.msk.f32.mxu1 %vm1901_vm8, %v8091_v43  ;;  %v4259_v43 = vld [vmem:[%s11392_s21 + $0x18] sm:$0xff] }
0x101a   :  { %v3460_v44 = vpop.f32.mrf.mxu1 }
0x101b   :  { %v3541_v45 = vrot.slane %v3460_v44, %v10550_v13  ;;  %v4258_v44 = vld [vmem:[%s11392_s21 + $0x10] sm:$0xff] }
0x101c   :  { %v9318_v47 = vpop.f32.mrf.mxu1 }
0x101d   :  { %v3542_v49 = vmul.f32 %v3541_v45, %v3304_v25  ;;  %v8113_v25 = vld [vmem:[%s11391_s17 + $0x90] sm:$0xff]  ;;  %v4257_v45 = vld [vmem:[%s11392_s21 + $0x8] sm:$0xff]  ;;  %v4256_v47 = vld [vmem:[%s11392_s21] sm:$0xff] }
0x101e   :  { %v3534_v48 = vpop.f32.mrf.mxu1 }
0x101f   :  { %v3546_v50 = vrot.slane %v3534_v48, %v10550_v13 }
0x1020   :  { %v9325_v51 = vpop.f32.mrf.mxu1 }
0x1021   :  { %v3547_v52 = vadd.f32 %v3546_v50, %v3542_v49 }
0x1023   :  { %v10768_v53 = vmax.f32 %v3547_v52, 0.0 }
0x1025   :  { %9326 = vmatprep.subr.mxu0 %v10768_v53  ;;  %9331 = vmatprep.subr.mxu1 %v10768_v53 }
0x1026   :  { %9327 = vmatpush3.msra.mxu0 %v10768_v53  ;;  %9332 = vmatpush3.msra.mxu1 %v10768_v53 }
0x1027   :  { %9329 = vmatmul.mubr.msk.f32.vlgmr.msra.gmra.mxu0 %vm1901_vm8, %v3550_v54  ;;  %9334 = vmatmul.mubr.msk.f32.vlgmr.msra.gmra.mxu1 %vm1901_vm8, %v8092_v55 }
0x1028   :  { %9336 = vmatprep.subr.mxu0 %v8102_v56  ;;  %9355 = vmatprep.subr.mxu1 %v3639_v57 }
0x1029   :  { %9337 = vmatpush3.msra.mxu0 %v8102_v56  ;;  %9356 = vmatpush3.msra.mxu1 %v3639_v57 }
0x102a   :  { %9338 = vmatprep.subr.mxu0 %v8101_v58  ;;  %9357 = vmatprep.subr.mxu1 %v3638_v59 }
0x102b   :  { %9339 = vmatpush3.msra.mxu0 %v8101_v58  ;;  %9358 = vmatpush3.msra.mxu1 %v3638_v59 }
0x102c   :  { %9340 = vmatprep.subr.mxu0 %v8100_v60  ;;  %9359 = vmatprep.subr.mxu1 %v3637_v61 }
0x102d   :  { %9341 = vmatpush3.msra.mxu0 %v8100_v60  ;;  %9360 = vmatpush3.msra.mxu1 %v3637_v61 }
0x102e   :  { %9342 = vmatprep.subr.mxu0 %v8099_v62  ;;  %9361 = vmatprep.subr.mxu1 %v3636_v63 }
0x102f   :  { %9343 = vmatpush3.msra.mxu0 %v8099_v62  ;;  %9362 = vmatpush3.msra.mxu1 %v3636_v63 }
0x1030   :  { %9344 = vmatprep.subr.mxu0 %v8098_v0  ;;  %9363 = vmatprep.subr.mxu1 %v3635_v1 }
0x1031   :  { %9345 = vmatpush3.msra.mxu0 %v8098_v0  ;;  %9364 = vmatpush3.msra.mxu1 %v3635_v1 }
0x1032   :  { %9346 = vmatprep.subr.mxu0 %v8097_v2  ;;  %9365 = vmatprep.subr.mxu1 %v3634_v3 }
0x1033   :  { %9347 = vmatpush3.msra.mxu0 %v8097_v2  ;;  %9366 = vmatpush3.msra.mxu1 %v3634_v3 }
0x1034   :  { %9348 = vmatprep.subr.mxu0 %v8096_v4  ;;  %9367 = vmatprep.subr.mxu1 %v3633_v6 }
0x1035   :  { %9349 = vmatpush3.msra.mxu0 %v8096_v4  ;;  %9368 = vmatpush3.msra.mxu1 %v3633_v6 }
0x1036   :  { %9350 = vmatprep.subr.mxu0 %v8095_v5  ;;  %9369 = vmatprep.subr.mxu1 %v3632_v7 }
0x1037   :  { %9351 = vmatpush3.msra.mxu0 %v8095_v5  ;;  %9370 = vmatpush3.msra.mxu1 %v3632_v7  ;;  %v4338_v5 = vld [vmem:[%s11393_s25] sm:$0xff] }
0x1038   :  { %9374 = vmatprep.subr.mxu0 %v10768_v53  ;;  %9379 = vmatprep.subr.mxu1 %v8118_v8 }
0x10e7   :  { %v9330_v9 = vpop.f32.mrf.mxu0  ;;  %v9335_v10 = vpop.f32.mrf.mxu1 }
0x10e9   :  { %v3623_v11 = vpop.f32.mrf.mxu0  ;;  %v3715_v12 = vpop.f32.mrf.mxu1 }
0x10ea   :  { %9352 = vmatprep.mubr.msk.f32.mxu0 %vm1022_vm6, %v3715_v12  ;;  %9371 = vmatprep.mubr.msk.f32.mxu1 %vm1022_vm6, %v3623_v11 }
0x10eb   :  { %9353 = vmatmul.mubr.msk.f32.vlgmr.msra.gmra.mxu0 %vm1022_vm6, %v9335_v10  ;;  %9372 = vmatmul.mubr.msk.f32.vlgmr.msra.gmra.mxu1 %vm1022_vm6, %v9330_v9 }
0x10ec   :  { %9375 = vmatpush3.msra.mxu0 %v10768_v53  ;;  %9376 = vmatprep.mubr.msk.f32.mxu0 %vm1901_vm8, %v8107_v14 }
0x10ed   :  { %9398 = vmatprep.subr.mxu0 %v10768_v53  ;;  %9380 = vmatpush3.msra.mxu1 %v8118_v8 }
0x10ee   :  { %9381 = vmatprep.subr.mxu1 %v8117_v15 }
0x10ef   :  { %9377 = vmatmul.mubr.msk.f32.vlgmr.msra.gmra.mxu0 %vm1901_vm8, %v8108_v16  ;;  %9382 = vmatpush3.msra.mxu1 %v8117_v15 }
0x10f0   :  { %9399 = vmatpush3.msra.mxu0 %v10768_v53  ;;  %9400 = vmatprep.mubr.msk.f32.mxu0 %vm1901_vm8, %v8121_v17 }
0x10f1   :  { %9383 = vmatprep.subr.mxu1 %v8116_v18  ;;  %9403 = vmatprep.subr.mxu0 %v8132_v19 }
0x10f2   :  { %9384 = vmatpush3.msra.mxu1 %v8116_v18 }
0x10f3   :  { %9401 = vmatmul.mubr.msk.f32.vlgmr.msra.gmra.mxu0 %vm1901_vm8, %v8122_v20  ;;  %9385 = vmatprep.subr.mxu1 %v8115_v21 }
0x10f4   :  { %9404 = vmatpush3.msra.mxu0 %v8132_v19  ;;  %9386 = vmatpush3.msra.mxu1 %v8115_v21 }
0x10f5   :  { %9405 = vmatprep.subr.mxu0 %v8131_v22  ;;  %9387 = vmatprep.subr.mxu1 %v8114_v23 }
0x10f6   :  { %9406 = vmatpush3.msra.mxu0 %v8131_v22  ;;  %9388 = vmatpush3.msra.mxu1 %v8114_v23 }
0x10f7   :  { %9407 = vmatprep.subr.mxu0 %v8130_v24  ;;  %9389 = vmatprep.subr.mxu1 %v8113_v25 }
0x10f8   :  { %9408 = vmatpush3.msra.mxu0 %v8130_v24  ;;  %9390 = vmatpush3.msra.mxu1 %v8113_v25 }
0x10f9   :  { %9409 = vmatprep.subr.mxu0 %v8129_v26  ;;  %9391 = vmatprep.subr.mxu1 %v8112_v27 }
0x10fa   :  { %9410 = vmatpush3.msra.mxu0 %v8129_v26  ;;  %9392 = vmatpush3.msra.mxu1 %v8112_v27 }
0x10fb   :  { %9411 = vmatprep.subr.mxu0 %v8128_v28  ;;  %9393 = vmatprep.subr.mxu1 %v8111_v29 }
0x10fc   :  { %9412 = vmatpush3.msra.mxu0 %v8128_v28  ;;  %9394 = vmatpush3.msra.mxu1 %v8111_v29 }
0x10fd   :  { %9413 = vmatprep.subr.mxu0 %v8127_v30  ;;  %9422 = vmatprep.subr.mxu1 %v10104_v46 }
0x10fe   :  { %9414 = vmatpush3.msra.mxu0 %v8127_v30  ;;  %v4503_v30 = vld [vmem:[%s11394_s29] sm:$0x1] }
0x10ff   :  { %9415 = vmatprep.subr.mxu0 %v8126_v31 }
0x1100   :  { %9416 = vmatpush3.msra.mxu0 %v8126_v31 }
0x1101   :  { %9417 = vmatprep.subr.mxu0 %v8125_v32 }
0x1102   :  { %9418 = vmatpush3.msra.mxu0 %v8125_v32 }
0x1103   :  { %9441 = vmatprep.subr.mxu0 %v10104_v46 }
0x11ab   :  { %v9354_v33 = vpop.f32.mrf.mxu0  ;;  %v9373_v48 = vpop.f32.mrf.mxu1 }
0x11ac   :  { %v3892_v51 = vadd.f32 %v9373_v48, %v9354_v33  ;;  %v4580_v33 = vld [vmem:[%s11395_s3] sm:$0x1] }
0x11ad   :  { %v3805_v34 = vpop.f32.mrf.mxu0  ;;  %v3886_v49 = vpop.f32.mrf.mxu1 }
0x11ae   :  { %v3887_v53 = vadd.f32 %v3886_v49, %v3805_v34  ;;  %v4668_v34 = vld [vmem:[%s11396_s8] sm:$0xff]  ;;  %v4669_v49 = vld [vmem:[%s11396_s8 + $0x8] sm:$0xff] }
0x11af   :  { %v9378_v35 = vpop.f32.mrf.mxu0 }
0x11b1   :  { %v3970_v36 = vpop.f32.mrf.mxu0 }
0x11b2   :  { %9395 = vmatprep.mubr.msk.f32.mxu1 %vm1022_vm6, %v3970_v36 }
0x11b3   :  { %9396 = vmatmul.mubr.msk.f32.vlgmr.msra.gmra.mxu1 %vm1022_vm6, %v9378_v35  ;;  %v9402_v37 = vpop.f32.mrf.mxu0  ;;  %v8144_v35 = vld [vmem:[%s11396_s8 + $0x20] sm:$0xff] }
0x11b4   :  { %9438 = vmatprep.mubr.msk.f32.mxu1 %vm10105_vm2, %v10104_v46  ;;  %9423 = vmatpush3.msra.mxu1 %v4263_v39 }
0x11b5   :  { %v4146_v38 = vpop.f32.mrf.mxu0  ;;  %9424 = vmatprep.subr.mxu1 %v10104_v46 }
0x11b6   :  { %9419 = vmatprep.mubr.msk.f32.mxu0 %vm1022_vm6, %v4146_v38  ;;  %9425 = vmatpush3.msra.mxu1 %v4262_v40 }
0x11b7   :  { %9420 = vmatmul.mubr.msk.f32.vlgmr.msra.gmra.mxu0 %vm1022_vm6, %v9402_v37  ;;  %9426 = vmatprep.subr.mxu1 %v10104_v46 }
0x11b8   :  { %9443 = vmatprep.mubr.msk.f32.mxu0 %vm10105_vm2, %v10104_v46  ;;  %9427 = vmatpush3.msra.mxu1 %v4261_v41 }
0x11b9   :  { %9428 = vmatprep.subr.mxu1 %v10104_v46  ;;  %9442 = vmatpush3.msra.mxu0 %v4338_v5 }
0x11ba   :  { %9429 = vmatpush3.msra.mxu1 %v4260_v42  ;;  %9446 = vmatprep.subr.mxu0 %v10104_v46 }
0x11bb   :  { %9430 = vmatprep.subr.mxu1 %v10104_v46 }
0x11bc   :  { %9431 = vmatpush3.msra.mxu1 %v4259_v43 }
0x11bd   :  { %9432 = vmatprep.subr.mxu1 %v10104_v46 }
0x11be   :  { %9433 = vmatpush3.msra.mxu1 %v4258_v44 }
0x11bf   :  { %9434 = vmatprep.subr.mxu1 %v10104_v46 }
0x11c0   :  { %9435 = vmatpush3.msra.mxu1 %v4257_v45 }
0x11c1   :  { %9436 = vmatprep.subr.mxu1 %v10104_v46 }
0x11c2   :  { %9437 = vmatpush3.msra.mxu1 %v4256_v47 }
0x11c3   :  { %9465 = vmatprep.subr.mxu1 %v10104_v46 }
0x1273   :  { %v9397_v50 = vpop.f32.mrf.mxu1 }
0x1274   :  { %v4070_v54 = vadd.f32 %v9397_v50, %v3892_v51  ;;  %v8145_v50 = vld [vmem:[%s11396_s8 + $0x28] sm:$0xff]  ;;  %v8159_v51 = vld [vmem:[%s11397_s14 + $0x78] sm:$0xff] }
0x1275   :  { %v4060_v52 = vpop.f32.mrf.mxu1 }
0x1276   :  { %v4069_v56 = vadd.f32 %v4060_v52, %v3887_v53  ;;  %v4670_v52 = vld [vmem:[%s11396_s8 + $0x10] sm:$0xff] }
0x1277   :  { %v9421_v55 = vpop.f32.mrf.mxu0  ;;  %v8146_v53 = vld [vmem:[%s11396_s8 + $0x30] sm:$0xff] }
0x1278   :  { %v4246_v57 = vadd.f32 %v9421_v55, %v4070_v54  ;;  %v8158_v54 = vld [vmem:[%s11397_s14 + $0x70] sm:$0xff]  ;;  %v4776_v55 = vld [vmem:[%s11397_s14 + $0x38] sm:$0xff] }
0x1279   :  { %v4236_v58 = vpop.f32.mrf.mxu0 }
0x127a   :  { %v4245_v59 = vadd.f32 %v4236_v58, %v4069_v56  ;;  %v4248_v60 = vsel %vm1022_vm6, %v4246_v57, 0.0  ;;  %v8147_v56 = vld [vmem:[%s11396_s8 + $0x38] sm:$0xff]  ;;  %v8157_v58 = vld [vmem:[%s11397_s14 + $0x68] sm:$0xff] }
0x127c   :  { %v4247_v61 = vsel %vm1022_vm6, %v4245_v59, 0.0 }
0x127d   :  { %v4249_v62 = vadd.f32 %v4248_v60, %v4247_v61  ;;  %v4775_v60 = vld [vmem:[%s11397_s14 + $0x30] sm:$0xff]  ;;  %v8155_v61 = vld [vmem:[%s11397_s14 + $0x58] sm:$0xff] }
0x127f   :  { %v4250_v63 = vrot.slane %v4249_v62, 4 }
0x1281   :  { %v4251_v0 = vadd.f32 %v4250_v63, %v4249_v62  ;;  %v4774_v62 = vld [vmem:[%s11397_s14 + $0x28] sm:$0xff]  ;;  %v8154_v63 = vld [vmem:[%s11397_s14 + $0x50] sm:$0xff] }
0x1283   :  { %v4252_v1 = vrot.slane %v4251_v0, 2 }
0x1285   :  { %v4253_v2 = vadd.f32 %v4252_v1, %v4251_v0  ;;  %v4773_v0 = vld [vmem:[%s11397_s14 + $0x20] sm:$0xff]  ;;  %v8153_v1 = vld [vmem:[%s11397_s14 + $0x48] sm:$0xff] }
0x1287   :  { %v4254_v3 = vrot.slane %v4253_v2, 1 }
0x1289   :  { %v4255_v4 = vadd.f32 %v4254_v3, %v4253_v2  ;;  %v4772_v2 = vld [vmem:[%s11397_s14 + $0x18] sm:$0xff]  ;;  %v8152_v3 = vld [vmem:[%s11397_s14 + $0x40] sm:$0xff] }
0x128b   :  { %9439 = vmatmul.mubr.msk.f32.vlgmr.msra.gmra.mxu1 %vm1022_vm6, %v4255_v4  ;;  %v4771_v4 = vld [vmem:[%s11397_s14 + $0x10] sm:$0xff] }
0x128c   :  { %9467 = vmatprep.mubr.msk.f32.mxu1 %vm10105_vm2, %v10104_v46  ;;  %9466 = vmatpush3.msra.mxu1 %v4338_v5 }
0x128d   :  { %9470 = vmatprep.subr.mxu1 %v10104_v46 }
0x134b   :  { %v4333_v6 = vpop.f32.mrf.mxu1 }
0x134c   :  { %v4337_v7 = vmul.f32 0.0078125, %v4333_v6  ;;  %v4769_v6 = vld [vmem:[%s11397_s14] sm:$0xff] }
0x134d   :  { %v9440_v8 = vpop.f32.mrf.mxu1 }
0x134e   :  { %9444 = vmatmul.mubr.msk.f32.vlgmr.msra.gmra.mxu0 %vm1901_vm8, %v4337_v7  ;;  %v8183_v7 = vld [vmem:[%s11397_s14 + $0xb8] sm:$0xff] }
0x134f   :  { %9447 = vmatpush3.msra.mxu0 %v4263_v39  ;;  %9462 = vmatprep.mubr.msk.f32.mxu0 %vm10105_vm2, %v10104_v46 }
0x1350   :  { %9448 = vmatprep.subr.mxu0 %v10104_v46 }
0x1351   :  { %9449 = vmatpush3.msra.mxu0 %v4262_v40 }
0x1352   :  { %9450 = vmatprep.subr.mxu0 %v10104_v46 }
0x1353   :  { %9451 = vmatpush3.msra.mxu0 %v4261_v41 }
0x1354   :  { %9452 = vmatprep.subr.mxu0 %v10104_v46 }
0x1355   :  { %9453 = vmatpush3.msra.mxu0 %v4260_v42 }
0x1356   :  { %9454 = vmatprep.subr.mxu0 %v10104_v46 }
0x1357   :  { %9455 = vmatpush3.msra.mxu0 %v4259_v43 }
0x1358   :  { %9456 = vmatprep.subr.mxu0 %v10104_v46 }
0x1359   :  { %9457 = vmatpush3.msra.mxu0 %v4258_v44 }
0x135a   :  { %9458 = vmatprep.subr.mxu0 %v10104_v46 }
0x135b   :  { %9459 = vmatpush3.msra.mxu0 %v4257_v45 }
0x135c   :  { %9460 = vmatprep.subr.mxu0 %v10104_v46 }
0x135d   :  { %9461 = vmatpush3.msra.mxu0 %v4256_v47 }
0x140e   :  { %v4408_v9 = vpop.f32.mrf.mxu0 }
0x140f   :  { %v4415_v10 = vrot.slane %v4408_v9, %v10550_v13 }
0x1410   :  { %v9445_v11 = vpop.f32.mrf.mxu0 }
0x1411   :  { %v4416_v12 = vsub.f32 %v4245_v59, %v4415_v10  ;;  %v4417_v14 = vsub.f32 %v4246_v57, %v4415_v10  ;;  %v4671_v57 = vld [vmem:[%s11396_s8 + $0x18] sm:$0xff]  ;;  %v8156_v59 = vld [vmem:[%s11397_s14 + $0x60] sm:$0xff] }
0x1413   :  { %v4418_v15 = vmul.f32 %v4416_v12, %v4416_v12  ;;  %v4419_v16 = vmul.f32 %v4417_v14, %v4417_v14 }
0x1415   :  { %v4420_v17 = vsel %vm1022_vm6, %v4418_v15, 0.0  ;;  %v4421_v18 = vsel %vm1022_vm6, %v4419_v16, 0.0 }
0x1416   :  { %v4422_v19 = vadd.f32 %v4421_v18, %v4420_v17  ;;  %v8168_v18 = vld [vmem:[%s11396_s8 + $0x40] sm:$0xff] }
0x1418   :  { %v4423_v20 = vrot.slane %v4422_v19, 4 }
0x141a   :  { %v4424_v21 = vadd.f32 %v4423_v20, %v4422_v19  ;;  %v8169_v19 = vld [vmem:[%s11396_s8 + $0x48] sm:$0xff]  ;;  %v8170_v20 = vld [vmem:[%s11396_s8 + $0x50] sm:$0xff] }
0x141c   :  { %v4425_v22 = vrot.slane %v4424_v21, 2 }
0x141e   :  { %v4426_v23 = vadd.f32 %v4425_v22, %v4424_v21  ;;  %v8171_v21 = vld [vmem:[%s11396_s8 + $0x58] sm:$0xff]  ;;  %v8188_v22 = vld [vmem:[%s11396_s8 + $0x60] sm:$0xff] }
0x1420   :  { %v4427_v24 = vrot.slane %v4426_v23, 1 }
0x1422   :  { %v4428_v25 = vadd.f32 %v4427_v24, %v4426_v23  ;;  %v8189_v23 = vld [vmem:[%s11396_s8 + $0x68] sm:$0xff]  ;;  %v8190_v24 = vld [vmem:[%s11396_s8 + $0x70] sm:$0xff] }
0x1424   :  { %9463 = vmatmul.mubr.msk.f32.vlgmr.msra.gmra.mxu0 %vm1022_vm6, %v4428_v25  ;;  %v8191_v25 = vld [vmem:[%s11396_s8 + $0x78] sm:$0xff] }
0x1425   :  { %9489 = vmatprep.mubr.msk.f32.mxu0 %vm856_vm5, %v8144_v35  ;;  %v8200_v35 = vld [vmem:[%s11397_s14 + $0xe0] sm:$0xff] }
0x14e4   :  { %v4498_v26 = vpop.f32.mrf.mxu0 }
0x14e5   :  { %v4502_v27 = vmul.f32 0.0078125, %v4498_v26  ;;  %v8181_v26 = vld [vmem:[%s11397_s14 + $0xa8] sm:$0xff] }
0x14e6   :  { %v9464_v28 = vpop.f32.mrf.mxu0 }
0x14e7   :  { %v4504_v29 = vadd.f32 1e-05, %v4502_v27  ;;  %v8180_v27 = vld [vmem:[%s11397_s14 + $0xa0] sm:$0xff]  ;;  %v8179_v28 = vld [vmem:[%s11397_s14 + $0x98] sm:$0xff] }
0x14e9   :  { %10011 = vrsqrt.f32 %v4504_v29  ;;  %v8203_v29 = vld [vmem:[%s11397_s14 + $0xf8] sm:$0xff] }
0x14f6   :  { %v10012_v31 = vpop.eup %10011 }
0x14f7   :  { %v4506_v32 = vmul.f32 %v10012_v31, %v4503_v30  ;;  %v8178_v30 = vld [vmem:[%s11397_s14 + $0x90] sm:$0xff] }
0x14f8   :  { %v8202_v31 = vld [vmem:[%s11397_s14 + $0xf0] sm:$0xff] }
0x14f9   :  { %9468 = vmatmul.mubr.msk.f32.vlgmr.msra.gmra.mxu1 %vm1901_vm8, %v4506_v32  ;;  %v8177_v32 = vld [vmem:[%s11397_s14 + $0x88] sm:$0xff] }
0x14fa   :  { %9471 = vmatpush3.msra.mxu1 %v4338_v5  ;;  %9472 = vmatprep.mubr.msk.f32.mxu1 %vm10105_vm2, %v10104_v46  ;;  %v4770_v5 = vld [vmem:[%s11397_s14 + $0x8] sm:$0xff] }
0x14fd   :  { %9473 = vmatmul.mubr.msk.f32.vlgmr.msra.gmra.mxu1 %vm1901_vm8, %v4580_v33  ;;  %v8201_v33 = vld [vmem:[%s11397_s14 + $0xe8] sm:$0xff] }
0x14fe   :  { %9479 = vmatprep.mubr.msk.f32.mxu1 %vm856_vm5, %v4668_v34  ;;  %v8176_v34 = vld [vmem:[%s11397_s14 + $0x80] sm:$0xff] }
0x15b9   :  { %v4576_v36 = vpop.f32.mrf.mxu1 }
0x15ba   :  { %v4657_v37 = vrot.slane %v4576_v36, %v10550_v13  ;;  %v8199_v36 = vld [vmem:[%s11397_s14 + $0xd8] sm:$0xff] }
0x15bb   :  { %v9469_v38 = vpop.f32.mrf.mxu1 }
0x15bc   :  { %v4658_v40 = vmul.f32 %v4657_v37, %v4416_v12  ;;  %v4659_v41 = vmul.f32 %v4657_v37, %v4417_v14  ;;  %v8182_v12 = vld [vmem:[%s11397_s14 + $0xb0] sm:$0xff]  ;;  %v8197_v38 = vld [vmem:[%s11397_s14 + $0xc8] sm:$0xff] }
0x15bd   :  { %v4650_v39 = vpop.f32.mrf.mxu1  ;;  %v8198_v37 = vld [vmem:[%s11397_s14 + $0xd0] sm:$0xff] }
0x15be   :  { %v4663_v42 = vrot.slane %v4650_v39, %v10550_v13  ;;  %v8196_v39 = vld [vmem:[%s11397_s14 + $0xc0] sm:$0xff] }
0x15bf   :  { %v9474_v43 = vpop.f32.mrf.mxu1 }
0x15c0   :  { %v4664_v44 = vadd.f32 %v4663_v42, %v4658_v40  ;;  %v4665_v45 = vadd.f32 %v4663_v42, %v4659_v41 }
0x15c2   :  { %v10886_v47 = vmax.f32 %v4665_v45, 0.0  ;;  %v10888_v48 = vmax.f32 %v4664_v44, 0.0 }
0x15c4   :  { %9475 = vmatprep.subr.mxu1 %v10886_v47  ;;  %9485 = vmatprep.subr.mxu0 %v10886_v47 }
0x15c5   :  { %9476 = vmatpush3.msra.mxu1 %v10886_v47  ;;  %9486 = vmatpush3.msra.mxu0 %v10886_v47 }
0x15c6   :  { %9477 = vmatprep.subr.mxu1 %v10888_v48  ;;  %9487 = vmatprep.subr.mxu0 %v10888_v48 }
0x15c7   :  { %9478 = vmatpush3.msra.mxu1 %v10888_v48  ;;  %9488 = vmatpush3.msra.mxu0 %v10888_v48 }
0x15c8   :  { %9480 = vmatmul.mubr.msk.f32.vlgmr.msra.gmra.mxu1 %vm856_vm5, %v4669_v49  ;;  %9490 = vmatmul.mubr.msk.f32.vlgmr.msra.gmra.mxu0 %vm856_vm5, %v8145_v50 }
0x15c9   :  { %9495 = vmatprep.subr.mxu1 %v8159_v51  ;;  %9482 = vmatprep.mubr.msk.f32.mxu1 %vm856_vm5, %v4670_v52 }
0x15ca   :  { %9496 = vmatpush3.msra.mxu1 %v8159_v51  ;;  %9492 = vmatprep.mubr.msk.f32.mxu0 %vm856_vm5, %v8146_v53  ;;  %v8219_v53 = vld [vmem:[%s11398_s19 + $0x58] sm:$0xff] }
0x15cb   :  { %9497 = vmatprep.subr.mxu1 %v8158_v54  ;;  %9517 = vmatprep.subr.mxu0 %v4776_v55 }
0x15cc   :  { %9498 = vmatpush3.msra.mxu1 %v8158_v54  ;;  %9493 = vmatmul.mubr.msk.f32.gmra.mxu0 %vm856_vm5, %v8147_v56  ;;  %v8218_v54 = vld [vmem:[%s11398_s19 + $0x50] sm:$0xff]  ;;  %v8216_v56 = vld [vmem:[%s11398_s19 + $0x40] sm:$0xff] }
0x15cd   :  { %9483 = vmatmul.mubr.msk.f32.gmra.mxu1 %vm856_vm5, %v4671_v57  ;;  %9499 = vmatprep.subr.mxu1 %v8157_v58  ;;  %v8215_v57 = vld [vmem:[%s11398_s19 + $0x38] sm:$0xff] }
0x15ce   :  { %9500 = vmatpush3.msra.mxu1 %v8157_v58  ;;  %9518 = vmatpush3.msra.mxu0 %v4776_v55  ;;  %v8217_v55 = vld [vmem:[%s11398_s19 + $0x48] sm:$0xff]  ;;  %v8214_v58 = vld [vmem:[%s11398_s19 + $0x30] sm:$0xff] }
0x15cf   :  { %9501 = vmatprep.subr.mxu1 %v8156_v59  ;;  %9519 = vmatprep.subr.mxu0 %v4775_v60 }
0x15d0   :  { %9502 = vmatpush3.msra.mxu1 %v8156_v59  ;;  %9520 = vmatpush3.msra.mxu0 %v4775_v60  ;;  %v5514_v59 = vld [vmem:[%s11399_s24] sm:$0xff] }
0x15d1   :  { %9503 = vmatprep.subr.mxu1 %v8155_v61  ;;  %9521 = vmatprep.subr.mxu0 %v4774_v62 }
0x15d2   :  { %9504 = vmatpush3.msra.mxu1 %v8155_v61  ;;  %9522 = vmatpush3.msra.mxu0 %v4774_v62 }
0x15d3   :  { %9505 = vmatprep.subr.mxu1 %v8154_v63  ;;  %9523 = vmatprep.subr.mxu0 %v4773_v0 }
0x15d4   :  { %9506 = vmatpush3.msra.mxu1 %v8154_v63  ;;  %9524 = vmatpush3.msra.mxu0 %v4773_v0 }
0x15d5   :  { %9507 = vmatprep.subr.mxu1 %v8153_v1  ;;  %9525 = vmatprep.subr.mxu0 %v4772_v2 }
0x15d6   :  { %9508 = vmatpush3.msra.mxu1 %v8153_v1  ;;  %9526 = vmatpush3.msra.mxu0 %v4772_v2 }
0x15d7   :  { %9509 = vmatprep.subr.mxu1 %v8152_v3  ;;  %9527 = vmatprep.subr.mxu0 %v4771_v4 }
0x15d8   :  { %9510 = vmatpush3.msra.mxu1 %v8152_v3  ;;  %9528 = vmatpush3.msra.mxu0 %v4771_v4 }
0x15d9   :  { %9539 = vmatprep.subr.mxu1 %v10886_v47  ;;  %9529 = vmatprep.subr.mxu0 %v4770_v5 }
0x15da   :  { %9530 = vmatpush3.msra.mxu0 %v4770_v5 }
0x15db   :  { %9531 = vmatprep.subr.mxu0 %v4769_v6 }
0x15dc   :  { %9532 = vmatpush3.msra.mxu0 %v4769_v6 }
0x15dd   :  { %9549 = vmatprep.subr.mxu0 %v8183_v7 }
0x1688   :  { %v9481_v8 = vpop.f32.mrf.mxu1  ;;  %v9491_v9 = vpop.f32.mrf.mxu0 }
0x168a   :  { %v4750_v10 = vpop.f32.mrf.mxu1  ;;  %v4860_v11 = vpop.f32.mrf.mxu0 }
0x168b   :  { %9511 = vmatprep.mubr.msk.f32.mxu1 %vm1022_vm6, %v4860_v11  ;;  %9533 = vmatprep.mubr.msk.f32.mxu0 %vm1022_vm6, %v4750_v10 }
0x168c   :  { %v9494_v14 = vpop.f32.mrf.mxu0  ;;  %9512 = vmatmul.mubr.msk.f32.vlgmr.msra.gmra.mxu1 %vm1022_vm6, %v9491_v9  ;;  %9534 = vmatmul.mubr.msk.f32.vlgmr.msra.gmra.mxu0 %vm1022_vm6, %v9481_v8 }
0x168d   :  { %v9484_v15 = vpop.f32.mrf.mxu1  ;;  %9540 = vmatpush3.msra.mxu1 %v10886_v47  ;;  %9550 = vmatpush3.msra.mxu0 %v8183_v7 }
0x168e   :  { %9541 = vmatprep.subr.mxu1 %v10888_v48  ;;  %v4870_v16 = vpop.f32.mrf.mxu0  ;;  %9551 = vmatprep.subr.mxu0 %v8182_v12 }
0x168f   :  { %v4760_v17 = vpop.f32.mrf.mxu1  ;;  %9542 = vmatpush3.msra.mxu1 %v10888_v48  ;;  %9514 = vmatprep.mubr.msk.f32.mxu1 %vm1022_vm6, %v4870_v16 }
0x1690   :  { %9536 = vmatprep.mubr.msk.f32.mxu0 %vm1022_vm6, %v4760_v17  ;;  %9571 = vmatprep.subr.mxu1 %v10886_v47 }
0x1691   :  { %9515 = vmatmul.mubr.msk.f32.gmra.mxu1 %vm1022_vm6, %v9494_v14  ;;  %9537 = vmatmul.mubr.msk.f32.gmra.mxu0 %vm1022_vm6, %v9484_v15 }
0x1692   :  { %9543 = vmatprep.mubr.msk.f32.mxu1 %vm856_vm5, %v8168_v18  ;;  %9552 = vmatpush3.msra.mxu0 %v8182_v12 }
0x1693   :  { %9553 = vmatprep.subr.mxu0 %v8181_v26 }
0x1694   :  { %9554 = vmatpush3.msra.mxu0 %v8181_v26  ;;  %v8210_v26 = vld [vmem:[%s11399_s24 + $0x10] sm:$0xff] }
0x1695   :  { %9544 = vmatmul.mubr.msk.f32.vlgmr.msra.gmra.mxu1 %vm856_vm5, %v8169_v19  ;;  %9555 = vmatprep.subr.mxu0 %v8180_v27 }
0x1696   :  { %9572 = vmatpush3.msra.mxu1 %v10886_v47  ;;  %9546 = vmatprep.mubr.msk.f32.mxu1 %vm856_vm5, %v8170_v20 }
0x1697   :  { %9573 = vmatprep.subr.mxu1 %v10888_v48  ;;  %9556 = vmatpush3.msra.mxu0 %v8180_v27  ;;  %v8211_v27 = vld [vmem:[%s11399_s24 + $0x18] sm:$0xff] }
0x1698   :  { %9574 = vmatpush3.msra.mxu1 %v10888_v48  ;;  %9557 = vmatprep.subr.mxu0 %v8179_v28 }
0x1699   :  { %9547 = vmatmul.mubr.msk.f32.gmra.mxu1 %vm856_vm5, %v8171_v21  ;;  %9581 = vmatprep.subr.mxu1 %v8203_v29 }
0x169a   :  { %9575 = vmatprep.mubr.msk.f32.mxu1 %vm856_vm5, %v8188_v22  ;;  %9558 = vmatpush3.msra.mxu0 %v8179_v28  ;;  %v5602_v28 = vld [vmem:[%s11398_s19 + $0x28] sm:$0xff] }
0x169b   :  { %9559 = vmatprep.subr.mxu0 %v8178_v30 }
0x169c   :  { %9560 = vmatpush3.msra.mxu0 %v8178_v30  ;;  %v5600_v30 = vld [vmem:[%s11398_s19 + $0x18] sm:$0xff] }
0x169d   :  { %9576 = vmatmul.mubr.msk.f32.vlgmr.msra.gmra.mxu1 %vm856_vm5, %v8189_v23  ;;  %9561 = vmatprep.subr.mxu0 %v8177_v32 }
0x169e   :  { %9578 = vmatprep.mubr.msk.f32.mxu1 %vm856_vm5, %v8190_v24  ;;  %9582 = vmatpush3.msra.mxu1 %v8203_v29  ;;  %v5601_v29 = vld [vmem:[%s11398_s19 + $0x20] sm:$0xff] }
0x169f   :  { %9583 = vmatprep.subr.mxu1 %v8202_v31  ;;  %9562 = vmatpush3.msra.mxu0 %v8177_v32  ;;  %v5598_v32 = vld [vmem:[%s11398_s19 + $0x8] sm:$0xff] }
0x16a0   :  { %9584 = vmatpush3.msra.mxu1 %v8202_v31  ;;  %9563 = vmatprep.subr.mxu0 %v8176_v34  ;;  %v5599_v31 = vld [vmem:[%s11398_s19 + $0x10] sm:$0xff] }
0x16a1   :  { %9579 = vmatmul.mubr.msk.f32.gmra.mxu1 %vm856_vm5, %v8191_v25  ;;  %9585 = vmatprep.subr.mxu1 %v8201_v33  ;;  %v5515_v25 = vld [vmem:[%s11399_s24 + $0x8] sm:$0xff] }
0x16a2   :  { %9586 = vmatpush3.msra.mxu1 %v8201_v33  ;;  %9564 = vmatpush3.msra.mxu0 %v8176_v34  ;;  %v5597_v33 = vld [vmem:[%s11398_s19] sm:$0xff] }
0x16a3   :  { %9587 = vmatprep.subr.mxu1 %v8200_v35 }
0x16a4   :  { %9588 = vmatpush3.msra.mxu1 %v8200_v35 }
0x16a5   :  { %9589 = vmatprep.subr.mxu1 %v8199_v36 }
0x16a6   :  { %9590 = vmatpush3.msra.mxu1 %v8199_v36 }
0x16a7   :  { %9591 = vmatprep.subr.mxu1 %v8198_v37 }
0x16a8   :  { %9592 = vmatpush3.msra.mxu1 %v8198_v37 }
0x16a9   :  { %9593 = vmatprep.subr.mxu1 %v8197_v38 }
0x16aa   :  { %9594 = vmatpush3.msra.mxu1 %v8197_v38  ;;  %v8224_v38 = vld [vmem:[%s11399_s24 + $0x20] sm:$0xff] }
0x16ab   :  { %9595 = vmatprep.subr.mxu1 %v8196_v39 }
0x16ac   :  { %9596 = vmatpush3.msra.mxu1 %v8196_v39  ;;  %v8225_v39 = vld [vmem:[%s11399_s24 + $0x28] sm:$0xff] }
0x16ad   :  { %9625 = vmatprep.subr.mxu1 %v8219_v53 }
0x174c   :  { %v9513_v40 = vpop.f32.mrf.mxu1  ;;  %v9535_v60 = vpop.f32.mrf.mxu0 }
0x174d   :  { %v5069_v2 = vadd.f32 %v9535_v60, %v9513_v40  ;;  %v8236_v40 = vld [vmem:[%s11399_s24 + $0x30] sm:$0xff] }
0x174e   :  { %v4966_v41 = vpop.f32.mrf.mxu1  ;;  %v5063_v61 = vpop.f32.mrf.mxu0  ;;  %v8240_v60 = vld [vmem:[%s11398_s19 + $0x90] sm:$0xff] }
0x174f   :  { %v5064_v4 = vadd.f32 %v5063_v61, %v4966_v41  ;;  %v8237_v41 = vld [vmem:[%s11399_s24 + $0x38] sm:$0xff] }
0x1750   :  { %v6291_v61 = vld [vmem:[%s11400_s30 + $0x38] sm:$0xff] }
0x1751   :  { %v9516_v42 = vpop.f32.mrf.mxu1  ;;  %v9538_v62 = vpop.f32.mrf.mxu0 }
0x1752   :  { %v5079_v7 = vadd.f32 %v9538_v62, %v9516_v42  ;;  %v8233_v42 = vld [vmem:[%s11398_s19 + $0x88] sm:$0xff]  ;;  %v6290_v62 = vld [vmem:[%s11400_s30 + $0x30] sm:$0xff] }
0x1753   :  { %v4976_v43 = vpop.f32.mrf.mxu1  ;;  %v5073_v63 = vpop.f32.mrf.mxu0 }
0x1754   :  { %v5074_v12 = vadd.f32 %v5073_v63, %v4976_v43  ;;  %v8232_v43 = vld [vmem:[%s11398_s19 + $0x80] sm:$0xff]  ;;  %v6289_v63 = vld [vmem:[%s11400_s30 + $0x28] sm:$0xff] }
0x1755   :  { %v9545_v44 = vpop.f32.mrf.mxu1 }
0x1757   :  { %v5165_v45 = vpop.f32.mrf.mxu1 }
0x1758   :  { %9565 = vmatprep.mubr.msk.f32.mxu0 %vm1022_vm6, %v5165_v45  ;;  %v8230_v45 = vld [vmem:[%s11398_s19 + $0x70] sm:$0xff] }
0x1759   :  { %v9548_v47 = vpop.f32.mrf.mxu1  ;;  %9566 = vmatmul.mubr.msk.f32.vlgmr.msra.gmra.mxu0 %vm1022_vm6, %v9545_v44  ;;  %v8231_v44 = vld [vmem:[%s11398_s19 + $0x78] sm:$0xff] }
0x175b   :  { %v5175_v48 = vpop.f32.mrf.mxu1 }
0x175c   :  { %9568 = vmatprep.mubr.msk.f32.mxu0 %vm1022_vm6, %v5175_v48  ;;  %v8228_v48 = vld [vmem:[%s11398_s19 + $0x60] sm:$0xff] }
0x175d   :  { %9569 = vmatmul.mubr.msk.f32.gmra.mxu0 %vm1022_vm6, %v9548_v47  ;;  %v9577_v49 = vpop.f32.mrf.mxu1  ;;  %v8229_v47 = vld [vmem:[%s11398_s19 + $0x68] sm:$0xff] }
0x175e   :  { %9611 = vmatprep.mubr.msk.f32.mxu0 %vm159_vm0, %v5514_v59 }
0x175f   :  { %v5377_v50 = vpop.f32.mrf.mxu1 }
0x1760   :  { %9597 = vmatprep.mubr.msk.f32.mxu1 %vm1022_vm6, %v5377_v50 }
0x1761   :  { %v9580_v51 = vpop.f32.mrf.mxu1  ;;  %9598 = vmatmul.mubr.msk.f32.vlgmr.msra.gmra.mxu1 %vm1022_vm6, %v9577_v49  ;;  %v8245_v49 = vld [vmem:[%s11398_s19 + $0xb8] sm:$0xff] }
0x1762   :  { %9626 = vmatpush3.msra.mxu1 %v8219_v53 }
0x1763   :  { %v5387_v52 = vpop.f32.mrf.mxu1  ;;  %9627 = vmatprep.subr.mxu1 %v8218_v54 }
0x1764   :  { %9600 = vmatprep.mubr.msk.f32.mxu1 %vm1022_vm6, %v5387_v52  ;;  %9628 = vmatpush3.msra.mxu1 %v8218_v54  ;;  %v8244_v54 = vld [vmem:[%s11398_s19 + $0xb0] sm:$0xff] }
0x1765   :  { %9601 = vmatmul.mubr.msk.f32.gmra.mxu1 %vm1022_vm6, %v9580_v51  ;;  %9629 = vmatprep.subr.mxu1 %v8217_v55 }
0x1766   :  { %9630 = vmatpush3.msra.mxu1 %v8217_v55  ;;  %v8243_v55 = vld [vmem:[%s11398_s19 + $0xa8] sm:$0xff] }
0x1767   :  { %9631 = vmatprep.subr.mxu1 %v8216_v56 }
0x1768   :  { %9632 = vmatpush3.msra.mxu1 %v8216_v56  ;;  %v8242_v56 = vld [vmem:[%s11398_s19 + $0xa0] sm:$0xff] }
0x1769   :  { %9633 = vmatprep.subr.mxu1 %v8215_v57 }
0x176a   :  { %9634 = vmatpush3.msra.mxu1 %v8215_v57 }
0x176b   :  { %9635 = vmatprep.subr.mxu1 %v8214_v58 }
0x176c   :  { %9636 = vmatpush3.msra.mxu1 %v8214_v58  ;;  %v8241_v58 = vld [vmem:[%s11398_s19 + $0x98] sm:$0xff] }
0x1819   :  { %v9567_v0 = vpop.f32.mrf.mxu0 }
0x181a   :  { %v5291_v5 = vadd.f32 %v9567_v0, %v5069_v2  ;;  %v6288_v0 = vld [vmem:[%s11400_s30 + $0x20] sm:$0xff]  ;;  %v6286_v2 = vld [vmem:[%s11400_s30 + $0x10] sm:$0xff] }
0x181b   :  { %v5271_v1 = vpop.f32.mrf.mxu0 }
0x181c   :  { %v5290_v8 = vadd.f32 %v5271_v1, %v5064_v4  ;;  %v6287_v1 = vld [vmem:[%s11400_s30 + $0x18] sm:$0xff] }
0x181d   :  { %v9570_v3 = vpop.f32.mrf.mxu0 }
0x181e   :  { %v5293_v14 = vadd.f32 %v9570_v3, %v5079_v7  ;;  %v6285_v3 = vld [vmem:[%s11400_s30 + $0x8] sm:$0xff] }
0x181f   :  { %v5281_v10 = vpop.f32.mrf.mxu0 }
0x1820   :  { %v5292_v17 = vadd.f32 %v5281_v10, %v5074_v12 }
0x1821   :  { %v9599_v6 = vpop.f32.mrf.mxu1 }
0x1822   :  { %v5503_v9 = vadd.f32 %v9599_v6, %v5291_v5 }
0x1823   :  { %v5483_v11 = vpop.f32.mrf.mxu1 }
0x1824   :  { %10013 = vtanh.f32 %v5503_v9  ;;  %v5502_v15 = vadd.f32 %v5483_v11, %v5290_v8 }
0x1825   :  { %v9602_v16 = vpop.f32.mrf.mxu1 }
0x1826   :  { %10015 = vtanh.f32 %v5502_v15  ;;  %v5505_v18 = vadd.f32 %v9602_v16, %v5293_v14 }
0x1827   :  { %v5493_v19 = vpop.f32.mrf.mxu1 }
0x1828   :  { %10017 = vtanh.f32 %v5505_v18  ;;  %v5504_v20 = vadd.f32 %v5493_v19, %v5292_v17 }
0x182a   :  { %10019 = vtanh.f32 %v5504_v20 }
0x1831   :  { %v10990_v21 = vpop.eup %10013 }
0x1832   :  { %5511 = vst.msk [vmem:[%s10291_s6 + $0x8] sm:$0xff] %vm338_vm1, %v10990_v21 }
0x1833   :  { %v10995_v22 = vpop.eup %10015 }
0x1834   :  { %5510 = vst.msk [vmem:[%s10291_s6] sm:$0xff] %vm338_vm1, %v10995_v22 }
0x1835   :  { %v11000_v23 = vpop.eup %10017 }
0x1836   :  { %5513 = vst.msk [vmem:[%s10291_s6 + $0x18] sm:$0xff] %vm338_vm1, %v11000_v23  ;;  %9603 = vmatprep.subr.mxu0 %v11000_v23  ;;  %9655 = vmatprep.subr.mxu1 %v11000_v23 }
0x1837   :  { %v11007_v24 = vpop.eup %10019  ;;  %9604 = vmatpush3.msra.mxu0 %v11000_v23 }
0x1838   :  { %5512 = vst.msk [vmem:[%s10291_s6 + $0x10] sm:$0xff] %vm338_vm1, %v11007_v24  ;;  %9605 = vmatprep.subr.mxu0 %v11007_v24  ;;  %s11401_s6 = sld [smem:[#allocation21_spill]] }
0x1839   :  { %9606 = vmatpush3.msra.mxu0 %v11007_v24 }
0x183a   :  { %9607 = vmatprep.subr.mxu0 %v10990_v21 }
0x183b   :  { %9608 = vmatpush3.msra.mxu0 %v10990_v21 }
0x183c   :  { %9609 = vmatprep.subr.mxu0 %v10995_v22 }
0x183d   :  { %9610 = vmatpush3.msra.mxu0 %v10995_v22 }
0x183e   :  { %9612 = vmatmul.mubr.msk.f32.vlgmr.msra.gmra.mxu0 %vm159_vm0, %v5515_v25  ;;  %9614 = vmatprep.subr.mxu0 %v11000_v23  ;;  %v6210_v20 = vld [vmem:[%s11401_s6] sm:$0xff]  ;;  %v8256_v25 = vld [vmem:[%s11400_s30 + $0x68] sm:$0xff] }
0x183f   :  { %9615 = vmatpush3.msra.mxu0 %v11000_v23  ;;  %9622 = vmatprep.mubr.msk.f32.mxu0 %vm159_vm0, %v8210_v26  ;;  %v8255_v26 = vld [vmem:[%s11400_s30 + $0x60] sm:$0xff] }
0x1840   :  { %9616 = vmatprep.subr.mxu0 %v11007_v24 }
0x1841   :  { %9617 = vmatpush3.msra.mxu0 %v11007_v24 }
0x1842   :  { %9618 = vmatprep.subr.mxu0 %v10990_v21 }
0x1843   :  { %9619 = vmatpush3.msra.mxu0 %v10990_v21 }
0x1844   :  { %9620 = vmatprep.subr.mxu0 %v10995_v22 }
0x1845   :  { %9621 = vmatpush3.msra.mxu0 %v10995_v22 }
0x1846   :  { %9623 = vmatmul.mubr.msk.f32.vlgmr.msra.gmra.mxu0 %vm159_vm0, %v8211_v27  ;;  %9640 = vmatprep.subr.mxu0 %v5602_v28  ;;  %v8254_v27 = vld [vmem:[%s11400_s30 + $0x58] sm:$0xff] }
0x1847   :  { %9641 = vmatpush3.msra.mxu0 %v5602_v28  ;;  %v8253_v28 = vld [vmem:[%s11400_s30 + $0x50] sm:$0xff] }
0x1848   :  { %9642 = vmatprep.subr.mxu0 %v5601_v29 }
0x1849   :  { %9643 = vmatpush3.msra.mxu0 %v5601_v29  ;;  %v6284_v29 = vld [vmem:[%s11400_s30] sm:$0xff] }
0x184a   :  { %9644 = vmatprep.subr.mxu0 %v5600_v30 }
0x184b   :  { %9645 = vmatpush3.msra.mxu0 %v5600_v30  ;;  %v8252_v30 = vld [vmem:[%s11400_s30 + $0x48] sm:$0xff] }
0x184c   :  { %9646 = vmatprep.subr.mxu0 %v5599_v31 }
0x184d   :  { %9647 = vmatpush3.msra.mxu0 %v5599_v31  ;;  %v8251_v31 = vld [vmem:[%s11400_s30 + $0x40] sm:$0xff] }
0x184e   :  { %9648 = vmatprep.subr.mxu0 %v5598_v32 }
0x184f   :  { %9649 = vmatpush3.msra.mxu0 %v5598_v32  ;;  %v8270_v32 = vld [vmem:[%s11400_s30 + $0xb8] sm:$0xff] }
0x1850   :  { %9650 = vmatprep.subr.mxu0 %v5597_v33 }
0x1851   :  { %9651 = vmatpush3.msra.mxu0 %v5597_v33 }
0x1852   :  { %9666 = vmatprep.subr.mxu0 %v8233_v42 }
0x18fe   :  { %v9613_v34 = vpop.f32.mrf.mxu0 }
0x1900   :  { %v5588_v35 = vpop.f32.mrf.mxu0 }
0x1901   :  { %9652 = vmatprep.mubr.msk.f32.mxu0 %vm338_vm1, %v5588_v35 }
0x1902   :  { %9653 = vmatmul.mubr.msk.f32.vlgmr.msra.gmra.mxu0 %vm338_vm1, %v9613_v34  ;;  %v8269_v34 = vld [vmem:[%s11400_s30 + $0xb0] sm:$0xff] }
0x1903   :  { %9667 = vmatpush3.msra.mxu0 %v8233_v42  ;;  %v8267_v42 = vld [vmem:[%s11400_s30 + $0xa0] sm:$0xff] }
0x1904   :  { %9668 = vmatprep.subr.mxu0 %v8232_v43 }
0x1905   :  { %9669 = vmatpush3.msra.mxu0 %v8232_v43  ;;  %v8280_v43 = vld [vmem:[%s11400_s30 + $0xf0] sm:$0xff] }
0x1906   :  { %v9624_v36 = vpop.f32.mrf.mxu0  ;;  %9670 = vmatprep.subr.mxu0 %v8231_v44 }
0x1907   :  { %9671 = vmatpush3.msra.mxu0 %v8231_v44  ;;  %v8266_v44 = vld [vmem:[%s11400_s30 + $0x98] sm:$0xff] }
0x1908   :  { %v5678_v37 = vpop.f32.mrf.mxu0  ;;  %9672 = vmatprep.subr.mxu0 %v8230_v45 }
0x1909   :  { %9637 = vmatprep.mubr.msk.f32.mxu1 %vm338_vm1, %v5678_v37  ;;  %9673 = vmatpush3.msra.mxu0 %v8230_v45  ;;  %v8268_v37 = vld [vmem:[%s11400_s30 + $0xa8] sm:$0xff] }
0x190a   :  { %9638 = vmatmul.mubr.msk.f32.vlgmr.msra.gmra.mxu1 %vm338_vm1, %v9624_v36  ;;  %9674 = vmatprep.subr.mxu0 %v8229_v47  ;;  %v8279_v45 = vld [vmem:[%s11400_s30 + $0xe8] sm:$0xff] }
0x190b   :  { %9656 = vmatpush3.msra.mxu1 %v11000_v23  ;;  %9663 = vmatprep.mubr.msk.f32.mxu1 %vm159_vm0, %v8224_v38 }
0x190c   :  { %9657 = vmatprep.subr.mxu1 %v11007_v24  ;;  %9675 = vmatpush3.msra.mxu0 %v8229_v47  ;;  %v8265_v47 = vld [vmem:[%s11400_s30 + $0x90] sm:$0xff] }
0x190d   :  { %9658 = vmatpush3.msra.mxu1 %v11007_v24  ;;  %9676 = vmatprep.subr.mxu0 %v8228_v48 }
0x190e   :  { %9659 = vmatprep.subr.mxu1 %v10990_v21  ;;  %9677 = vmatpush3.msra.mxu0 %v8228_v48  ;;  %v8278_v48 = vld [vmem:[%s11400_s30 + $0xe0] sm:$0xff] }
0x190f   :  { %9660 = vmatpush3.msra.mxu1 %v10990_v21  ;;  %9692 = vmatprep.subr.mxu0 %v8245_v49 }
0x1910   :  { %9661 = vmatprep.subr.mxu1 %v10995_v22 }
0x1911   :  { %9662 = vmatpush3.msra.mxu1 %v10995_v22 }
0x1912   :  { %9664 = vmatmul.mubr.msk.f32.vlgmr.msra.gmra.mxu1 %vm159_vm0, %v8225_v39  ;;  %9681 = vmatprep.subr.mxu1 %v11000_v23  ;;  %v8261_v39 = vld [vmem:[%s11401_s6 + $0x10] sm:$0xff] }
0x1913   :  { %9682 = vmatpush3.msra.mxu1 %v11000_v23  ;;  %9689 = vmatprep.mubr.msk.f32.mxu1 %vm159_vm0, %v8236_v40  ;;  %v8258_v23 = vld [vmem:[%s11400_s30 + $0x78] sm:$0xff] }
0x1914   :  { %9683 = vmatprep.subr.mxu1 %v11007_v24  ;;  %v8272_v40 = vld [vmem:[%s11401_s6 + $0x18] sm:$0xff] }
0x1915   :  { %9684 = vmatpush3.msra.mxu1 %v11007_v24  ;;  %v8257_v24 = vld [vmem:[%s11400_s30 + $0x70] sm:$0xff] }
0x1916   :  { %9685 = vmatprep.subr.mxu1 %v10990_v21 }
0x1917   :  { %9686 = vmatpush3.msra.mxu1 %v10990_v21 }
0x1918   :  { %9687 = vmatprep.subr.mxu1 %v10995_v22 }
0x1919   :  { %9688 = vmatpush3.msra.mxu1 %v10995_v22  ;;  %v8249_v22 = vld [vmem:[%s11401_s6 + $0x8] sm:$0xff] }
0x191a   :  { %9690 = vmatmul.mubr.msk.f32.vlgmr.msra.gmra.mxu1 %vm159_vm0, %v8237_v41  ;;  %9707 = vmatprep.subr.mxu1 %v10104_v46  ;;  %v8281_v41 = vld [vmem:[%s11400_s30 + $0xf8] sm:$0xff] }
0x191b   :  { %9711 = vmatprep.mubr.msk.f32.mxu1 %vm10105_vm2, %v10104_v46 }
0x19c2   :  { %v9654_v4 = vpop.f32.mrf.mxu0 }
0x19c4   :  { %v5847_v5 = vpop.f32.mrf.mxu0 }
0x19ca   :  { %v9639_v50 = vpop.f32.mrf.mxu1 }
0x19cb   :  { %v5853_v7 = vadd.f32 %v9654_v4, %v9639_v50  ;;  %v8277_v50 = vld [vmem:[%s11400_s30 + $0xd8] sm:$0xff] }
0x19cc   :  { %v5766_v51 = vpop.f32.mrf.mxu1  ;;  %v6848_v4 = vld [vmem:[%s11402_s20 + $0x18] sm:$0xff] }
0x19cd   :  { %v5848_v9 = vadd.f32 %v5847_v5, %v5766_v51  ;;  %v8263_v51 = vld [vmem:[%s11400_s30 + $0x80] sm:$0xff]  ;;  %v6847_v5 = vld [vmem:[%s11402_s20 + $0x10] sm:$0xff] }
0x19d2   :  { %v9665_v52 = vpop.f32.mrf.mxu1 }
0x19d4   :  { %v5931_v53 = vpop.f32.mrf.mxu1 }
0x19d5   :  { %9678 = vmatprep.mubr.msk.f32.mxu0 %vm338_vm1, %v5931_v53  ;;  %v8275_v53 = vld [vmem:[%s11400_s30 + $0xc8] sm:$0xff] }
0x19d6   :  { %9679 = vmatmul.mubr.msk.f32.vlgmr.msra.gmra.mxu0 %vm338_vm1, %v9665_v52  ;;  %v8276_v52 = vld [vmem:[%s11400_s30 + $0xd0] sm:$0xff] }
0x19d7   :  { %9693 = vmatpush3.msra.mxu0 %v8245_v49  ;;  %v8264_v49 = vld [vmem:[%s11400_s30 + $0x88] sm:$0xff] }
0x19d8   :  { %9694 = vmatprep.subr.mxu0 %v8244_v54 }
0x19d9   :  { %9695 = vmatpush3.msra.mxu0 %v8244_v54  ;;  %v8274_v54 = vld [vmem:[%s11400_s30 + $0xc0] sm:$0xff] }
0x19da   :  { %9696 = vmatprep.subr.mxu0 %v8243_v55  ;;  %v9691_v57 = vpop.f32.mrf.mxu1 }
0x19db   :  { %9697 = vmatpush3.msra.mxu0 %v8243_v55 }
0x19dc   :  { %9698 = vmatprep.subr.mxu0 %v8242_v56  ;;  %v6105_v59 = vpop.f32.mrf.mxu1 }
0x19dd   :  { %9699 = vmatpush3.msra.mxu0 %v8242_v56  ;;  %9704 = vmatprep.mubr.msk.f32.mxu0 %vm338_vm1, %v6105_v59 }
0x19de   :  { %9700 = vmatprep.subr.mxu0 %v8241_v58 }
0x19df   :  { %9701 = vmatpush3.msra.mxu0 %v8241_v58 }
0x19e0   :  { %9702 = vmatprep.subr.mxu0 %v8240_v60 }
0x19e1   :  { %9703 = vmatpush3.msra.mxu0 %v8240_v60 }
0x19e2   :  { %9705 = vmatmul.mubr.msk.f32.vlgmr.msra.gmra.mxu0 %vm338_vm1, %v9691_v57  ;;  %9740 = vmatprep.subr.mxu0 %v10104_v46 }
0x19e3   :  { %9756 = vmatprep.mubr.msk.f32.mxu0 %vm10105_vm2, %v10104_v46  ;;  %9741 = vmatpush3.msra.mxu0 %v6291_v61 }
0x19e4   :  { %9742 = vmatprep.subr.mxu0 %v10104_v46 }
0x19e5   :  { %9743 = vmatpush3.msra.mxu0 %v6290_v62 }
0x19e6   :  { %9744 = vmatprep.subr.mxu0 %v10104_v46 }
0x19e7   :  { %9745 = vmatpush3.msra.mxu0 %v6289_v63 }
0x19e8   :  { %9746 = vmatprep.subr.mxu0 %v10104_v46 }
0x19e9   :  { %9747 = vmatpush3.msra.mxu0 %v6288_v0  ;;  %v6852_v0 = vld [vmem:[%s11402_s20 + $0x38] sm:$0xff] }
0x19ea   :  { %9748 = vmatprep.subr.mxu0 %v10104_v46 }
0x19eb   :  { %9749 = vmatpush3.msra.mxu0 %v6287_v1  ;;  %v6851_v1 = vld [vmem:[%s11402_s20 + $0x30] sm:$0xff] }
0x19ec   :  { %9750 = vmatprep.subr.mxu0 %v10104_v46 }
0x19ed   :  { %9751 = vmatpush3.msra.mxu0 %v6286_v2  ;;  %v6850_v2 = vld [vmem:[%s11402_s20 + $0x28] sm:$0xff] }
0x19ee   :  { %9752 = vmatprep.subr.mxu0 %v10104_v46 }
0x19ef   :  { %9753 = vmatpush3.msra.mxu0 %v6285_v3  ;;  %v6849_v3 = vld [vmem:[%s11402_s20 + $0x20] sm:$0xff] }
0x19f0   :  { %9754 = vmatprep.subr.mxu0 %v10104_v46 }
0x19f1   :  { %9755 = vmatpush3.msra.mxu0 %v6284_v29 }
0x19f2   :  { %9766 = vmatprep.subr.mxu0 %v10104_v46 }
0x1a96   :  { %v9680_v6 = vpop.f32.mrf.mxu0 }
0x1a97   :  { %v6029_v10 = vadd.f32 %v9680_v6, %v5853_v7  ;;  %v6846_v6 = vld [vmem:[%s11402_s20 + $0x8] sm:$0xff]  ;;  %v6845_v7 = vld [vmem:[%s11402_s20] sm:$0xff] }
0x1a98   :  { %v6019_v8 = vpop.f32.mrf.mxu0 }
0x1a99   :  { %v6028_v12 = vadd.f32 %v6019_v8, %v5848_v9 }
0x1aa2   :  { %v9706_v11 = vpop.f32.mrf.mxu0 }
0x1aa3   :  { %v6203_v14 = vadd.f32 %v9706_v11, %v6029_v10 }
0x1aa4   :  { %v6193_v15 = vpop.f32.mrf.mxu0 }
0x1aa5   :  { %vm6205_vm12 = vcmp.ge.f32.partialorder %v6203_v14, 0.0  ;;  %v6207_v16 = vmul.f32 0.2, %v6203_v14  ;;  %v6202_v17 = vadd.f32 %v6193_v15, %v6028_v12 }
0x1aa7   :  { %vm6204_vm13 = vcmp.ge.f32.partialorder %v6202_v17, 0.0  ;;  %v6206_v18 = vmul.f32 0.2, %v6202_v17  ;;  %v11102_v19 = vsel %vm6205_vm12, %v6203_v14, %v6207_v16 }
0x1aa8   :  { %9708 = vmatpush3.msra.mxu1 %v11102_v19 }
0x1aa9   :  { %9709 = vmatprep.subr.mxu1 %v10104_v46  ;;  %v11107_v21 = vsel %vm6204_vm13, %v6202_v17, %v6206_v18 }
0x1aaa   :  { %9710 = vmatpush3.msra.mxu1 %v11107_v21 }
0x1aab   :  { %9712 = vmatmul.mubr.msk.f32.vlgmr.msra.gmra.mxu1 %vm856_vm5, %v6210_v20  ;;  %9714 = vmatprep.subr.mxu1 %v10104_v46 }
0x1aac   :  { %9715 = vmatpush3.msra.mxu1 %v11102_v19  ;;  %9718 = vmatprep.mubr.msk.f32.mxu1 %vm10105_vm2, %v10104_v46 }
0x1aad   :  { %9716 = vmatprep.subr.mxu1 %v10104_v46 }
0x1aae   :  { %9717 = vmatpush3.msra.mxu1 %v11107_v21 }
0x1aaf   :  { %9719 = vmatmul.mubr.msk.f32.vlgmr.msra.gmra.mxu1 %vm856_vm5, %v8249_v22  ;;  %9721 = vmatprep.subr.mxu1 %v10104_v46  ;;  %v6928_v22 = vld [vmem:[%s11403_s7 + $0x8] sm:$0xff] }
0x1ab0   :  { %9722 = vmatpush3.msra.mxu1 %v8258_v23  ;;  %9737 = vmatprep.mubr.msk.f32.mxu1 %vm10105_vm2, %v10104_v46  ;;  %v6927_v23 = vld [vmem:[%s11403_s7] sm:$0xff] }
0x1ab1   :  { %9723 = vmatprep.subr.mxu1 %v10104_v46 }
0x1ab2   :  { %9724 = vmatpush3.msra.mxu1 %v8257_v24 }
0x1ab3   :  { %9725 = vmatprep.subr.mxu1 %v10104_v46 }
0x1ab4   :  { %9726 = vmatpush3.msra.mxu1 %v8256_v25 }
0x1ab5   :  { %9727 = vmatprep.subr.mxu1 %v10104_v46 }
0x1ab6   :  { %9728 = vmatpush3.msra.mxu1 %v8255_v26 }
0x1ab7   :  { %9729 = vmatprep.subr.mxu1 %v10104_v46 }
0x1ab8   :  { %9730 = vmatpush3.msra.mxu1 %v8254_v27 }
0x1ab9   :  { %9731 = vmatprep.subr.mxu1 %v10104_v46 }
0x1aba   :  { %9732 = vmatpush3.msra.mxu1 %v8253_v28 }
0x1abb   :  { %9733 = vmatprep.subr.mxu1 %v10104_v46 }
0x1abc   :  { %9734 = vmatpush3.msra.mxu1 %v8252_v30 }
0x1abd   :  { %9735 = vmatprep.subr.mxu1 %v10104_v46 }
0x1abe   :  { %9736 = vmatpush3.msra.mxu1 %v8251_v31 }
0x1abf   :  { %9759 = vmatprep.subr.mxu1 %v10104_v46 }
0x1b6b   :  { %v6280_v33 = vpop.f32.mrf.mxu1 }
0x1b6c   :  { %9757 = vmatmul.mubr.msk.f32.vlgmr.msra.gmra.mxu0 %vm1022_vm6, %v6280_v33 }
0x1b6d   :  { %v9713_v35 = vpop.f32.mrf.mxu1  ;;  %9767 = vmatpush3.msra.mxu0 %v8270_v32  ;;  %9782 = vmatprep.mubr.msk.f32.mxu0 %vm10105_vm2, %v10104_v46 }
0x1b6e   :  { %9768 = vmatprep.subr.mxu0 %v10104_v46 }
0x1b6f   :  { %v6363_v36 = vpop.f32.mrf.mxu1  ;;  %9769 = vmatpush3.msra.mxu0 %v8269_v34 }
0x1b70   :  { %9738 = vmatmul.mubr.msk.f32.vlgmr.msra.gmra.mxu1 %vm1022_vm6, %v6363_v36  ;;  %9770 = vmatprep.subr.mxu0 %v10104_v46 }
0x1b71   :  { %9760 = vmatpush3.msra.mxu1 %v11102_v19  ;;  %v9720_v38 = vpop.f32.mrf.mxu1  ;;  %9763 = vmatprep.mubr.msk.f32.mxu1 %vm10105_vm2, %v10104_v46 }
0x1b72   :  { %9761 = vmatprep.subr.mxu1 %v10104_v46  ;;  %9771 = vmatpush3.msra.mxu0 %v8268_v37 }
0x1b73   :  { %9762 = vmatpush3.msra.mxu1 %v11107_v21  ;;  %9772 = vmatprep.subr.mxu0 %v10104_v46 }
0x1b74   :  { %9785 = vmatprep.subr.mxu1 %v10104_v46  ;;  %9764 = vmatmul.mubr.msk.f32.vlgmr.msra.gmra.mxu1 %vm856_vm5, %v8261_v39 }
0x1b75   :  { %9786 = vmatpush3.msra.mxu1 %v11102_v19  ;;  %9789 = vmatprep.mubr.msk.f32.mxu1 %vm10105_vm2, %v10104_v46 }
0x1b76   :  { %9787 = vmatprep.subr.mxu1 %v10104_v46  ;;  %9773 = vmatpush3.msra.mxu0 %v8267_v42 }
0x1b77   :  { %9788 = vmatpush3.msra.mxu1 %v11107_v21  ;;  %9774 = vmatprep.subr.mxu0 %v10104_v46 }
0x1b78   :  { %9790 = vmatmul.mubr.msk.f32.vlgmr.msra.gmra.mxu1 %vm856_vm5, %v8272_v40  ;;  %9792 = vmatprep.subr.mxu1 %v10104_v46 }
0x1b79   :  { %9793 = vmatpush3.msra.mxu1 %v8281_v41  ;;  %9808 = vmatprep.mubr.msk.f32.mxu1 %vm10105_vm2, %v10104_v46 }
0x1b7a   :  { %9794 = vmatprep.subr.mxu1 %v10104_v46  ;;  %9775 = vmatpush3.msra.mxu0 %v8266_v44 }
0x1b7b   :  { %9795 = vmatpush3.msra.mxu1 %v8280_v43  ;;  %9776 = vmatprep.subr.mxu0 %v10104_v46  ;;  %v7089_v43 = vld [vmem:[%s11404_s10] sm:$0x1] }
0x1b7c   :  { %9796 = vmatprep.subr.mxu1 %v10104_v46  ;;  %9777 = vmatpush3.msra.mxu0 %v8265_v47  ;;  %v7166_v47 = vld [vmem:[%s11405_s11] sm:$0x1] }
0x1b7d   :  { %9797 = vmatpush3.msra.mxu1 %v8279_v45  ;;  %9778 = vmatprep.subr.mxu0 %v10104_v46 }
0x1b7e   :  { %9798 = vmatprep.subr.mxu1 %v10104_v46  ;;  %9779 = vmatpush3.msra.mxu0 %v8264_v49 }
0x1b7f   :  { %9799 = vmatpush3.msra.mxu1 %v8278_v48  ;;  %9780 = vmatprep.subr.mxu0 %v10104_v46 }
0x1b80   :  { %9800 = vmatprep.subr.mxu1 %v10104_v46  ;;  %9781 = vmatpush3.msra.mxu0 %v8263_v51 }
0x1b81   :  { %9801 = vmatpush3.msra.mxu1 %v8277_v50  ;;  %9811 = vmatprep.subr.mxu0 %v10104_v46 }
0x1b82   :  { %9802 = vmatprep.subr.mxu1 %v10104_v46 }
0x1b83   :  { %9803 = vmatpush3.msra.mxu1 %v8276_v52 }
0x1b84   :  { %9804 = vmatprep.subr.mxu1 %v10104_v46 }
0x1b85   :  { %9805 = vmatpush3.msra.mxu1 %v8275_v53 }
0x1b86   :  { %9806 = vmatprep.subr.mxu1 %v10104_v46 }
0x1b87   :  { %9807 = vmatpush3.msra.mxu1 %v8274_v54 }
0x1b88   :  { %9830 = vmatprep.subr.mxu1 %v10104_v46 }
0x1c2c   :  { %v6518_v55 = vpop.f32.mrf.mxu0 }
0x1c2e   :  { %v9758_v56 = vpop.f32.mrf.mxu0 }
0x1c30   :  { %v6445_v57 = vpop.f32.mrf.mxu1 }
0x1c31   :  { %v6519_v58 = vadd.f32 %v6518_v55, %v6445_v57  ;;  %v8289_v57 = vld [vmem:[%s11406_s15 + $0x2] sm:$0x3] }
0x1c32   :  { %v9739_v59 = vpop.f32.mrf.mxu1 }
0x1c34   :  { %v6593_v60 = vpop.f32.mrf.mxu1 }
0x1c35   :  { %9783 = vmatmul.mubr.msk.f32.vlgmr.msra.gmra.mxu0 %vm1022_vm6, %v6593_v60  ;;  %v8298_v60 = vld [vmem:[%s10286_s12 + $0x78] sm:$0xff] }
0x1c36   :  { %v9765_v61 = vpop.f32.mrf.mxu1  ;;  %9827 = vmatprep.mubr.msk.f32.mxu0 %vm10105_vm2, %v10104_v46  ;;  %9812 = vmatpush3.msra.mxu0 %v6852_v0 }
0x1c37   :  { %9813 = vmatprep.subr.mxu0 %v10104_v46  ;;  %v7334_v61 = vld [vmem:[%s10286_s12 + $0x38] sm:$0xff] }
0x1c38   :  { %v6751_v62 = vpop.f32.mrf.mxu1  ;;  %9814 = vmatpush3.msra.mxu0 %v6851_v1 }
0x1c39   :  { %9809 = vmatmul.mubr.msk.f32.vlgmr.msra.gmra.mxu1 %vm1022_vm6, %v6751_v62  ;;  %9815 = vmatprep.subr.mxu0 %v10104_v46  ;;  %v7333_v62 = vld [vmem:[%s10286_s12 + $0x30] sm:$0xff] }
0x1c3a   :  { %v9791_v63 = vpop.f32.mrf.mxu1  ;;  %9834 = vmatprep.mubr.msk.f32.mxu1 %vm10105_vm2, %v10104_v46  ;;  %9816 = vmatpush3.msra.mxu0 %v6850_v2 }
0x1c3b   :  { %9817 = vmatprep.subr.mxu0 %v10104_v46  ;;  %9831 = vmatpush3.msra.mxu1 %v6928_v22  ;;  %v8296_v63 = vld [vmem:[%s10286_s12 + $0x68] sm:$0xff] }
0x1c3c   :  { %9818 = vmatpush3.msra.mxu0 %v6849_v3  ;;  %9832 = vmatprep.subr.mxu1 %v10104_v46 }
0x1c3d   :  { %9819 = vmatprep.subr.mxu0 %v10104_v46  ;;  %9833 = vmatpush3.msra.mxu1 %v6927_v23 }
0x1c3e   :  { %9820 = vmatpush3.msra.mxu0 %v6848_v4  ;;  %9837 = vmatprep.subr.mxu1 %v10104_v46 }
0x1c3f   :  { %9821 = vmatprep.subr.mxu0 %v10104_v46 }
0x1c40   :  { %9822 = vmatpush3.msra.mxu0 %v6847_v5 }
0x1c41   :  { %9823 = vmatprep.subr.mxu0 %v10104_v46 }
0x1c42   :  { %9824 = vmatpush3.msra.mxu0 %v6846_v6 }
0x1c43   :  { %9825 = vmatprep.subr.mxu0 %v10104_v46 }
0x1c44   :  { %9826 = vmatpush3.msra.mxu0 %v6845_v7 }
0x1c45   :  { %9856 = vmatprep.subr.mxu0 %v10104_v46 }
0x1cf5   :  { %v6675_v8 = vpop.f32.mrf.mxu0 }
0x1cf6   :  { %v6679_v10 = vadd.f32 %v6675_v8, %v6519_v58  ;;  %v7253_v58 = vld [vmem:[%s11406_s15] sm:$0x3] }
0x1cf7   :  { %v9784_v9 = vpop.f32.mrf.mxu0  ;;  %v8291_v8 = vld [vmem:[%s10286_s12 + $0x40] sm:$0xff] }
0x1cf8   :  { %v7328_v9 = vld [vmem:[%s10286_s12 + $0x8] sm:$0xff] }
0x1cf9   :  { %v6833_v11 = vpop.f32.mrf.mxu1 }
0x1cfa   :  { %v6837_v12 = vadd.f32 %v6833_v11, %v6679_v10  ;;  %v7327_v10 = vld [vmem:[%s10286_s12] sm:$0xff] }
0x1cfb   :  { %v9810_v14 = vpop.f32.mrf.mxu1 }
0x1cfc   :  { %v6838_v15 = vsel %vm1022_vm6, %v6837_v12, 0.0  ;;  %v8310_v14 = vld [vmem:[%s10286_s12 + $0xb8] sm:$0xff] }
0x1cfd   :  { %v6839_v16 = vrot.slane %v6838_v15, 4 }
0x1cff   :  { %v6840_v17 = vadd.f32 %v6839_v16, %v6838_v15  ;;  %v8301_v16 = vld [vmem:[%s11406_s15 + $0x4] sm:$0x3] }
0x1d01   :  { %v6841_v18 = vrot.slane %v6840_v17, 2 }
0x1d03   :  { %v6842_v19 = vadd.f32 %v6841_v18, %v6840_v17  ;;  %v8309_v18 = vld [vmem:[%s10286_s12 + $0xb0] sm:$0xff] }
0x1d05   :  { %v6843_v20 = vrot.slane %v6842_v19, 1 }
0x1d07   :  { %v6844_v21 = vadd.f32 %v6843_v20, %v6842_v19  ;;  %v8308_v19 = vld [vmem:[%s10286_s12 + $0xa8] sm:$0xff]  ;;  %v8312_v20 = vld [vmem:[%s11406_s15 + $0x6] sm:$0x3] }
0x1d09   :  { %9828 = vmatmul.mubr.msk.f32.vlgmr.msra.gmra.mxu0 %vm1022_vm6, %v6844_v21  ;;  %v8321_v21 = vld [vmem:[%s10286_s12 + $0xf8] sm:$0xff] }
0x1d0a   :  { %9860 = vmatprep.mubr.msk.f32.mxu0 %vm10105_vm2, %v10104_v46  ;;  %9857 = vmatpush3.msra.mxu0 %v6928_v22 }
0x1d0b   :  { %9858 = vmatprep.subr.mxu0 %v10104_v46 }
0x1d0c   :  { %9859 = vmatpush3.msra.mxu0 %v6927_v23 }
0x1d0d   :  { %9863 = vmatprep.subr.mxu0 %v10104_v46 }
0x1dc9   :  { %v6922_v24 = vpop.f32.mrf.mxu0 }
0x1dca   :  { %v6926_v25 = vmul.f32 0.03125, %v6922_v24  ;;  %v8306_v24 = vld [vmem:[%s10286_s12 + $0x98] sm:$0xff] }
0x1dcb   :  { %v9829_v26 = vpop.f32.mrf.mxu0 }
0x1dcc   :  { %9835 = vmatmul.mubr.msk.f32.vlgmr.msra.gmra.mxu1 %vm856_vm5, %v6926_v25  ;;  %v8319_v25 = vld [vmem:[%s10286_s12 + $0xe8] sm:$0xff]  ;;  %v8305_v26 = vld [vmem:[%s10286_s12 + $0x90] sm:$0xff] }
0x1dcd   :  { %9838 = vmatpush3.msra.mxu1 %v6852_v0  ;;  %9853 = vmatprep.mubr.msk.f32.mxu1 %vm10105_vm2, %v10104_v46  ;;  %v7332_v0 = vld [vmem:[%s10286_s12 + $0x28] sm:$0xff] }
0x1dce   :  { %9839 = vmatprep.subr.mxu1 %v10104_v46 }
0x1dcf   :  { %9840 = vmatpush3.msra.mxu1 %v6851_v1  ;;  %v8295_v1 = vld [vmem:[%s10286_s12 + $0x60] sm:$0xff] }
0x1dd0   :  { %9841 = vmatprep.subr.mxu1 %v10104_v46 }
0x1dd1   :  { %9842 = vmatpush3.msra.mxu1 %v6850_v2  ;;  %v7331_v2 = vld [vmem:[%s10286_s12 + $0x20] sm:$0xff] }
0x1dd2   :  { %9843 = vmatprep.subr.mxu1 %v10104_v46 }
0x1dd3   :  { %9844 = vmatpush3.msra.mxu1 %v6849_v3  ;;  %v8294_v3 = vld [vmem:[%s10286_s12 + $0x58] sm:$0xff] }
0x1dd4   :  { %9845 = vmatprep.subr.mxu1 %v10104_v46 }
0x1dd5   :  { %9846 = vmatpush3.msra.mxu1 %v6848_v4  ;;  %v7330_v4 = vld [vmem:[%s10286_s12 + $0x18] sm:$0xff] }
0x1dd6   :  { %9847 = vmatprep.subr.mxu1 %v10104_v46 }
0x1dd7   :  { %9848 = vmatpush3.msra.mxu1 %v6847_v5  ;;  %v8293_v5 = vld [vmem:[%s10286_s12 + $0x50] sm:$0xff] }
0x1dd8   :  { %9849 = vmatprep.subr.mxu1 %v10104_v46 }
0x1dd9   :  { %9850 = vmatpush3.msra.mxu1 %v6846_v6  ;;  %v7329_v6 = vld [vmem:[%s10286_s12 + $0x10] sm:$0xff] }
0x1dda   :  { %9851 = vmatprep.subr.mxu1 %v10104_v46 }
0x1ddb   :  { %9852 = vmatpush3.msra.mxu1 %v6845_v7  ;;  %v8292_v7 = vld [vmem:[%s10286_s12 + $0x48] sm:$0xff] }
0x1ddc   :  { %9875 = vmatprep.subr.mxu1 %v10104_v46 }
0x1e8c   :  { %v6998_v27 = vpop.f32.mrf.mxu1 }
0x1e8d   :  { %v7005_v28 = vrot.slane %v6998_v27, %v10550_v13  ;;  %v8318_v27 = vld [vmem:[%s10286_s12 + $0xe0] sm:$0xff] }
0x1e8e   :  { %v9836_v29 = vpop.f32.mrf.mxu1 }
0x1e8f   :  { %v7006_v30 = vsub.f32 %v6837_v12, %v7005_v28  ;;  %v8304_v28 = vld [vmem:[%s10286_s12 + $0x88] sm:$0xff]  ;;  %v8317_v29 = vld [vmem:[%s10286_s12 + $0xd8] sm:$0xff] }
0x1e91   :  { %v7007_v31 = vmul.f32 %v7006_v30, %v7006_v30 }
0x1e93   :  { %v7008_v32 = vsel %vm1022_vm6, %v7007_v31, 0.0  ;;  %v8316_v31 = vld [vmem:[%s10286_s12 + $0xd0] sm:$0xff] }
0x1e94   :  { %v7009_v33 = vrot.slane %v7008_v32, 4 }
0x1e96   :  { %v7010_v34 = vadd.f32 %v7009_v33, %v7008_v32  ;;  %v8315_v32 = vld [vmem:[%s10286_s12 + $0xc8] sm:$0xff]  ;;  %v8314_v33 = vld [vmem:[%s10286_s12 + $0xc0] sm:$0xff] }
0x1e98   :  { %v7011_v35 = vrot.slane %v7010_v34, 2 }
0x1e9a   :  { %v7012_v36 = vadd.f32 %v7011_v35, %v7010_v34 }
0x1e9c   :  { %v7013_v37 = vrot.slane %v7012_v36, 1 }
0x1e9e   :  { %v7014_v38 = vadd.f32 %v7013_v37, %v7012_v36 }
0x1ea0   :  { %9854 = vmatmul.mubr.msk.f32.vlgmr.msra.gmra.mxu1 %vm1022_vm6, %v7014_v38 }
0x1ea1   :  { %9877 = vmatprep.mubr.msk.f32.mxu1 %vm10105_vm2, %v10104_v46 }
0x1f60   :  { %v7084_v39 = vpop.f32.mrf.mxu1 }
0x1f61   :  { %v7088_v40 = vmul.f32 0.03125, %v7084_v39 }
0x1f62   :  { %v9855_v41 = vpop.f32.mrf.mxu1 }
0x1f63   :  { %v7090_v42 = vadd.f32 1e-05, %v7088_v40 }
0x1f65   :  { %10021 = vrsqrt.f32 %v7090_v42 }
0x1f72   :  { %v10022_v44 = vpop.eup %10021 }
0x1f73   :  { %v7092_v45 = vmul.f32 %v10022_v44, %v7089_v43 }
0x1f75   :  { %9861 = vmatmul.mubr.msk.f32.vlgmr.msra.gmra.mxu0 %vm856_vm5, %v7092_v45 }
0x1f76   :  { %9864 = vmatpush3.msra.mxu0 %v6928_v22  ;;  %9867 = vmatprep.mubr.msk.f32.mxu0 %vm10105_vm2, %v10104_v46  ;;  %v8307_v22 = vld [vmem:[%s10286_s12 + $0xa0] sm:$0xff] }
0x1f77   :  { %9865 = vmatprep.subr.mxu0 %v10104_v46 }
0x1f78   :  { %9866 = vmatpush3.msra.mxu0 %v6927_v23  ;;  %v8320_v23 = vld [vmem:[%s10286_s12 + $0xf0] sm:$0xff] }
0x1f79   :  { %9868 = vmatmul.mubr.msk.f32.vlgmr.msra.gmra.mxu0 %vm856_vm5, %v7166_v47  ;;  %9870 = vmatprep.subr.mxu0 %v10104_v46 }
0x1f7a   :  { %9872 = vmatprep.mubr.msk.f32.mxu0 %vm10105_vm2, %v10104_v46 }
0x2035   :  { %v7162_v48 = vpop.f32.mrf.mxu0 }
0x2036   :  { %v7243_v49 = vrot.slane %v7162_v48, %v10550_v13 }
0x2037   :  { %v9862_v50 = vpop.f32.mrf.mxu0 }
0x2038   :  { %v7244_v52 = vmul.f32 %v7243_v49, %v7006_v30  ;;  %v8303_v30 = vld [vmem:[%s10286_s12 + $0x80] sm:$0xff] }
0x2039   :  { %v7236_v51 = vpop.f32.mrf.mxu0 }
0x203a   :  { %v7248_v53 = vrot.slane %v7236_v51, %v10550_v13  ;;  %v8297_v13 = vld [vmem:[%s10286_s12 + $0x70] sm:$0xff] }
0x203b   :  { %v9869_v54 = vpop.f32.mrf.mxu0 }
0x203c   :  { %v7249_v55 = vadd.f32 %v7248_v53, %v7244_v52 }
0x203e   :  { %v7251_v56 = vmul.f32 0.2, %v7249_v55  ;;  %vm7250_vm14 = vcmp.ge.f32.partialorder %v7249_v55, 0.0 }
0x2040   :  { %v11256_v59 = vsel %vm7250_vm14, %v7249_v55, %v7251_v56 }
0x2041   :  { %9871 = vmatpush3.msra.mxu0 %v11256_v59  ;;  %9876 = vmatpush3.msra.mxu1 %v11256_v59 }
0x2042   :  { %9878 = vmatmul.mubr.msk.f32.vlgmr.msra.gmra.mxu1 %vm1901_vm8, %v8289_v57  ;;  %9873 = vmatmul.mubr.msk.f32.vlgmr.msra.gmra.mxu0 %vm1901_vm8, %v7253_v58 }
0x2043   :  { %9880 = vmatprep.subr.mxu0 %v10104_v46  ;;  %9899 = vmatprep.subr.mxu1 %v10104_v46 }
0x2044   :  { %9881 = vmatpush3.msra.mxu0 %v8298_v60  ;;  %9900 = vmatpush3.msra.mxu1 %v7334_v61 }
0x2045   :  { %9882 = vmatprep.subr.mxu0 %v10104_v46  ;;  %9901 = vmatprep.subr.mxu1 %v10104_v46 }
0x2046   :  { %9883 = vmatpush3.msra.mxu0 %v8297_v13  ;;  %9902 = vmatpush3.msra.mxu1 %v7333_v62 }
0x2047   :  { %9884 = vmatprep.subr.mxu0 %v10104_v46  ;;  %9903 = vmatprep.subr.mxu1 %v10104_v46 }
0x2048   :  { %9885 = vmatpush3.msra.mxu0 %v8296_v63  ;;  %9904 = vmatpush3.msra.mxu1 %v7332_v0 }
0x2049   :  { %9886 = vmatprep.subr.mxu0 %v10104_v46  ;;  %9905 = vmatprep.subr.mxu1 %v10104_v46 }
0x204a   :  { %9887 = vmatpush3.msra.mxu0 %v8295_v1  ;;  %9906 = vmatpush3.msra.mxu1 %v7331_v2 }
0x204b   :  { %9888 = vmatprep.subr.mxu0 %v10104_v46  ;;  %9907 = vmatprep.subr.mxu1 %v10104_v46 }
0x204c   :  { %9889 = vmatpush3.msra.mxu0 %v8294_v3  ;;  %9908 = vmatpush3.msra.mxu1 %v7330_v4 }
0x204d   :  { %9890 = vmatprep.subr.mxu0 %v10104_v46  ;;  %9909 = vmatprep.subr.mxu1 %v10104_v46 }
0x204e   :  { %9891 = vmatpush3.msra.mxu0 %v8293_v5  ;;  %9910 = vmatpush3.msra.mxu1 %v7329_v6 }
0x204f   :  { %9892 = vmatprep.subr.mxu0 %v10104_v46  ;;  %9896 = vmatprep.mubr.msk.f32.mxu0 %vm10105_vm2, %v10104_v46 }
0x2050   :  { %9893 = vmatpush3.msra.mxu0 %v8292_v7  ;;  %9911 = vmatprep.subr.mxu1 %v10104_v46 }
0x2051   :  { %9894 = vmatprep.subr.mxu0 %v10104_v46  ;;  %9915 = vmatprep.mubr.msk.f32.mxu1 %vm10105_vm2, %v10104_v46 }
0x2052   :  { %9895 = vmatpush3.msra.mxu0 %v8291_v8  ;;  %9912 = vmatpush3.msra.mxu1 %v7328_v9 }
0x2053   :  { %9918 = vmatprep.subr.mxu0 %v10104_v46  ;;  %9913 = vmatprep.subr.mxu1 %v10104_v46 }
0x2054   :  { %9914 = vmatpush3.msra.mxu1 %v7327_v10 }
0x2055   :  { %9923 = vmatprep.subr.mxu1 %v10104_v46 }
0x2102   :  { %v7406_v11 = vpop.f32.mrf.mxu1  ;;  %v7323_v12 = vpop.f32.mrf.mxu0 }
0x2103   :  { %9897 = vmatmul.mubr.msk.f32.vlgmr.msra.gmra.mxu0 %vm1022_vm6, %v7406_v11  ;;  %9916 = vmatmul.mubr.msk.f32.vlgmr.msra.gmra.mxu1 %vm1022_vm6, %v7323_v12 }
0x2104   :  { %9919 = vmatpush3.msra.mxu0 %v11256_v59  ;;  %v9879_v15 = vpop.f32.mrf.mxu1  ;;  %9920 = vmatprep.mubr.msk.f32.mxu0 %vm10105_vm2, %v10104_v46  ;;  %v9874_v17 = vpop.f32.mrf.mxu0 }
0x2105   :  { %9942 = vmatprep.subr.mxu0 %v10104_v46  ;;  %9924 = vmatpush3.msra.mxu1 %v8310_v14 }
0x2106   :  { %9925 = vmatprep.subr.mxu1 %v10104_v46  ;;  %9939 = vmatprep.mubr.msk.f32.mxu1 %vm10105_vm2, %v10104_v46 }
0x2107   :  { %9921 = vmatmul.mubr.msk.f32.vlgmr.msra.gmra.mxu0 %vm1901_vm8, %v8301_v16  ;;  %9926 = vmatpush3.msra.mxu1 %v8309_v18 }
0x2108   :  { %9943 = vmatpush3.msra.mxu0 %v11256_v59  ;;  %9944 = vmatprep.mubr.msk.f32.mxu0 %vm10105_vm2, %v10104_v46 }
0x2109   :  { %9927 = vmatprep.subr.mxu1 %v10104_v46  ;;  %9947 = vmatprep.subr.mxu0 %v10104_v46 }
0x210a   :  { %9928 = vmatpush3.msra.mxu1 %v8308_v19 }
0x210b   :  { %9945 = vmatmul.mubr.msk.f32.vlgmr.msra.gmra.mxu0 %vm1901_vm8, %v8312_v20  ;;  %9929 = vmatprep.subr.mxu1 %v10104_v46 }
0x210c   :  { %9948 = vmatpush3.msra.mxu0 %v8321_v21  ;;  %9930 = vmatpush3.msra.mxu1 %v8307_v22 }
0x210d   :  { %9949 = vmatprep.subr.mxu0 %v10104_v46  ;;  %9931 = vmatprep.subr.mxu1 %v10104_v46 }
0x210e   :  { %9950 = vmatpush3.msra.mxu0 %v8320_v23  ;;  %9932 = vmatpush3.msra.mxu1 %v8306_v24 }
0x210f   :  { %9951 = vmatprep.subr.mxu0 %v10104_v46  ;;  %9933 = vmatprep.subr.mxu1 %v10104_v46 }
0x2110   :  { %9952 = vmatpush3.msra.mxu0 %v8319_v25  ;;  %9963 = vmatprep.mubr.msk.f32.mxu0 %vm10105_vm2, %v10104_v46 }
0x2111   :  { %9953 = vmatprep.subr.mxu0 %v10104_v46  ;;  %9934 = vmatpush3.msra.mxu1 %v8305_v26 }
0x2112   :  { %9954 = vmatpush3.msra.mxu0 %v8318_v27  ;;  %9935 = vmatprep.subr.mxu1 %v10104_v46 }
0x2113   :  { %9955 = vmatprep.subr.mxu0 %v10104_v46  ;;  %9936 = vmatpush3.msra.mxu1 %v8304_v28 }
0x2114   :  { %9956 = vmatpush3.msra.mxu0 %v8317_v29  ;;  %9937 = vmatprep.subr.mxu1 %v10104_v46 }
0x2115   :  { %9957 = vmatprep.subr.mxu0 %v10104_v46  ;;  %9938 = vmatpush3.msra.mxu1 %v8303_v30 }
0x2116   :  { %9958 = vmatpush3.msra.mxu0 %v8316_v31 }
0x2117   :  { %9959 = vmatprep.subr.mxu0 %v10104_v46 }
0x2118   :  { %9960 = vmatpush3.msra.mxu0 %v8315_v32 }
0x2119   :  { %9961 = vmatprep.subr.mxu0 %v10104_v46 }
0x211a   :  { %9962 = vmatpush3.msra.mxu0 %v8314_v33 }
0x21c3   :  { %v7488_v34 = vpop.f32.mrf.mxu0  ;;  %v7561_v35 = vpop.f32.mrf.mxu1 }
0x21c4   :  { %v7562_v36 = vadd.f32 %v7561_v35, %v7488_v34 }
0x21c5   :  { %v9898_v37 = vpop.f32.mrf.mxu0  ;;  %v9917_v38 = vpop.f32.mrf.mxu1 }
0x21c7   :  { %v7636_v39 = vpop.f32.mrf.mxu0 }
0x21c8   :  { %9940 = vmatmul.mubr.msk.f32.vlgmr.msra.gmra.mxu1 %vm1022_vm6, %v7636_v39 }
0x21c9   :  { %v9922_v40 = vpop.f32.mrf.mxu0 }
0x21cb   :  { %v7794_v41 = vpop.f32.mrf.mxu0 }
0x21cc   :  { %9964 = vmatmul.mubr.msk.f32.vlgmr.msra.gmra.mxu0 %vm1022_vm6, %v7794_v41 }
0x21cd   :  { %v9946_v42 = vpop.f32.mrf.mxu0 }
0x21ce   :  { %10034 = shalt.err (!%p10031_p4)
}
0x21cf   :  { %7893 = dma.vmem_to_hbm [thread:$0]  %s7891_s18, 32, %s10296_s27, [#allocation3]  }
0x21d0   :  { %s10107_s12 = smov [#allocation4]  }
0x21d1   :  { %s7900_s23 = sshll.u32 %s10107_s12, 4  ;;  %s7901_s23 = int_to_ptr.vmem [resolvable:$true] %s7900_s23 }
0x21d2   :  { %s10043_s26 = scalar_lea.vmem %s7901_s23, 32  ;;  %p10048_p6 = scmp.lt.s32.totalorder %s7901_s23, %s7901_s23 }
0x21d3   :  { %p10044_p5 = scmp.ne.s32.totalorder %s7901_s23, %s10043_s26  ;;  %p10049_p7 = scmp.lt.s32.totalorder %s10043_s26, %s10043_s26 }
0x21d5   :  { %p10050_p8 = por %p10049_p7, %p10048_p6 }
0x21d7   :  { %p10051_p9 = pnand %p10050_p8, %p10044_p5 }
0x2288   :  { %v7718_v46 = vpop.f32.mrf.mxu1 }
0x2289   :  { %v7722_v44 = vadd.f32 %v7718_v46, %v7562_v36 }
0x228a   :  { %v9941_v43 = vpop.f32.mrf.mxu1 }
0x228c   :  { %v7876_v45 = vpop.f32.mrf.mxu0 }
0x228d   :  { %v7880_v47 = vadd.f32 %v7876_v45, %v7722_v44 }
0x228e   :  { %v9965_v48 = vpop.f32.mrf.mxu0 }
0x228f   :  { %7881 = vst.msk [vmem:[#allocation4] sm:$0x3] %vm2529_vm10, %v7880_v47 }
0x2290   :  { %10054 = shalt.err (!%p10051_p9)
}
0x2291   :  { %7903 = dma.vmem_to_hbm [thread:$0]  %s7901_s23, 32, %s10301_s4, [#allocation5]  }
0x2292   :  { %10063 = dma.done.wait [#allocation3], 32  }
0x2293   :  { %10064 = vsyncadd [#allocation3], 4294967264 }
0x2294   :  { %10065 = dma.done.wait [#allocation5], 32  }
0x2295   :  { %10066 = vsyncadd [#allocation5], 4294967264 }
0x2296   :  { %7912 = vsyncpa [#allocation3], 1 }
0x2297   :  { %7913 = vsyncpa [#allocation5], 1 }

</bundles_post_ra>
